<compile_context>
chip_gen: v7x
topology: tpu7x:2x2x1
jax: 0.10.0
libtpu: 0.0.40
codegen_flags: <defaults>
</compile_context>

<pallas_src>
import jax
import jax.numpy as jnp
import numpy as np
from jax.experimental import pallas as pl
from jax.experimental.pallas import tpu as pltpu

BN_EPS = 1e-5


# ----------------------------------------------------------------------------
# The single fused kernel (runs once per image via grid=(N,))
# ----------------------------------------------------------------------------
def _mcunet_kernel(xcol_ref,
                   c1w_ref, c1b_ref, c1s_ref,
                   d1w_ref, d1b_ref, p1w_ref, p1b_ref, s1_ref,
                   d2w_ref, d2b_ref, p2w_ref, p2b_ref, s2_ref,
                   d3w_ref, d3b_ref, p3w_ref, p3b_ref, s3_ref,
                   d4w_ref, d4b_ref, p4w_ref, p4b_ref, s4_ref,
                   d5w_ref, d5b_ref, p5w_ref, p5b_ref,
                   fcw_ref, fcb_ref,
                   out_ref):
    def pw(x, w_ref, b_ref):
        # 1x1 conv (+ column halo / column downsample, encoded in the blocked
        # weight) as one bf16 MXU matmul with f32 accumulation, then bias+ReLU6.
        y = jnp.dot(x.astype(jnp.bfloat16), w_ref[...],
                    preferred_element_type=jnp.float32)
        return jnp.clip(y + b_ref[...], 0.0, 6.0)

    def row_pad(sel_ref, y):
        # Row halo insertion / row downsample as a tiny f32 matmul (ReLU6
        # commutes with it: rows are only copied or zeroed, never mixed).
        return jnp.dot(sel_ref[...], y, preferred_element_type=jnp.float32)

    def dw3x3(xp, w_ref, b_ref, H, W, C):
        # 3x3 depthwise conv on a zero-padded lane-dense value xp: [H+2,(W+2)*C].
        # dx taps = lane rolls (XLU, overlap with VPU); dy taps = 3 row slices
        # of the dx-accumulated rows.  Bias + ReLU6 fused.  Stride is handled
        # downstream (full-res compute; downsample folded into the next matmuls).
        Lp = xp.shape[-1]
        xs = (xp,
              pltpu.roll(xp, shift=(-C) % Lp, axis=1),
              pltpu.roll(xp, shift=(-2 * C) % Lp, axis=1))
        acc = None
        for dy in range(3):
            row = None
            for dx in range(3):
                term = xs[dx] * w_ref[3 * dy + dx]          # [9, Lp] pre-tiled weights
                row = term if row is None else row + term
            row = row[dy:dy + H, :]
            acc = row if acc is None else acc + row
        return jnp.clip(acc[:, :W * C] + b_ref[...], 0.0, 6.0)

    xcol = xcol_ref[0]                                      # [24, 768] f32 im2col rows
    # conv_bn(3->16, s2): blocked matmul emits block1's padded input directly.
    a1 = row_pad(c1s_ref, pw(xcol, c1w_ref, c1b_ref))       # [26, 416]
    # block1: dw16 s1 + pw 16->8  -> block2's (full-res) padded input.
    d1 = dw3x3(a1, d1w_ref, d1b_ref, 24, 24, 16)            # [24, 384]
    a2 = row_pad(s1_ref, pw(d1, p1w_ref, p1b_ref))          # [26, 208]
    # block2: dw8 s2 (computed at full res) + pw 8->16 on even rows/cols.
    d2 = dw3x3(a2, d2w_ref, d2b_ref, 24, 24, 8)             # [24, 192]
    a3 = row_pad(s2_ref, pw(d2, p2w_ref, p2b_ref))          # [14, 224]
    # block3: dw16 s1 + pw 16->16.
    d3 = dw3x3(a3, d3w_ref, d3b_ref, 12, 12, 16)            # [12, 192]
    a4 = row_pad(s3_ref, pw(d3, p3w_ref, p3b_ref))          # [14, 224]
    # block4: dw16 s2 (full res) + pw 16->16 on even rows/cols.
    d4 = dw3x3(a4, d4w_ref, d4b_ref, 12, 12, 16)            # [12, 192]
    a5 = row_pad(s4_ref, pw(d4, p4w_ref, p4b_ref))          # [8, 128]
    # block5: dw16 s1 + pw 16->16 (no halo: the avgpool is next, and it must
    # stay AFTER this ReLU6 -- do not hoist).
    d5 = dw3x3(a5, d5w_ref, d5b_ref, 6, 6, 16)              # [6, 96]
    y5 = pw(d5, p5w_ref, p5b_ref)                           # [6, 96]
    # AdaptiveAvgPool2d(1) + Dropout(identity) + Linear: the spatial mean is
    # folded into the pre-tiled, pre-scaled FC weight (fcw[w*16+c] = W[c]/36).
    feat = jnp.sum(y5, axis=0, keepdims=True)               # [1, 96]
    out_ref[0] = jnp.dot(feat, fcw_ref[...],
                         preferred_element_type=jnp.float32) + fcb_ref[...]


# ----------------------------------------------------------------------------
# Host-side constant construction (block weights, bias rows, row selectors)
# ----------------------------------------------------------------------------
def _pw_block(w, groups, stride, pad):
    """Expand a per-position matrix w [Cin, Cout] into the spatially blocked
    matmul weight mapping lane-dense rows [groups*Cin] ->
    [(groups//stride + 2*pad)*Cout]: applies w to every `stride`-th input
    column group and inserts `pad` zero column groups (next dw layer's halo)."""
    cin, cout = w.shape
    gout = groups // stride + 2 * pad
    blk = np.zeros((groups * cin, gout * cout), np.float32)
    for s in range(0, groups, stride):
        g = pad + s // stride
        blk[s * cin:(s + 1) * cin, g * cout:(g + 1) * cout] = w
    return blk


def _bias_row(b, groups, stride, pad):
    """Matching bias row: bias at interior column groups, zeros in the halo."""
    cout = b.shape[0]
    gout = groups // stride + 2 * pad
    row = np.zeros((1, gout * cout), np.float32)
    for g in range(pad, pad + groups // stride):
        row[0, g * cout:(g + 1) * cout] = b
    return row


def _row_sel(rows, stride, pad):
    """Row selector: picks every `stride`-th row and adds `pad` zero halo rows."""
    rout = rows // stride + 2 * pad
    sel = np.zeros((rout, rows), np.float32)
    for i in range(rows // stride):
        sel[pad + i, stride * i] = 1.0
    return sel


def make_divisible(v, divisor=8, min_value=None):
    if min_value is None:
        min_value = divisor
    new_v = max(min_value, int(v + divisor / 2) // divisor * divisor)
    if new_v < 0.9 * v:
        new_v += divisor
    return new_v


def init_params(key, num_classes=6, input_channels=3, width_mult=0.5, img_size=48):
    """Mirrors MCUNet.__init__ shapes and _initialize_weights (kaiming fan_out
    convs, N(0, 0.01) Linear); eval-mode BN folded into the conv weights."""
    bn_scale = lambda c: np.full((c,), 1.0 / np.sqrt(1.0 + BN_EPS), np.float32)

    c0 = make_divisible(32 * width_mult)                       # 16
    block_config = [[1, make_divisible(16 * width_mult), 1, 1],
                    [6, make_divisible(24 * width_mult), 2, 2],
                    [6, make_divisible(32 * width_mult), 2, 2]]
    blocks, cin = [], c0
    for _t, c, n, s in block_config:                           # t unused, as in the reference
        for i in range(n):
            blocks.append((cin, c, s if i == 0 else 1))
            cin = c
    # The fused kernel is specialized to exactly this topology.
    assert blocks == [(16, 8, 1), (8, 16, 2), (16, 16, 1), (16, 16, 2), (16, 16, 1)]
    assert img_size == 48 and input_channels == 3

    keys = iter(jax.random.split(key, 2 * len(blocks) + 2))
    p = {}

    # conv_bn(3 -> 16, stride 2): kaiming fan_out, BN scale folded in.
    sp = img_size // 2                                         # 24
    w1 = np.asarray(jax.random.normal(next(keys), (3, 3, input_channels, c0), jnp.float32))
    w1 = w1 * np.float32(np.sqrt(2.0 / (c0 * 9))) * bn_scale(c0)
    w1col = w1.reshape(9 * input_channels, c0)                 # row k = (dy*3+dx)*3 + cin
    w1col = np.pad(w1col, ((0, 32 - 9 * input_channels), (0, 0)))  # K 27 -> 32 (im2col pad)
    p["c1w"] = jnp.asarray(_pw_block(w1col, sp, 1, 1), jnp.bfloat16)   # [768, 416]
    p["c1b"] = jnp.asarray(_bias_row(np.zeros((c0,), np.float32), sp, 1, 1))
    p["c1s"] = jnp.asarray(_row_sel(sp, 1, 1))                 # [26, 24]

    for bi, (ci, co, s) in enumerate(blocks, start=1):
        # depthwise 3x3 (+ BN fold): per-channel weights pre-tiled lane-dense
        # to one row per tap, [9, (W+2)*ci], matching the padded input width.
        wdw = np.asarray(jax.random.normal(next(keys), (9, ci), jnp.float32))
        wdw = wdw * np.float32(np.sqrt(2.0 / 9.0)) * bn_scale(ci)
        p[f"d{bi}w"] = jnp.asarray(np.tile(wdw, (1, sp + 2)))
        p[f"d{bi}b"] = jnp.asarray(np.zeros((1, sp * ci), np.float32))
        # pointwise 1x1 (+ BN fold) as a spatially blocked bf16 matmul weight
        # that also encodes the next layer's column halo and (for stride 2)
        # the even-column downsample.
        wpw = np.asarray(jax.random.normal(next(keys), (ci, co), jnp.float32))
        wpw = wpw * np.float32(np.sqrt(2.0 / co)) * bn_scale(co)[None, :]
        pad = 0 if bi == len(blocks) else 1
        p[f"p{bi}w"] = jnp.asarray(_pw_block(wpw, sp, s, pad), jnp.bfloat16)
        p[f"p{bi}b"] = jnp.asarray(_bias_row(np.zeros((co,), np.float32), sp, s, pad))
        if bi != len(blocks):
            p[f"s{bi}"] = jnp.asarray(_row_sel(sp, s, pad))
        sp = sp // s

    # Classifier: AdaptiveAvgPool2d(1) folded into a spatially tiled,
    # pre-scaled FC weight; Dropout(0.2) is identity at inference.
    wfc = np.asarray(jax.random.normal(next(keys), (blocks[-1][1], num_classes),
                                       jnp.float32)) * 0.01
    p["fcw"] = jnp.asarray(np.tile(wfc, (sp, 1)) / float(sp * sp))     # [96, ncls]
    p["fcb"] = jnp.asarray(np.zeros((1, num_classes), np.float32))
    return p


# ----------------------------------------------------------------------------
# Wrapper: one tiny XLA prologue (NCHW->im2col) + one pallas_call
# ----------------------------------------------------------------------------
def _im2col_conv1(x_nhwc):
    """3x3 / stride-2 / pad-1 im2col of the network input, laid out lane-dense
    per output row: [N, 24, 24*32] (each 32-lane group = 27 taps + 5 zeros)."""
    # TODO(synk): move this prologue in-kernel via strided ref loads to make the
    # network a zero-glue single launch.
    N, H, W, C = x_nhwc.shape
    Ho, Wo = H // 2, W // 2
    xp = jnp.pad(x_nhwc, ((0, 0), (1, 1), (1, 1), (0, 0)))
    taps = [xp[:, dy:dy + 2 * Ho - 1:2, dx:dx + 2 * Wo - 1:2, :]
            for dy in range(3) for dx in range(3)]
    xcol = jnp.concatenate(taps, axis=-1)                      # [N, 24, 24, 27]
    xcol = jnp.pad(xcol, ((0, 0), (0, 0), (0, 0), (0, 32 - 9 * C)))
    return xcol.reshape(N, Ho, Wo * 32)


_WEIGHT_ORDER = ("c1w", "c1b", "c1s",
                 "d1w", "d1b", "p1w", "p1b", "s1",
                 "d2w", "d2b", "p2w", "p2b", "s2",
                 "d3w", "d3b", "p3w", "p3b", "s3",
                 "d4w", "d4b", "p4w", "p4b", "s4",
                 "d5w", "d5b", "p5w", "p5b",
                 "fcw", "fcb")


@jax.jit
def mcunet_forward(x_nchw, params):
    """params is a flat dict of jnp arrays only (jit-safe pytree)."""
    x = jnp.transpose(x_nchw, (0, 2, 3, 1)).astype(jnp.float32)    # NCHW -> NHWC
    xcol = _im2col_conv1(x)                                        # [N, 24, 768]
    n = xcol.shape[0]
    ncls = params["fcb"].shape[1]
    weights = [params[k] for k in _WEIGHT_ORDER]

    in_specs = [pl.BlockSpec((1,) + xcol.shape[1:], lambda i: (i, 0, 0))]
    in_specs += [pl.BlockSpec(w.shape, lambda i: (0, 0)) for w in weights]

    out = pl.pallas_call(
        _mcunet_kernel,
        grid=(n,),
        out_shape=jax.ShapeDtypeStruct((n, 1, ncls), jnp.float32),
        in_specs=in_specs,
        out_specs=pl.BlockSpec((1, 1, ncls), lambda i: (i, 0, 0)),
        compiler_params=pltpu.CompilerParams(
            dimension_semantics=("parallel",)),
    )(xcol, *weights)
    return out.reshape(n, ncls)


if __name__ == "__main__":
    key = jax.random.PRNGKey(0)
    k_param, k_input = jax.random.split(key)

    params = init_params(k_param, num_classes=6, input_channels=3,
                         width_mult=0.5, img_size=48)

    # Input matches the PyTorch module's convention: NCHW, 3 channels, 48x48.
    x = jax.random.normal(k_input, (2, 3, 48, 48), jnp.float32)

    out = jax.block_until_ready(mcunet_forward(x, params))
    assert out.shape == (2, 6), out.shape
    assert bool(jnp.all(jnp.isfinite(out)))
    print("KERNEL_OK")
</pallas_src>

<mosaic_0001>
module attributes {stable_mosaic.version = 11 : i64} {
  func.func @_mcunet_kernel(%arg0: i32, %arg1: memref<1x24x768xf32, #tpu.memory_space<vmem>>, %arg2: memref<768x416xbf16, #tpu.memory_space<vmem>>, %arg3: memref<1x416xf32, #tpu.memory_space<vmem>>, %arg4: memref<26x24xf32, #tpu.memory_space<vmem>>, %arg5: memref<9x416xf32, #tpu.memory_space<vmem>>, %arg6: memref<1x384xf32, #tpu.memory_space<vmem>>, %arg7: memref<384x208xbf16, #tpu.memory_space<vmem>>, %arg8: memref<1x208xf32, #tpu.memory_space<vmem>>, %arg9: memref<26x24xf32, #tpu.memory_space<vmem>>, %arg10: memref<9x208xf32, #tpu.memory_space<vmem>>, %arg11: memref<1x192xf32, #tpu.memory_space<vmem>>, %arg12: memref<192x224xbf16, #tpu.memory_space<vmem>>, %arg13: memref<1x224xf32, #tpu.memory_space<vmem>>, %arg14: memref<14x24xf32, #tpu.memory_space<vmem>>, %arg15: memref<9x224xf32, #tpu.memory_space<vmem>>, %arg16: memref<1x192xf32, #tpu.memory_space<vmem>>, %arg17: memref<192x224xbf16, #tpu.memory_space<vmem>>, %arg18: memref<1x224xf32, #tpu.memory_space<vmem>>, %arg19: memref<14x12xf32, #tpu.memory_space<vmem>>, %arg20: memref<9x224xf32, #tpu.memory_space<vmem>>, %arg21: memref<1x192xf32, #tpu.memory_space<vmem>>, %arg22: memref<192x128xbf16, #tpu.memory_space<vmem>>, %arg23: memref<1x128xf32, #tpu.memory_space<vmem>>, %arg24: memref<8x12xf32, #tpu.memory_space<vmem>>, %arg25: memref<9x128xf32, #tpu.memory_space<vmem>>, %arg26: memref<1x96xf32, #tpu.memory_space<vmem>>, %arg27: memref<96x96xbf16, #tpu.memory_space<vmem>>, %arg28: memref<1x96xf32, #tpu.memory_space<vmem>>, %arg29: memref<96x6xf32, #tpu.memory_space<vmem>>, %arg30: memref<1x6xf32, #tpu.memory_space<vmem>>, %arg31: memref<1x1x6xf32, #tpu.memory_space<vmem>>) attributes {dimension_semantics = [#tpu.dimension_semantics<parallel>], iteration_bounds = array<i64: 2>, scalar_prefetch = 0 : i64, scratch_operands = 0 : i64, tpu.core_type = #tpu.core_type<tc>, window_params = [{transform_indices = @transform_0, window_bounds = array<i64: 1, 24, 768>}, {pipeline_mode = #tpu.pipeline_mode<synchronous>, transform_indices = @transform_1, window_bounds = array<i64: 768, 416>}, {pipeline_mode = #tpu.pipeline_mode<synchronous>, transform_indices = @transform_2, window_bounds = array<i64: 1, 416>}, {pipeline_mode = #tpu.pipeline_mode<synchronous>, transform_indices = @transform_3, window_bounds = array<i64: 26, 24>}, {pipeline_mode = #tpu.pipeline_mode<synchronous>, transform_indices = @transform_4, window_bounds = array<i64: 9, 416>}, {pipeline_mode = #tpu.pipeline_mode<synchronous>, transform_indices = @transform_5, window_bounds = array<i64: 1, 384>}, {pipeline_mode = #tpu.pipeline_mode<synchronous>, transform_indices = @transform_6, window_bounds = array<i64: 384, 208>}, {pipeline_mode = #tpu.pipeline_mode<synchronous>, transform_indices = @transform_7, window_bounds = array<i64: 1, 208>}, {pipeline_mode = #tpu.pipeline_mode<synchronous>, transform_indices = @transform_8, window_bounds = array<i64: 26, 24>}, {pipeline_mode = #tpu.pipeline_mode<synchronous>, transform_indices = @transform_9, window_bounds = array<i64: 9, 208>}, {pipeline_mode = #tpu.pipeline_mode<synchronous>, transform_indices = @transform_10, window_bounds = array<i64: 1, 192>}, {pipeline_mode = #tpu.pipeline_mode<synchronous>, transform_indices = @transform_11, window_bounds = array<i64: 192, 224>}, {pipeline_mode = #tpu.pipeline_mode<synchronous>, transform_indices = @transform_12, window_bounds = array<i64: 1, 224>}, {pipeline_mode = #tpu.pipeline_mode<synchronous>, transform_indices = @transform_13, window_bounds = array<i64: 14, 24>}, {pipeline_mode = #tpu.pipeline_mode<synchronous>, transform_indices = @transform_14, window_bounds = array<i64: 9, 224>}, {pipeline_mode = #tpu.pipeline_mode<synchronous>, transform_indices = @transform_15, window_bounds = array<i64: 1, 192>}, {pipeline_mode = #tpu.pipeline_mode<synchronous>, transform_indices = @transform_16, window_bounds = array<i64: 192, 224>}, {pipeline_mode = #tpu.pipeline_mode<synchronous>, transform_indices = @transform_17, window_bounds = array<i64: 1, 224>}, {pipeline_mode = #tpu.pipeline_mode<synchronous>, transform_indices = @transform_18, window_bounds = array<i64: 14, 12>}, {pipeline_mode = #tpu.pipeline_mode<synchronous>, transform_indices = @transform_19, window_bounds = array<i64: 9, 224>}, {pipeline_mode = #tpu.pipeline_mode<synchronous>, transform_indices = @transform_20, window_bounds = array<i64: 1, 192>}, {pipeline_mode = #tpu.pipeline_mode<synchronous>, transform_indices = @transform_21, window_bounds = array<i64: 192, 128>}, {pipeline_mode = #tpu.pipeline_mode<synchronous>, transform_indices = @transform_22, window_bounds = array<i64: 1, 128>}, {pipeline_mode = #tpu.pipeline_mode<synchronous>, transform_indices = @transform_23, window_bounds = array<i64: 8, 12>}, {pipeline_mode = #tpu.pipeline_mode<synchronous>, transform_indices = @transform_24, window_bounds = array<i64: 9, 128>}, {pipeline_mode = #tpu.pipeline_mode<synchronous>, transform_indices = @transform_25, window_bounds = array<i64: 1, 96>}, {pipeline_mode = #tpu.pipeline_mode<synchronous>, transform_indices = @transform_26, window_bounds = array<i64: 96, 96>}, {pipeline_mode = #tpu.pipeline_mode<synchronous>, transform_indices = @transform_27, window_bounds = array<i64: 1, 96>}, {pipeline_mode = #tpu.pipeline_mode<synchronous>, transform_indices = @transform_28, window_bounds = array<i64: 96, 6>}, {pipeline_mode = #tpu.pipeline_mode<synchronous>, transform_indices = @transform_29, window_bounds = array<i64: 1, 6>}, {transform_indices = @transform_30, window_bounds = array<i64: 1, 1, 6>}]} {
    %c0 = arith.constant 0 : index
    %c0_0 = arith.constant 0 : index
    %c0_1 = arith.constant 0 : index
    %0 = vector.load %arg1[%c0, %c0_0, %c0_1] : memref<1x24x768xf32, #tpu.memory_space<vmem>>, vector<1x24x768xf32>
    %1 = vector.shape_cast %0 : vector<1x24x768xf32> to vector<24x768xf32>
    %2 = arith.truncf %1 : vector<24x768xf32> to vector<24x768xbf16>
    %c0_2 = arith.constant 0 : index
    %c0_3 = arith.constant 0 : index
    %3 = vector.load %arg2[%c0_2, %c0_3] : memref<768x416xbf16, #tpu.memory_space<vmem>>, vector<768x416xbf16>
    %cst = arith.constant dense<0.000000e+00> : vector<24x416xf32>
    %4 = tpu.matmul %2, %3, %cst {dimension_numbers = #tpu.dot_dimension_numbers<[1], [0], [0], [1], [0, 0, 1, 1], [], []>} : vector<24x768xbf16>, vector<768x416xbf16>, vector<24x416xf32> -> vector<24x416xf32>
    %c0_4 = arith.constant 0 : index
    %c0_5 = arith.constant 0 : index
    %5 = vector.load %arg3[%c0_4, %c0_5] : memref<1x416xf32, #tpu.memory_space<vmem>>, vector<1x416xf32>
    %6 = vector.broadcast %5 : vector<1x416xf32> to vector<24x416xf32>
    %7 = arith.addf %4, %6 : vector<24x416xf32>
    %cst_6 = arith.constant 0.000000e+00 : f32
    %cst_7 = arith.constant 6.000000e+00 : f32
    %8 = vector.broadcast %cst_6 : f32 to vector<24x416xf32>
    %9 = arith.maximumf %8, %7 : vector<24x416xf32>
    %10 = vector.broadcast %cst_7 : f32 to vector<24x416xf32>
    %11 = arith.minimumf %10, %9 : vector<24x416xf32>
    %c0_8 = arith.constant 0 : index
    %c0_9 = arith.constant 0 : index
    %12 = vector.load %arg4[%c0_8, %c0_9] : memref<26x24xf32, #tpu.memory_space<vmem>>, vector<26x24xf32>
    %cst_10 = arith.constant dense<0.000000e+00> : vector<26x416xf32>
    %13 = tpu.matmul %12, %11, %cst_10 {dimension_numbers = #tpu.dot_dimension_numbers<[1], [0], [0], [1], [0, 0, 1, 1], [], []>} : vector<26x24xf32>, vector<24x416xf32>, vector<26x416xf32> -> vector<26x416xf32>
    %c400_i32 = arith.constant 400 : i32
    %14 = tpu.dynamic_rotate %13 by %c400_i32 dim 1 : vector<26x416xf32>, i32 -> vector<26x416xf32>
    %c384_i32 = arith.constant 384 : i32
    %15 = tpu.dynamic_rotate %13 by %c384_i32 dim 1 : vector<26x416xf32>, i32 -> vector<26x416xf32>
    %c0_11 = arith.constant 0 : index
    %c0_12 = arith.constant 0 : index
    %16 = vector.load %arg5[%c0_11, %c0_12] : memref<9x416xf32, #tpu.memory_space<vmem>>, vector<1x416xf32>
    %17 = vector.shape_cast %16 : vector<1x416xf32> to vector<416xf32>
    %18 = vector.shape_cast %17 : vector<416xf32> to vector<1x416xf32>
    %19 = vector.broadcast %18 : vector<1x416xf32> to vector<26x416xf32>
    %20 = arith.mulf %13, %19 : vector<26x416xf32>
    %c1 = arith.constant 1 : index
    %c0_13 = arith.constant 0 : index
    %21 = vector.load %arg5[%c1, %c0_13] : memref<9x416xf32, #tpu.memory_space<vmem>>, vector<1x416xf32>
    %22 = vector.shape_cast %21 : vector<1x416xf32> to vector<416xf32>
    %23 = vector.shape_cast %22 : vector<416xf32> to vector<1x416xf32>
    %24 = vector.broadcast %23 : vector<1x416xf32> to vector<26x416xf32>
    %25 = arith.mulf %14, %24 : vector<26x416xf32>
    %26 = arith.addf %20, %25 : vector<26x416xf32>
    %c2 = arith.constant 2 : index
    %c0_14 = arith.constant 0 : index
    %27 = vector.load %arg5[%c2, %c0_14] : memref<9x416xf32, #tpu.memory_space<vmem>>, vector<1x416xf32>
    %28 = vector.shape_cast %27 : vector<1x416xf32> to vector<416xf32>
    %29 = vector.shape_cast %28 : vector<416xf32> to vector<1x416xf32>
    %30 = vector.broadcast %29 : vector<1x416xf32> to vector<26x416xf32>
    %31 = arith.mulf %15, %30 : vector<26x416xf32>
    %32 = arith.addf %26, %31 : vector<26x416xf32>
    %33 = vector.extract_strided_slice %32 {offsets = [0, 0], sizes = [24, 416], strides = [1, 1]} : vector<26x416xf32> to vector<24x416xf32>
    %c3 = arith.constant 3 : index
    %c0_15 = arith.constant 0 : index
    %34 = vector.load %arg5[%c3, %c0_15] : memref<9x416xf32, #tpu.memory_space<vmem>>, vector<1x416xf32>
    %35 = vector.shape_cast %34 : vector<1x416xf32> to vector<416xf32>
    %36 = vector.shape_cast %35 : vector<416xf32> to vector<1x416xf32>
    %37 = vector.broadcast %36 : vector<1x416xf32> to vector<26x416xf32>
    %38 = arith.mulf %13, %37 : vector<26x416xf32>
    %c4 = arith.constant 4 : index
    %c0_16 = arith.constant 0 : index
    %39 = vector.load %arg5[%c4, %c0_16] : memref<9x416xf32, #tpu.memory_space<vmem>>, vector<1x416xf32>
    %40 = vector.shape_cast %39 : vector<1x416xf32> to vector<416xf32>
    %41 = vector.shape_cast %40 : vector<416xf32> to vector<1x416xf32>
    %42 = vector.broadcast %41 : vector<1x416xf32> to vector<26x416xf32>
    %43 = arith.mulf %14, %42 : vector<26x416xf32>
    %44 = arith.addf %38, %43 : vector<26x416xf32>
    %c5 = arith.constant 5 : index
    %c0_17 = arith.constant 0 : index
    %45 = vector.load %arg5[%c5, %c0_17] : memref<9x416xf32, #tpu.memory_space<vmem>>, vector<1x416xf32>
    %46 = vector.shape_cast %45 : vector<1x416xf32> to vector<416xf32>
    %47 = vector.shape_cast %46 : vector<416xf32> to vector<1x416xf32>
    %48 = vector.broadcast %47 : vector<1x416xf32> to vector<26x416xf32>
    %49 = arith.mulf %15, %48 : vector<26x416xf32>
    %50 = arith.addf %44, %49 : vector<26x416xf32>
    %51 = vector.extract_strided_slice %50 {offsets = [1, 0], sizes = [24, 416], strides = [1, 1]} : vector<26x416xf32> to vector<24x416xf32>
    %52 = arith.addf %33, %51 : vector<24x416xf32>
    %c6 = arith.constant 6 : index
    %c0_18 = arith.constant 0 : index
    %53 = vector.load %arg5[%c6, %c0_18] : memref<9x416xf32, #tpu.memory_space<vmem>>, vector<1x416xf32>
    %54 = vector.shape_cast %53 : vector<1x416xf32> to vector<416xf32>
    %55 = vector.shape_cast %54 : vector<416xf32> to vector<1x416xf32>
    %56 = vector.broadcast %55 : vector<1x416xf32> to vector<26x416xf32>
    %57 = arith.mulf %13, %56 : vector<26x416xf32>
    %c7 = arith.constant 7 : index
    %c0_19 = arith.constant 0 : index
    %58 = vector.load %arg5[%c7, %c0_19] : memref<9x416xf32, #tpu.memory_space<vmem>>, vector<1x416xf32>
    %59 = vector.shape_cast %58 : vector<1x416xf32> to vector<416xf32>
    %60 = vector.shape_cast %59 : vector<416xf32> to vector<1x416xf32>
    %61 = vector.broadcast %60 : vector<1x416xf32> to vector<26x416xf32>
    %62 = arith.mulf %14, %61 : vector<26x416xf32>
    %63 = arith.addf %57, %62 : vector<26x416xf32>
    %c8 = arith.constant 8 : index
    %c0_20 = arith.constant 0 : index
    %64 = vector.load %arg5[%c8, %c0_20] : memref<9x416xf32, #tpu.memory_space<vmem>>, vector<1x416xf32>
    %65 = vector.shape_cast %64 : vector<1x416xf32> to vector<416xf32>
    %66 = vector.shape_cast %65 : vector<416xf32> to vector<1x416xf32>
    %67 = vector.broadcast %66 : vector<1x416xf32> to vector<26x416xf32>
    %68 = arith.mulf %15, %67 : vector<26x416xf32>
    %69 = arith.addf %63, %68 : vector<26x416xf32>
    %70 = vector.extract_strided_slice %69 {offsets = [2, 0], sizes = [24, 416], strides = [1, 1]} : vector<26x416xf32> to vector<24x416xf32>
    %71 = arith.addf %52, %70 : vector<24x416xf32>
    %72 = vector.extract_strided_slice %71 {offsets = [0, 0], sizes = [24, 384], strides = [1, 1]} : vector<24x416xf32> to vector<24x384xf32>
    %c0_21 = arith.constant 0 : index
    %c0_22 = arith.constant 0 : index
    %73 = vector.load %arg6[%c0_21, %c0_22] : memref<1x384xf32, #tpu.memory_space<vmem>>, vector<1x384xf32>
    %74 = vector.broadcast %73 : vector<1x384xf32> to vector<24x384xf32>
    %75 = arith.addf %72, %74 : vector<24x384xf32>
    %cst_23 = arith.constant 0.000000e+00 : f32
    %cst_24 = arith.constant 6.000000e+00 : f32
    %76 = vector.broadcast %cst_23 : f32 to vector<24x384xf32>
    %77 = arith.maximumf %76, %75 : vector<24x384xf32>
    %78 = vector.broadcast %cst_24 : f32 to vector<24x384xf32>
    %79 = arith.minimumf %78, %77 : vector<24x384xf32>
    %80 = arith.truncf %79 : vector<24x384xf32> to vector<24x384xbf16>
    %c0_25 = arith.constant 0 : index
    %c0_26 = arith.constant 0 : index
    %81 = vector.load %arg7[%c0_25, %c0_26] : memref<384x208xbf16, #tpu.memory_space<vmem>>, vector<384x208xbf16>
    %cst_27 = arith.constant dense<0.000000e+00> : vector<24x208xf32>
    %82 = tpu.matmul %80, %81, %cst_27 {dimension_numbers = #tpu.dot_dimension_numbers<[1], [0], [0], [1], [0, 0, 1, 1], [], []>} : vector<24x384xbf16>, vector<384x208xbf16>, vector<24x208xf32> -> vector<24x208xf32>
    %c0_28 = arith.constant 0 : index
    %c0_29 = arith.constant 0 : index
    %83 = vector.load %arg8[%c0_28, %c0_29] : memref<1x208xf32, #tpu.memory_space<vmem>>, vector<1x208xf32>
    %84 = vector.broadcast %83 : vector<1x208xf32> to vector<24x208xf32>
    %85 = arith.addf %82, %84 : vector<24x208xf32>
    %cst_30 = arith.constant 0.000000e+00 : f32
    %cst_31 = arith.constant 6.000000e+00 : f32
    %86 = vector.broadcast %cst_30 : f32 to vector<24x208xf32>
    %87 = arith.maximumf %86, %85 : vector<24x208xf32>
    %88 = vector.broadcast %cst_31 : f32 to vector<24x208xf32>
    %89 = arith.minimumf %88, %87 : vector<24x208xf32>
    %c0_32 = arith.constant 0 : index
    %c0_33 = arith.constant 0 : index
    %90 = vector.load %arg9[%c0_32, %c0_33] : memref<26x24xf32, #tpu.memory_space<vmem>>, vector<26x24xf32>
    %cst_34 = arith.constant dense<0.000000e+00> : vector<26x208xf32>
    %91 = tpu.matmul %90, %89, %cst_34 {dimension_numbers = #tpu.dot_dimension_numbers<[1], [0], [0], [1], [0, 0, 1, 1], [], []>} : vector<26x24xf32>, vector<24x208xf32>, vector<26x208xf32> -> vector<26x208xf32>
    %c200_i32 = arith.constant 200 : i32
    %92 = tpu.dynamic_rotate %91 by %c200_i32 dim 1 : vector<26x208xf32>, i32 -> vector<26x208xf32>
    %c192_i32 = arith.constant 192 : i32
    %93 = tpu.dynamic_rotate %91 by %c192_i32 dim 1 : vector<26x208xf32>, i32 -> vector<26x208xf32>
    %c0_35 = arith.constant 0 : index
    %c0_36 = arith.constant 0 : index
    %94 = vector.load %arg10[%c0_35, %c0_36] : memref<9x208xf32, #tpu.memory_space<vmem>>, vector<1x208xf32>
    %95 = vector.shape_cast %94 : vector<1x208xf32> to vector<208xf32>
    %96 = vector.shape_cast %95 : vector<208xf32> to vector<1x208xf32>
    %97 = vector.broadcast %96 : vector<1x208xf32> to vector<26x208xf32>
    %98 = arith.mulf %91, %97 : vector<26x208xf32>
    %c1_37 = arith.constant 1 : index
    %c0_38 = arith.constant 0 : index
    %99 = vector.load %arg10[%c1_37, %c0_38] : memref<9x208xf32, #tpu.memory_space<vmem>>, vector<1x208xf32>
    %100 = vector.shape_cast %99 : vector<1x208xf32> to vector<208xf32>
    %101 = vector.shape_cast %100 : vector<208xf32> to vector<1x208xf32>
    %102 = vector.broadcast %101 : vector<1x208xf32> to vector<26x208xf32>
    %103 = arith.mulf %92, %102 : vector<26x208xf32>
    %104 = arith.addf %98, %103 : vector<26x208xf32>
    %c2_39 = arith.constant 2 : index
    %c0_40 = arith.constant 0 : index
    %105 = vector.load %arg10[%c2_39, %c0_40] : memref<9x208xf32, #tpu.memory_space<vmem>>, vector<1x208xf32>
    %106 = vector.shape_cast %105 : vector<1x208xf32> to vector<208xf32>
    %107 = vector.shape_cast %106 : vector<208xf32> to vector<1x208xf32>
    %108 = vector.broadcast %107 : vector<1x208xf32> to vector<26x208xf32>
    %109 = arith.mulf %93, %108 : vector<26x208xf32>
    %110 = arith.addf %104, %109 : vector<26x208xf32>
    %111 = vector.extract_strided_slice %110 {offsets = [0, 0], sizes = [24, 208], strides = [1, 1]} : vector<26x208xf32> to vector<24x208xf32>
    %c3_41 = arith.constant 3 : index
    %c0_42 = arith.constant 0 : index
    %112 = vector.load %arg10[%c3_41, %c0_42] : memref<9x208xf32, #tpu.memory_space<vmem>>, vector<1x208xf32>
    %113 = vector.shape_cast %112 : vector<1x208xf32> to vector<208xf32>
    %114 = vector.shape_cast %113 : vector<208xf32> to vector<1x208xf32>
    %115 = vector.broadcast %114 : vector<1x208xf32> to vector<26x208xf32>
    %116 = arith.mulf %91, %115 : vector<26x208xf32>
    %c4_43 = arith.constant 4 : index
    %c0_44 = arith.constant 0 : index
    %117 = vector.load %arg10[%c4_43, %c0_44] : memref<9x208xf32, #tpu.memory_space<vmem>>, vector<1x208xf32>
    %118 = vector.shape_cast %117 : vector<1x208xf32> to vector<208xf32>
    %119 = vector.shape_cast %118 : vector<208xf32> to vector<1x208xf32>
    %120 = vector.broadcast %119 : vector<1x208xf32> to vector<26x208xf32>
    %121 = arith.mulf %92, %120 : vector<26x208xf32>
    %122 = arith.addf %116, %121 : vector<26x208xf32>
    %c5_45 = arith.constant 5 : index
    %c0_46 = arith.constant 0 : index
    %123 = vector.load %arg10[%c5_45, %c0_46] : memref<9x208xf32, #tpu.memory_space<vmem>>, vector<1x208xf32>
    %124 = vector.shape_cast %123 : vector<1x208xf32> to vector<208xf32>
    %125 = vector.shape_cast %124 : vector<208xf32> to vector<1x208xf32>
    %126 = vector.broadcast %125 : vector<1x208xf32> to vector<26x208xf32>
    %127 = arith.mulf %93, %126 : vector<26x208xf32>
    %128 = arith.addf %122, %127 : vector<26x208xf32>
    %129 = vector.extract_strided_slice %128 {offsets = [1, 0], sizes = [24, 208], strides = [1, 1]} : vector<26x208xf32> to vector<24x208xf32>
    %130 = arith.addf %111, %129 : vector<24x208xf32>
    %c6_47 = arith.constant 6 : index
    %c0_48 = arith.constant 0 : index
    %131 = vector.load %arg10[%c6_47, %c0_48] : memref<9x208xf32, #tpu.memory_space<vmem>>, vector<1x208xf32>
    %132 = vector.shape_cast %131 : vector<1x208xf32> to vector<208xf32>
    %133 = vector.shape_cast %132 : vector<208xf32> to vector<1x208xf32>
    %134 = vector.broadcast %133 : vector<1x208xf32> to vector<26x208xf32>
    %135 = arith.mulf %91, %134 : vector<26x208xf32>
    %c7_49 = arith.constant 7 : index
    %c0_50 = arith.constant 0 : index
    %136 = vector.load %arg10[%c7_49, %c0_50] : memref<9x208xf32, #tpu.memory_space<vmem>>, vector<1x208xf32>
    %137 = vector.shape_cast %136 : vector<1x208xf32> to vector<208xf32>
    %138 = vector.shape_cast %137 : vector<208xf32> to vector<1x208xf32>
    %139 = vector.broadcast %138 : vector<1x208xf32> to vector<26x208xf32>
    %140 = arith.mulf %92, %139 : vector<26x208xf32>
    %141 = arith.addf %135, %140 : vector<26x208xf32>
    %c8_51 = arith.constant 8 : index
    %c0_52 = arith.constant 0 : index
    %142 = vector.load %arg10[%c8_51, %c0_52] : memref<9x208xf32, #tpu.memory_space<vmem>>, vector<1x208xf32>
    %143 = vector.shape_cast %142 : vector<1x208xf32> to vector<208xf32>
    %144 = vector.shape_cast %143 : vector<208xf32> to vector<1x208xf32>
    %145 = vector.broadcast %144 : vector<1x208xf32> to vector<26x208xf32>
    %146 = arith.mulf %93, %145 : vector<26x208xf32>
    %147 = arith.addf %141, %146 : vector<26x208xf32>
    %148 = vector.extract_strided_slice %147 {offsets = [2, 0], sizes = [24, 208], strides = [1, 1]} : vector<26x208xf32> to vector<24x208xf32>
    %149 = arith.addf %130, %148 : vector<24x208xf32>
    %150 = vector.extract_strided_slice %149 {offsets = [0, 0], sizes = [24, 192], strides = [1, 1]} : vector<24x208xf32> to vector<24x192xf32>
    %c0_53 = arith.constant 0 : index
    %c0_54 = arith.constant 0 : index
    %151 = vector.load %arg11[%c0_53, %c0_54] : memref<1x192xf32, #tpu.memory_space<vmem>>, vector<1x192xf32>
    %152 = vector.broadcast %151 : vector<1x192xf32> to vector<24x192xf32>
    %153 = arith.addf %150, %152 : vector<24x192xf32>
    %cst_55 = arith.constant 0.000000e+00 : f32
    %cst_56 = arith.constant 6.000000e+00 : f32
    %154 = vector.broadcast %cst_55 : f32 to vector<24x192xf32>
    %155 = arith.maximumf %154, %153 : vector<24x192xf32>
    %156 = vector.broadcast %cst_56 : f32 to vector<24x192xf32>
    %157 = arith.minimumf %156, %155 : vector<24x192xf32>
    %158 = arith.truncf %157 : vector<24x192xf32> to vector<24x192xbf16>
    %c0_57 = arith.constant 0 : index
    %c0_58 = arith.constant 0 : index
    %159 = vector.load %arg12[%c0_57, %c0_58] : memref<192x224xbf16, #tpu.memory_space<vmem>>, vector<192x224xbf16>
    %cst_59 = arith.constant dense<0.000000e+00> : vector<24x224xf32>
    %160 = tpu.matmul %158, %159, %cst_59 {dimension_numbers = #tpu.dot_dimension_numbers<[1], [0], [0], [1], [0, 0, 1, 1], [], []>} : vector<24x192xbf16>, vector<192x224xbf16>, vector<24x224xf32> -> vector<24x224xf32>
    %c0_60 = arith.constant 0 : index
    %c0_61 = arith.constant 0 : index
    %161 = vector.load %arg13[%c0_60, %c0_61] : memref<1x224xf32, #tpu.memory_space<vmem>>, vector<1x224xf32>
    %162 = vector.broadcast %161 : vector<1x224xf32> to vector<24x224xf32>
    %163 = arith.addf %160, %162 : vector<24x224xf32>
    %cst_62 = arith.constant 0.000000e+00 : f32
    %cst_63 = arith.constant 6.000000e+00 : f32
    %164 = vector.broadcast %cst_62 : f32 to vector<24x224xf32>
    %165 = arith.maximumf %164, %163 : vector<24x224xf32>
    %166 = vector.broadcast %cst_63 : f32 to vector<24x224xf32>
    %167 = arith.minimumf %166, %165 : vector<24x224xf32>
    %c0_64 = arith.constant 0 : index
    %c0_65 = arith.constant 0 : index
    %168 = vector.load %arg14[%c0_64, %c0_65] : memref<14x24xf32, #tpu.memory_space<vmem>>, vector<14x24xf32>
    %cst_66 = arith.constant dense<0.000000e+00> : vector<14x224xf32>
    %169 = tpu.matmul %168, %167, %cst_66 {dimension_numbers = #tpu.dot_dimension_numbers<[1], [0], [0], [1], [0, 0, 1, 1], [], []>} : vector<14x24xf32>, vector<24x224xf32>, vector<14x224xf32> -> vector<14x224xf32>
    %c208_i32 = arith.constant 208 : i32
    %170 = tpu.dynamic_rotate %169 by %c208_i32 dim 1 : vector<14x224xf32>, i32 -> vector<14x224xf32>
    %c192_i32_67 = arith.constant 192 : i32
    %171 = tpu.dynamic_rotate %169 by %c192_i32_67 dim 1 : vector<14x224xf32>, i32 -> vector<14x224xf32>
    %c0_68 = arith.constant 0 : index
    %c0_69 = arith.constant 0 : index
    %172 = vector.load %arg15[%c0_68, %c0_69] : memref<9x224xf32, #tpu.memory_space<vmem>>, vector<1x224xf32>
    %173 = vector.shape_cast %172 : vector<1x224xf32> to vector<224xf32>
    %174 = vector.shape_cast %173 : vector<224xf32> to vector<1x224xf32>
    %175 = vector.broadcast %174 : vector<1x224xf32> to vector<14x224xf32>
    %176 = arith.mulf %169, %175 : vector<14x224xf32>
    %c1_70 = arith.constant 1 : index
    %c0_71 = arith.constant 0 : index
    %177 = vector.load %arg15[%c1_70, %c0_71] : memref<9x224xf32, #tpu.memory_space<vmem>>, vector<1x224xf32>
    %178 = vector.shape_cast %177 : vector<1x224xf32> to vector<224xf32>
    %179 = vector.shape_cast %178 : vector<224xf32> to vector<1x224xf32>
    %180 = vector.broadcast %179 : vector<1x224xf32> to vector<14x224xf32>
    %181 = arith.mulf %170, %180 : vector<14x224xf32>
    %182 = arith.addf %176, %181 : vector<14x224xf32>
    %c2_72 = arith.constant 2 : index
    %c0_73 = arith.constant 0 : index
    %183 = vector.load %arg15[%c2_72, %c0_73] : memref<9x224xf32, #tpu.memory_space<vmem>>, vector<1x224xf32>
    %184 = vector.shape_cast %183 : vector<1x224xf32> to vector<224xf32>
    %185 = vector.shape_cast %184 : vector<224xf32> to vector<1x224xf32>
    %186 = vector.broadcast %185 : vector<1x224xf32> to vector<14x224xf32>
    %187 = arith.mulf %171, %186 : vector<14x224xf32>
    %188 = arith.addf %182, %187 : vector<14x224xf32>
    %189 = vector.extract_strided_slice %188 {offsets = [0, 0], sizes = [12, 224], strides = [1, 1]} : vector<14x224xf32> to vector<12x224xf32>
    %c3_74 = arith.constant 3 : index
    %c0_75 = arith.constant 0 : index
    %190 = vector.load %arg15[%c3_74, %c0_75] : memref<9x224xf32, #tpu.memory_space<vmem>>, vector<1x224xf32>
    %191 = vector.shape_cast %190 : vector<1x224xf32> to vector<224xf32>
    %192 = vector.shape_cast %191 : vector<224xf32> to vector<1x224xf32>
    %193 = vector.broadcast %192 : vector<1x224xf32> to vector<14x224xf32>
    %194 = arith.mulf %169, %193 : vector<14x224xf32>
    %c4_76 = arith.constant 4 : index
    %c0_77 = arith.constant 0 : index
    %195 = vector.load %arg15[%c4_76, %c0_77] : memref<9x224xf32, #tpu.memory_space<vmem>>, vector<1x224xf32>
    %196 = vector.shape_cast %195 : vector<1x224xf32> to vector<224xf32>
    %197 = vector.shape_cast %196 : vector<224xf32> to vector<1x224xf32>
    %198 = vector.broadcast %197 : vector<1x224xf32> to vector<14x224xf32>
    %199 = arith.mulf %170, %198 : vector<14x224xf32>
    %200 = arith.addf %194, %199 : vector<14x224xf32>
    %c5_78 = arith.constant 5 : index
    %c0_79 = arith.constant 0 : index
    %201 = vector.load %arg15[%c5_78, %c0_79] : memref<9x224xf32, #tpu.memory_space<vmem>>, vector<1x224xf32>
    %202 = vector.shape_cast %201 : vector<1x224xf32> to vector<224xf32>
    %203 = vector.shape_cast %202 : vector<224xf32> to vector<1x224xf32>
    %204 = vector.broadcast %203 : vector<1x224xf32> to vector<14x224xf32>
    %205 = arith.mulf %171, %204 : vector<14x224xf32>
    %206 = arith.addf %200, %205 : vector<14x224xf32>
    %207 = vector.extract_strided_slice %206 {offsets = [1, 0], sizes = [12, 224], strides = [1, 1]} : vector<14x224xf32> to vector<12x224xf32>
    %208 = arith.addf %189, %207 : vector<12x224xf32>
    %c6_80 = arith.constant 6 : index
    %c0_81 = arith.constant 0 : index
    %209 = vector.load %arg15[%c6_80, %c0_81] : memref<9x224xf32, #tpu.memory_space<vmem>>, vector<1x224xf32>
    %210 = vector.shape_cast %209 : vector<1x224xf32> to vector<224xf32>
    %211 = vector.shape_cast %210 : vector<224xf32> to vector<1x224xf32>
    %212 = vector.broadcast %211 : vector<1x224xf32> to vector<14x224xf32>
    %213 = arith.mulf %169, %212 : vector<14x224xf32>
    %c7_82 = arith.constant 7 : index
    %c0_83 = arith.constant 0 : index
    %214 = vector.load %arg15[%c7_82, %c0_83] : memref<9x224xf32, #tpu.memory_space<vmem>>, vector<1x224xf32>
    %215 = vector.shape_cast %214 : vector<1x224xf32> to vector<224xf32>
    %216 = vector.shape_cast %215 : vector<224xf32> to vector<1x224xf32>
    %217 = vector.broadcast %216 : vector<1x224xf32> to vector<14x224xf32>
    %218 = arith.mulf %170, %217 : vector<14x224xf32>
    %219 = arith.addf %213, %218 : vector<14x224xf32>
    %c8_84 = arith.constant 8 : index
    %c0_85 = arith.constant 0 : index
    %220 = vector.load %arg15[%c8_84, %c0_85] : memref<9x224xf32, #tpu.memory_space<vmem>>, vector<1x224xf32>
    %221 = vector.shape_cast %220 : vector<1x224xf32> to vector<224xf32>
    %222 = vector.shape_cast %221 : vector<224xf32> to vector<1x224xf32>
    %223 = vector.broadcast %222 : vector<1x224xf32> to vector<14x224xf32>
    %224 = arith.mulf %171, %223 : vector<14x224xf32>
    %225 = arith.addf %219, %224 : vector<14x224xf32>
    %226 = vector.extract_strided_slice %225 {offsets = [2, 0], sizes = [12, 224], strides = [1, 1]} : vector<14x224xf32> to vector<12x224xf32>
    %227 = arith.addf %208, %226 : vector<12x224xf32>
    %228 = vector.extract_strided_slice %227 {offsets = [0, 0], sizes = [12, 192], strides = [1, 1]} : vector<12x224xf32> to vector<12x192xf32>
    %c0_86 = arith.constant 0 : index
    %c0_87 = arith.constant 0 : index
    %229 = vector.load %arg16[%c0_86, %c0_87] : memref<1x192xf32, #tpu.memory_space<vmem>>, vector<1x192xf32>
    %230 = vector.broadcast %229 : vector<1x192xf32> to vector<12x192xf32>
    %231 = arith.addf %228, %230 : vector<12x192xf32>
    %cst_88 = arith.constant 0.000000e+00 : f32
    %cst_89 = arith.constant 6.000000e+00 : f32
    %232 = vector.broadcast %cst_88 : f32 to vector<12x192xf32>
    %233 = arith.maximumf %232, %231 : vector<12x192xf32>
    %234 = vector.broadcast %cst_89 : f32 to vector<12x192xf32>
    %235 = arith.minimumf %234, %233 : vector<12x192xf32>
    %236 = arith.truncf %235 : vector<12x192xf32> to vector<12x192xbf16>
    %c0_90 = arith.constant 0 : index
    %c0_91 = arith.constant 0 : index
    %237 = vector.load %arg17[%c0_90, %c0_91] : memref<192x224xbf16, #tpu.memory_space<vmem>>, vector<192x224xbf16>
    %cst_92 = arith.constant dense<0.000000e+00> : vector<12x224xf32>
    %238 = tpu.matmul %236, %237, %cst_92 {dimension_numbers = #tpu.dot_dimension_numbers<[1], [0], [0], [1], [0, 0, 1, 1], [], []>} : vector<12x192xbf16>, vector<192x224xbf16>, vector<12x224xf32> -> vector<12x224xf32>
    %c0_93 = arith.constant 0 : index
    %c0_94 = arith.constant 0 : index
    %239 = vector.load %arg18[%c0_93, %c0_94] : memref<1x224xf32, #tpu.memory_space<vmem>>, vector<1x224xf32>
    %240 = vector.broadcast %239 : vector<1x224xf32> to vector<12x224xf32>
    %241 = arith.addf %238, %240 : vector<12x224xf32>
    %cst_95 = arith.constant 0.000000e+00 : f32
    %cst_96 = arith.constant 6.000000e+00 : f32
    %242 = vector.broadcast %cst_95 : f32 to vector<12x224xf32>
    %243 = arith.maximumf %242, %241 : vector<12x224xf32>
    %244 = vector.broadcast %cst_96 : f32 to vector<12x224xf32>
    %245 = arith.minimumf %244, %243 : vector<12x224xf32>
    %c0_97 = arith.constant 0 : index
    %c0_98 = arith.constant 0 : index
    %246 = vector.load %arg19[%c0_97, %c0_98] : memref<14x12xf32, #tpu.memory_space<vmem>>, vector<14x12xf32>
    %cst_99 = arith.constant dense<0.000000e+00> : vector<14x224xf32>
    %247 = tpu.matmul %246, %245, %cst_99 {dimension_numbers = #tpu.dot_dimension_numbers<[1], [0], [0], [1], [0, 0, 1, 1], [], []>} : vector<14x12xf32>, vector<12x224xf32>, vector<14x224xf32> -> vector<14x224xf32>
    %c208_i32_100 = arith.constant 208 : i32
    %248 = tpu.dynamic_rotate %247 by %c208_i32_100 dim 1 : vector<14x224xf32>, i32 -> vector<14x224xf32>
    %c192_i32_101 = arith.constant 192 : i32
    %249 = tpu.dynamic_rotate %247 by %c192_i32_101 dim 1 : vector<14x224xf32>, i32 -> vector<14x224xf32>
    %c0_102 = arith.constant 0 : index
    %c0_103 = arith.constant 0 : index
    %250 = vector.load %arg20[%c0_102, %c0_103] : memref<9x224xf32, #tpu.memory_space<vmem>>, vector<1x224xf32>
    %251 = vector.shape_cast %250 : vector<1x224xf32> to vector<224xf32>
    %252 = vector.shape_cast %251 : vector<224xf32> to vector<1x224xf32>
    %253 = vector.broadcast %252 : vector<1x224xf32> to vector<14x224xf32>
    %254 = arith.mulf %247, %253 : vector<14x224xf32>
    %c1_104 = arith.constant 1 : index
    %c0_105 = arith.constant 0 : index
    %255 = vector.load %arg20[%c1_104, %c0_105] : memref<9x224xf32, #tpu.memory_space<vmem>>, vector<1x224xf32>
    %256 = vector.shape_cast %255 : vector<1x224xf32> to vector<224xf32>
    %257 = vector.shape_cast %256 : vector<224xf32> to vector<1x224xf32>
    %258 = vector.broadcast %257 : vector<1x224xf32> to vector<14x224xf32>
    %259 = arith.mulf %248, %258 : vector<14x224xf32>
    %260 = arith.addf %254, %259 : vector<14x224xf32>
    %c2_106 = arith.constant 2 : index
    %c0_107 = arith.constant 0 : index
    %261 = vector.load %arg20[%c2_106, %c0_107] : memref<9x224xf32, #tpu.memory_space<vmem>>, vector<1x224xf32>
    %262 = vector.shape_cast %261 : vector<1x224xf32> to vector<224xf32>
    %263 = vector.shape_cast %262 : vector<224xf32> to vector<1x224xf32>
    %264 = vector.broadcast %263 : vector<1x224xf32> to vector<14x224xf32>
    %265 = arith.mulf %249, %264 : vector<14x224xf32>
    %266 = arith.addf %260, %265 : vector<14x224xf32>
    %267 = vector.extract_strided_slice %266 {offsets = [0, 0], sizes = [12, 224], strides = [1, 1]} : vector<14x224xf32> to vector<12x224xf32>
    %c3_108 = arith.constant 3 : index
    %c0_109 = arith.constant 0 : index
    %268 = vector.load %arg20[%c3_108, %c0_109] : memref<9x224xf32, #tpu.memory_space<vmem>>, vector<1x224xf32>
    %269 = vector.shape_cast %268 : vector<1x224xf32> to vector<224xf32>
    %270 = vector.shape_cast %269 : vector<224xf32> to vector<1x224xf32>
    %271 = vector.broadcast %270 : vector<1x224xf32> to vector<14x224xf32>
    %272 = arith.mulf %247, %271 : vector<14x224xf32>
    %c4_110 = arith.constant 4 : index
    %c0_111 = arith.constant 0 : index
    %273 = vector.load %arg20[%c4_110, %c0_111] : memref<9x224xf32, #tpu.memory_space<vmem>>, vector<1x224xf32>
    %274 = vector.shape_cast %273 : vector<1x224xf32> to vector<224xf32>
    %275 = vector.shape_cast %274 : vector<224xf32> to vector<1x224xf32>
    %276 = vector.broadcast %275 : vector<1x224xf32> to vector<14x224xf32>
    %277 = arith.mulf %248, %276 : vector<14x224xf32>
    %278 = arith.addf %272, %277 : vector<14x224xf32>
    %c5_112 = arith.constant 5 : index
    %c0_113 = arith.constant 0 : index
    %279 = vector.load %arg20[%c5_112, %c0_113] : memref<9x224xf32, #tpu.memory_space<vmem>>, vector<1x224xf32>
    %280 = vector.shape_cast %279 : vector<1x224xf32> to vector<224xf32>
    %281 = vector.shape_cast %280 : vector<224xf32> to vector<1x224xf32>
    %282 = vector.broadcast %281 : vector<1x224xf32> to vector<14x224xf32>
    %283 = arith.mulf %249, %282 : vector<14x224xf32>
    %284 = arith.addf %278, %283 : vector<14x224xf32>
    %285 = vector.extract_strided_slice %284 {offsets = [1, 0], sizes = [12, 224], strides = [1, 1]} : vector<14x224xf32> to vector<12x224xf32>
    %286 = arith.addf %267, %285 : vector<12x224xf32>
    %c6_114 = arith.constant 6 : index
    %c0_115 = arith.constant 0 : index
    %287 = vector.load %arg20[%c6_114, %c0_115] : memref<9x224xf32, #tpu.memory_space<vmem>>, vector<1x224xf32>
    %288 = vector.shape_cast %287 : vector<1x224xf32> to vector<224xf32>
    %289 = vector.shape_cast %288 : vector<224xf32> to vector<1x224xf32>
    %290 = vector.broadcast %289 : vector<1x224xf32> to vector<14x224xf32>
    %291 = arith.mulf %247, %290 : vector<14x224xf32>
    %c7_116 = arith.constant 7 : index
    %c0_117 = arith.constant 0 : index
    %292 = vector.load %arg20[%c7_116, %c0_117] : memref<9x224xf32, #tpu.memory_space<vmem>>, vector<1x224xf32>
    %293 = vector.shape_cast %292 : vector<1x224xf32> to vector<224xf32>
    %294 = vector.shape_cast %293 : vector<224xf32> to vector<1x224xf32>
    %295 = vector.broadcast %294 : vector<1x224xf32> to vector<14x224xf32>
    %296 = arith.mulf %248, %295 : vector<14x224xf32>
    %297 = arith.addf %291, %296 : vector<14x224xf32>
    %c8_118 = arith.constant 8 : index
    %c0_119 = arith.constant 0 : index
    %298 = vector.load %arg20[%c8_118, %c0_119] : memref<9x224xf32, #tpu.memory_space<vmem>>, vector<1x224xf32>
    %299 = vector.shape_cast %298 : vector<1x224xf32> to vector<224xf32>
    %300 = vector.shape_cast %299 : vector<224xf32> to vector<1x224xf32>
    %301 = vector.broadcast %300 : vector<1x224xf32> to vector<14x224xf32>
    %302 = arith.mulf %249, %301 : vector<14x224xf32>
    %303 = arith.addf %297, %302 : vector<14x224xf32>
    %304 = vector.extract_strided_slice %303 {offsets = [2, 0], sizes = [12, 224], strides = [1, 1]} : vector<14x224xf32> to vector<12x224xf32>
    %305 = arith.addf %286, %304 : vector<12x224xf32>
    %306 = vector.extract_strided_slice %305 {offsets = [0, 0], sizes = [12, 192], strides = [1, 1]} : vector<12x224xf32> to vector<12x192xf32>
    %c0_120 = arith.constant 0 : index
    %c0_121 = arith.constant 0 : index
    %307 = vector.load %arg21[%c0_120, %c0_121] : memref<1x192xf32, #tpu.memory_space<vmem>>, vector<1x192xf32>
    %308 = vector.broadcast %307 : vector<1x192xf32> to vector<12x192xf32>
    %309 = arith.addf %306, %308 : vector<12x192xf32>
    %cst_122 = arith.constant 0.000000e+00 : f32
    %cst_123 = arith.constant 6.000000e+00 : f32
    %310 = vector.broadcast %cst_122 : f32 to vector<12x192xf32>
    %311 = arith.maximumf %310, %309 : vector<12x192xf32>
    %312 = vector.broadcast %cst_123 : f32 to vector<12x192xf32>
    %313 = arith.minimumf %312, %311 : vector<12x192xf32>
    %314 = arith.truncf %313 : vector<12x192xf32> to vector<12x192xbf16>
    %c0_124 = arith.constant 0 : index
    %c0_125 = arith.constant 0 : index
    %315 = vector.load %arg22[%c0_124, %c0_125] : memref<192x128xbf16, #tpu.memory_space<vmem>>, vector<192x128xbf16>
    %cst_126 = arith.constant dense<0.000000e+00> : vector<12x128xf32>
    %316 = tpu.matmul %314, %315, %cst_126 {dimension_numbers = #tpu.dot_dimension_numbers<[1], [0], [0], [1], [0, 0, 1, 1], [], []>} : vector<12x192xbf16>, vector<192x128xbf16>, vector<12x128xf32> -> vector<12x128xf32>
    %c0_127 = arith.constant 0 : index
    %c0_128 = arith.constant 0 : index
    %317 = vector.load %arg23[%c0_127, %c0_128] : memref<1x128xf32, #tpu.memory_space<vmem>>, vector<1x128xf32>
    %318 = vector.broadcast %317 : vector<1x128xf32> to vector<12x128xf32>
    %319 = arith.addf %316, %318 : vector<12x128xf32>
    %cst_129 = arith.constant 0.000000e+00 : f32
    %cst_130 = arith.constant 6.000000e+00 : f32
    %320 = vector.broadcast %cst_129 : f32 to vector<12x128xf32>
    %321 = arith.maximumf %320, %319 : vector<12x128xf32>
    %322 = vector.broadcast %cst_130 : f32 to vector<12x128xf32>
    %323 = arith.minimumf %322, %321 : vector<12x128xf32>
    %c0_131 = arith.constant 0 : index
    %c0_132 = arith.constant 0 : index
    %324 = vector.load %arg24[%c0_131, %c0_132] : memref<8x12xf32, #tpu.memory_space<vmem>>, vector<8x12xf32>
    %cst_133 = arith.constant dense<0.000000e+00> : vector<8x128xf32>
    %325 = tpu.matmul %324, %323, %cst_133 {dimension_numbers = #tpu.dot_dimension_numbers<[1], [0], [0], [1], [0, 0, 1, 1], [], []>} : vector<8x12xf32>, vector<12x128xf32>, vector<8x128xf32> -> vector<8x128xf32>
    %c112_i32 = arith.constant 112 : i32
    %326 = tpu.dynamic_rotate %325 by %c112_i32 dim 1 : vector<8x128xf32>, i32 -> vector<8x128xf32>
    %c96_i32 = arith.constant 96 : i32
    %327 = tpu.dynamic_rotate %325 by %c96_i32 dim 1 : vector<8x128xf32>, i32 -> vector<8x128xf32>
    %c0_134 = arith.constant 0 : index
    %c0_135 = arith.constant 0 : index
    %328 = vector.load %arg25[%c0_134, %c0_135] : memref<9x128xf32, #tpu.memory_space<vmem>>, vector<1x128xf32>
    %329 = vector.shape_cast %328 : vector<1x128xf32> to vector<128xf32>
    %330 = vector.shape_cast %329 : vector<128xf32> to vector<1x128xf32>
    %331 = vector.broadcast %330 : vector<1x128xf32> to vector<8x128xf32>
    %332 = arith.mulf %325, %331 : vector<8x128xf32>
    %c1_136 = arith.constant 1 : index
    %c0_137 = arith.constant 0 : index
    %333 = vector.load %arg25[%c1_136, %c0_137] : memref<9x128xf32, #tpu.memory_space<vmem>>, vector<1x128xf32>
    %334 = vector.shape_cast %333 : vector<1x128xf32> to vector<128xf32>
    %335 = vector.shape_cast %334 : vector<128xf32> to vector<1x128xf32>
    %336 = vector.broadcast %335 : vector<1x128xf32> to vector<8x128xf32>
    %337 = arith.mulf %326, %336 : vector<8x128xf32>
    %338 = arith.addf %332, %337 : vector<8x128xf32>
    %c2_138 = arith.constant 2 : index
    %c0_139 = arith.constant 0 : index
    %339 = vector.load %arg25[%c2_138, %c0_139] : memref<9x128xf32, #tpu.memory_space<vmem>>, vector<1x128xf32>
    %340 = vector.shape_cast %339 : vector<1x128xf32> to vector<128xf32>
    %341 = vector.shape_cast %340 : vector<128xf32> to vector<1x128xf32>
    %342 = vector.broadcast %341 : vector<1x128xf32> to vector<8x128xf32>
    %343 = arith.mulf %327, %342 : vector<8x128xf32>
    %344 = arith.addf %338, %343 : vector<8x128xf32>
    %345 = vector.extract_strided_slice %344 {offsets = [0, 0], sizes = [6, 128], strides = [1, 1]} : vector<8x128xf32> to vector<6x128xf32>
    %c3_140 = arith.constant 3 : index
    %c0_141 = arith.constant 0 : index
    %346 = vector.load %arg25[%c3_140, %c0_141] : memref<9x128xf32, #tpu.memory_space<vmem>>, vector<1x128xf32>
    %347 = vector.shape_cast %346 : vector<1x128xf32> to vector<128xf32>
    %348 = vector.shape_cast %347 : vector<128xf32> to vector<1x128xf32>
    %349 = vector.broadcast %348 : vector<1x128xf32> to vector<8x128xf32>
    %350 = arith.mulf %325, %349 : vector<8x128xf32>
    %c4_142 = arith.constant 4 : index
    %c0_143 = arith.constant 0 : index
    %351 = vector.load %arg25[%c4_142, %c0_143] : memref<9x128xf32, #tpu.memory_space<vmem>>, vector<1x128xf32>
    %352 = vector.shape_cast %351 : vector<1x128xf32> to vector<128xf32>
    %353 = vector.shape_cast %352 : vector<128xf32> to vector<1x128xf32>
    %354 = vector.broadcast %353 : vector<1x128xf32> to vector<8x128xf32>
    %355 = arith.mulf %326, %354 : vector<8x128xf32>
    %356 = arith.addf %350, %355 : vector<8x128xf32>
    %c5_144 = arith.constant 5 : index
    %c0_145 = arith.constant 0 : index
    %357 = vector.load %arg25[%c5_144, %c0_145] : memref<9x128xf32, #tpu.memory_space<vmem>>, vector<1x128xf32>
    %358 = vector.shape_cast %357 : vector<1x128xf32> to vector<128xf32>
    %359 = vector.shape_cast %358 : vector<128xf32> to vector<1x128xf32>
    %360 = vector.broadcast %359 : vector<1x128xf32> to vector<8x128xf32>
    %361 = arith.mulf %327, %360 : vector<8x128xf32>
    %362 = arith.addf %356, %361 : vector<8x128xf32>
    %363 = vector.extract_strided_slice %362 {offsets = [1, 0], sizes = [6, 128], strides = [1, 1]} : vector<8x128xf32> to vector<6x128xf32>
    %364 = arith.addf %345, %363 : vector<6x128xf32>
    %c6_146 = arith.constant 6 : index
    %c0_147 = arith.constant 0 : index
    %365 = vector.load %arg25[%c6_146, %c0_147] : memref<9x128xf32, #tpu.memory_space<vmem>>, vector<1x128xf32>
    %366 = vector.shape_cast %365 : vector<1x128xf32> to vector<128xf32>
    %367 = vector.shape_cast %366 : vector<128xf32> to vector<1x128xf32>
    %368 = vector.broadcast %367 : vector<1x128xf32> to vector<8x128xf32>
    %369 = arith.mulf %325, %368 : vector<8x128xf32>
    %c7_148 = arith.constant 7 : index
    %c0_149 = arith.constant 0 : index
    %370 = vector.load %arg25[%c7_148, %c0_149] : memref<9x128xf32, #tpu.memory_space<vmem>>, vector<1x128xf32>
    %371 = vector.shape_cast %370 : vector<1x128xf32> to vector<128xf32>
    %372 = vector.shape_cast %371 : vector<128xf32> to vector<1x128xf32>
    %373 = vector.broadcast %372 : vector<1x128xf32> to vector<8x128xf32>
    %374 = arith.mulf %326, %373 : vector<8x128xf32>
    %375 = arith.addf %369, %374 : vector<8x128xf32>
    %c8_150 = arith.constant 8 : index
    %c0_151 = arith.constant 0 : index
    %376 = vector.load %arg25[%c8_150, %c0_151] : memref<9x128xf32, #tpu.memory_space<vmem>>, vector<1x128xf32>
    %377 = vector.shape_cast %376 : vector<1x128xf32> to vector<128xf32>
    %378 = vector.shape_cast %377 : vector<128xf32> to vector<1x128xf32>
    %379 = vector.broadcast %378 : vector<1x128xf32> to vector<8x128xf32>
    %380 = arith.mulf %327, %379 : vector<8x128xf32>
    %381 = arith.addf %375, %380 : vector<8x128xf32>
    %382 = vector.extract_strided_slice %381 {offsets = [2, 0], sizes = [6, 128], strides = [1, 1]} : vector<8x128xf32> to vector<6x128xf32>
    %383 = arith.addf %364, %382 : vector<6x128xf32>
    %384 = vector.extract_strided_slice %383 {offsets = [0, 0], sizes = [6, 96], strides = [1, 1]} : vector<6x128xf32> to vector<6x96xf32>
    %c0_152 = arith.constant 0 : index
    %c0_153 = arith.constant 0 : index
    %385 = vector.load %arg26[%c0_152, %c0_153] : memref<1x96xf32, #tpu.memory_space<vmem>>, vector<1x96xf32>
    %386 = vector.broadcast %385 : vector<1x96xf32> to vector<6x96xf32>
    %387 = arith.addf %384, %386 : vector<6x96xf32>
    %cst_154 = arith.constant 0.000000e+00 : f32
    %cst_155 = arith.constant 6.000000e+00 : f32
    %388 = vector.broadcast %cst_154 : f32 to vector<6x96xf32>
    %389 = arith.maximumf %388, %387 : vector<6x96xf32>
    %390 = vector.broadcast %cst_155 : f32 to vector<6x96xf32>
    %391 = arith.minimumf %390, %389 : vector<6x96xf32>
    %392 = arith.truncf %391 : vector<6x96xf32> to vector<6x96xbf16>
    %c0_156 = arith.constant 0 : index
    %c0_157 = arith.constant 0 : index
    %393 = vector.load %arg27[%c0_156, %c0_157] : memref<96x96xbf16, #tpu.memory_space<vmem>>, vector<96x96xbf16>
    %cst_158 = arith.constant dense<0.000000e+00> : vector<6x96xf32>
    %394 = tpu.matmul %392, %393, %cst_158 {dimension_numbers = #tpu.dot_dimension_numbers<[1], [0], [0], [1], [0, 0, 1, 1], [], []>} : vector<6x96xbf16>, vector<96x96xbf16>, vector<6x96xf32> -> vector<6x96xf32>
    %c0_159 = arith.constant 0 : index
    %c0_160 = arith.constant 0 : index
    %395 = vector.load %arg28[%c0_159, %c0_160] : memref<1x96xf32, #tpu.memory_space<vmem>>, vector<1x96xf32>
    %396 = vector.broadcast %395 : vector<1x96xf32> to vector<6x96xf32>
    %397 = arith.addf %394, %396 : vector<6x96xf32>
    %cst_161 = arith.constant 0.000000e+00 : f32
    %cst_162 = arith.constant 6.000000e+00 : f32
    %398 = vector.broadcast %cst_161 : f32 to vector<6x96xf32>
    %399 = arith.maximumf %398, %397 : vector<6x96xf32>
    %400 = vector.broadcast %cst_162 : f32 to vector<6x96xf32>
    %401 = arith.minimumf %400, %399 : vector<6x96xf32>
    %cst_163 = arith.constant dense<0.000000e+00> : vector<96xf32>
    %402 = vector.multi_reduction <add>, %401, %cst_163 [0] : vector<6x96xf32> to vector<96xf32>
    %403 = vector.shape_cast %402 : vector<96xf32> to vector<1x96xf32>
    %c0_164 = arith.constant 0 : index
    %c0_165 = arith.constant 0 : index
    %404 = vector.load %arg29[%c0_164, %c0_165] : memref<96x6xf32, #tpu.memory_space<vmem>>, vector<96x6xf32>
    %cst_166 = arith.constant dense<0.000000e+00> : vector<1x6xf32>
    %405 = tpu.matmul %403, %404, %cst_166 {dimension_numbers = #tpu.dot_dimension_numbers<[1], [0], [0], [1], [0, 0, 1, 1], [], []>} : vector<1x96xf32>, vector<96x6xf32>, vector<1x6xf32> -> vector<1x6xf32>
    %c0_167 = arith.constant 0 : index
    %c0_168 = arith.constant 0 : index
    %406 = vector.load %arg30[%c0_167, %c0_168] : memref<1x6xf32, #tpu.memory_space<vmem>>, vector<1x6xf32>
    %407 = arith.addf %405, %406 : vector<1x6xf32>
    %c0_169 = arith.constant 0 : index
    %c0_170 = arith.constant 0 : index
    %c0_171 = arith.constant 0 : index
    %408 = vector.load %arg31[%c0_169, %c0_170, %c0_171] : memref<1x1x6xf32, #tpu.memory_space<vmem>>, vector<1x1x6xf32>
    %409 = vector.shape_cast %408 : vector<1x1x6xf32> to vector<1x6xf32>
    %410 = vector.shape_cast %407 : vector<1x6xf32> to vector<1x1x6xf32>
    tpu.vector_store %arg31[%c0_169, %c0_170, %c0_171], %410 {strides = array<i32>} : memref<1x1x6xf32, #tpu.memory_space<vmem>>, vector<1x1x6xf32>,
    return
  }
  func.func @transform_0(%arg0: i32) -> (i32, i32, i32) {
    %c0_i32 = arith.constant 0 : i32
    %c0_i32_0 = arith.constant 0 : i32
    %c0_i32_1 = arith.constant 0 : i32
    return %arg0, %c0_i32, %c0_i32_0 : i32, i32, i32
  }
  func.func @transform_1(%arg0: i32) -> (i32, i32) {
    %c0_i32 = arith.constant 0 : i32
    %c0_i32_0 = arith.constant 0 : i32
    %c0_i32_1 = arith.constant 0 : i32
    return %c0_i32, %c0_i32_0 : i32, i32
  }
  func.func @transform_2(%arg0: i32) -> (i32, i32) {
    %c0_i32 = arith.constant 0 : i32
    %c0_i32_0 = arith.constant 0 : i32
    %c0_i32_1 = arith.constant 0 : i32
    return %c0_i32, %c0_i32_0 : i32, i32
  }
  func.func @transform_3(%arg0: i32) -> (i32, i32) {
    %c0_i32 = arith.constant 0 : i32
    %c0_i32_0 = arith.constant 0 : i32
    %c0_i32_1 = arith.constant 0 : i32
    return %c0_i32, %c0_i32_0 : i32, i32
  }
  func.func @transform_4(%arg0: i32) -> (i32, i32) {
    %c0_i32 = arith.constant 0 : i32
    %c0_i32_0 = arith.constant 0 : i32
    %c0_i32_1 = arith.constant 0 : i32
    return %c0_i32, %c0_i32_0 : i32, i32
  }
  func.func @transform_5(%arg0: i32) -> (i32, i32) {
    %c0_i32 = arith.constant 0 : i32
    %c0_i32_0 = arith.constant 0 : i32
    %c0_i32_1 = arith.constant 0 : i32
    return %c0_i32, %c0_i32_0 : i32, i32
  }
  func.func @transform_6(%arg0: i32) -> (i32, i32) {
    %c0_i32 = arith.constant 0 : i32
    %c0_i32_0 = arith.constant 0 : i32
    %c0_i32_1 = arith.constant 0 : i32
    return %c0_i32, %c0_i32_0 : i32, i32
  }
  func.func @transform_7(%arg0: i32) -> (i32, i32) {
    %c0_i32 = arith.constant 0 : i32
    %c0_i32_0 = arith.constant 0 : i32
    %c0_i32_1 = arith.constant 0 : i32
    return %c0_i32, %c0_i32_0 : i32, i32
  }
  func.func @transform_8(%arg0: i32) -> (i32, i32) {
    %c0_i32 = arith.constant 0 : i32
    %c0_i32_0 = arith.constant 0 : i32
    %c0_i32_1 = arith.constant 0 : i32
    return %c0_i32, %c0_i32_0 : i32, i32
  }
  func.func @transform_9(%arg0: i32) -> (i32, i32) {
    %c0_i32 = arith.constant 0 : i32
    %c0_i32_0 = arith.constant 0 : i32
    %c0_i32_1 = arith.constant 0 : i32
    return %c0_i32, %c0_i32_0 : i32, i32
  }
  func.func @transform_10(%arg0: i32) -> (i32, i32) {
    %c0_i32 = arith.constant 0 : i32
    %c0_i32_0 = arith.constant 0 : i32
    %c0_i32_1 = arith.constant 0 : i32
    return %c0_i32, %c0_i32_0 : i32, i32
  }
  func.func @transform_11(%arg0: i32) -> (i32, i32) {
    %c0_i32 = arith.constant 0 : i32
    %c0_i32_0 = arith.constant 0 : i32
    %c0_i32_1 = arith.constant 0 : i32
    return %c0_i32, %c0_i32_0 : i32, i32
  }
  func.func @transform_12(%arg0: i32) -> (i32, i32) {
    %c0_i32 = arith.constant 0 : i32
    %c0_i32_0 = arith.constant 0 : i32
    %c0_i32_1 = arith.constant 0 : i32
    return %c0_i32, %c0_i32_0 : i32, i32
  }
  func.func @transform_13(%arg0: i32) -> (i32, i32) {
    %c0_i32 = arith.constant 0 : i32
    %c0_i32_0 = arith.constant 0 : i32
    %c0_i32_1 = arith.constant 0 : i32
    return %c0_i32, %c0_i32_0 : i32, i32
  }
  func.func @transform_14(%arg0: i32) -> (i32, i32) {
    %c0_i32 = arith.constant 0 : i32
    %c0_i32_0 = arith.constant 0 : i32
    %c0_i32_1 = arith.constant 0 : i32
    return %c0_i32, %c0_i32_0 : i32, i32
  }
  func.func @transform_15(%arg0: i32) -> (i32, i32) {
    %c0_i32 = arith.constant 0 : i32
    %c0_i32_0 = arith.constant 0 : i32
    %c0_i32_1 = arith.constant 0 : i32
    return %c0_i32, %c0_i32_0 : i32, i32
  }
  func.func @transform_16(%arg0: i32) -> (i32, i32) {
    %c0_i32 = arith.constant 0 : i32
    %c0_i32_0 = arith.constant 0 : i32
    %c0_i32_1 = arith.constant 0 : i32
    return %c0_i32, %c0_i32_0 : i32, i32
  }
  func.func @transform_17(%arg0: i32) -> (i32, i32) {
    %c0_i32 = arith.constant 0 : i32
    %c0_i32_0 = arith.constant 0 : i32
    %c0_i32_1 = arith.constant 0 : i32
    return %c0_i32, %c0_i32_0 : i32, i32
  }
  func.func @transform_18(%arg0: i32) -> (i32, i32) {
    %c0_i32 = arith.constant 0 : i32
    %c0_i32_0 = arith.constant 0 : i32
    %c0_i32_1 = arith.constant 0 : i32
    return %c0_i32, %c0_i32_0 : i32, i32
  }
  func.func @transform_19(%arg0: i32) -> (i32, i32) {
    %c0_i32 = arith.constant 0 : i32
    %c0_i32_0 = arith.constant 0 : i32
    %c0_i32_1 = arith.constant 0 : i32
    return %c0_i32, %c0_i32_0 : i32, i32
  }
  func.func @transform_20(%arg0: i32) -> (i32, i32) {
    %c0_i32 = arith.constant 0 : i32
    %c0_i32_0 = arith.constant 0 : i32
    %c0_i32_1 = arith.constant 0 : i32
    return %c0_i32, %c0_i32_0 : i32, i32
  }
  func.func @transform_21(%arg0: i32) -> (i32, i32) {
    %c0_i32 = arith.constant 0 : i32
    %c0_i32_0 = arith.constant 0 : i32
    %c0_i32_1 = arith.constant 0 : i32
    return %c0_i32, %c0_i32_0 : i32, i32
  }
  func.func @transform_22(%arg0: i32) -> (i32, i32) {
    %c0_i32 = arith.constant 0 : i32
    %c0_i32_0 = arith.constant 0 : i32
    %c0_i32_1 = arith.constant 0 : i32
    return %c0_i32, %c0_i32_0 : i32, i32
  }
  func.func @transform_23(%arg0: i32) -> (i32, i32) {
    %c0_i32 = arith.constant 0 : i32
    %c0_i32_0 = arith.constant 0 : i32
    %c0_i32_1 = arith.constant 0 : i32
    return %c0_i32, %c0_i32_0 : i32, i32
  }
  func.func @transform_24(%arg0: i32) -> (i32, i32) {
    %c0_i32 = arith.constant 0 : i32
    %c0_i32_0 = arith.constant 0 : i32
    %c0_i32_1 = arith.constant 0 : i32
    return %c0_i32, %c0_i32_0 : i32, i32
  }
  func.func @transform_25(%arg0: i32) -> (i32, i32) {
    %c0_i32 = arith.constant 0 : i32
    %c0_i32_0 = arith.constant 0 : i32
    %c0_i32_1 = arith.constant 0 : i32
    return %c0_i32, %c0_i32_0 : i32, i32
  }
  func.func @transform_26(%arg0: i32) -> (i32, i32) {
    %c0_i32 = arith.constant 0 : i32
    %c0_i32_0 = arith.constant 0 : i32
    %c0_i32_1 = arith.constant 0 : i32
    return %c0_i32, %c0_i32_0 : i32, i32
  }
  func.func @transform_27(%arg0: i32) -> (i32, i32) {
    %c0_i32 = arith.constant 0 : i32
    %c0_i32_0 = arith.constant 0 : i32
    %c0_i32_1 = arith.constant 0 : i32
    return %c0_i32, %c0_i32_0 : i32, i32
  }
  func.func @transform_28(%arg0: i32) -> (i32, i32) {
    %c0_i32 = arith.constant 0 : i32
    %c0_i32_0 = arith.constant 0 : i32
    %c0_i32_1 = arith.constant 0 : i32
    return %c0_i32, %c0_i32_0 : i32, i32
  }
  func.func @transform_29(%arg0: i32) -> (i32, i32) {
    %c0_i32 = arith.constant 0 : i32
    %c0_i32_0 = arith.constant 0 : i32
    %c0_i32_1 = arith.constant 0 : i32
    return %c0_i32, %c0_i32_0 : i32, i32
  }
  func.func @transform_30(%arg0: i32) -> (i32, i32, i32) {
    %c0_i32 = arith.constant 0 : i32
    %c0_i32_0 = arith.constant 0 : i32
    %c0_i32_1 = arith.constant 0 : i32
    return %arg0, %c0_i32, %c0_i32_0 : i32, i32, i32
  }
}

</mosaic_0001>

<bundles_post_ra>
// kernel: mcunet_forward.1
= control target key start
LH: loop header
LB: loop body
LE: loop exit
PB: predicated region body
PF: predicated region fallthrough
CT: control target
= control target key end

     0   :  { %s7898_s6 = smov 1   ;;  %s7899_s10 = smov 2   ;;  %s10255_s0 = inlined_call_operand.smem [shape: u32[31], index: -1, kind: input, shape index: {}] }
   0x1   :  { %s7949_s5 = sld [smem:[%s10255_s0]]   ;;  %s7900_s14 = smov 3  }
   0x2   :  { %s7954_s9 = sld [smem:[%s10255_s0 + %s7898_s6]]   ;;  %s7901_s18 = smov 4  }
   0x3   :  { %s7959_s13 = sld [smem:[%s10255_s0 + %s7899_s10]]   ;;  %s7902_s22 = smov 5  }
   0x4   :  { %s7964_s17 = sld [smem:[%s10255_s0 + %s7900_s14]]   ;;  %s7903_s26 = smov 6  }
   0x5   :  { %s7969_s21 = sld [smem:[%s10255_s0 + %s7901_s18]]   ;;  %s7904_s30 = smov 7  }
   0x6   :  { %s7974_s25 = sld [smem:[%s10255_s0 + %s7902_s22]]   ;;  %s7905_s4 = smov 8  }
   0x7   :  { %10310 = sst [smem:[#allocation5_spill]] %s7949_s5  ;;  %s7906_s10 = smov 9  }
   0x8   :  { %10311 = sst [smem:[#allocation6_spill]] %s7954_s9  ;;  %s7907_s15 = smov 10  }
   0x9   :  { %s7979_s29 = sld [smem:[%s10255_s0 + %s7903_s26]]   ;;  %s7908_s20 = smov 11  }
   0xa   :  { %s7984_s3 = sld [smem:[%s10255_s0 + %s7904_s30]]   ;;  %s7909_s26 = smov 12  }
   0xb   :  { %s7989_s8 = sld [smem:[%s10255_s0 + %s7905_s4]]   ;;  %s7910_s1 = smov 13  }
   0xc   :  { %s7994_s14 = sld [smem:[%s10255_s0 + %s7906_s10]]   ;;  %s7911_s7 = smov 14  }
   0xd   :  { %s7999_s19 = sld [smem:[%s10255_s0 + %s7907_s15]]   ;;  %s7912_s15 = smov 15  }
   0xe   :  { %s8004_s24 = sld [smem:[%s10255_s0 + %s7908_s20]]   ;;  %s7913_s22 = smov 16  }
   0xf   :  { %s8009_s30 = sld [smem:[%s10255_s0 + %s7909_s26]]   ;;  %s7914_s28 = smov 17  }
  0x10   :  { %10312 = sst [smem:[#allocation7_spill]] %s7984_s3 }
  0x11   :  { %10313 = sst [smem:[#allocation8_spill]] %s7989_s8 }
  0x12   :  { %s8014_s6 = sld [smem:[%s10255_s0 + %s7910_s1]]  }
  0x13   :  { %s8019_s12 = sld [smem:[%s10255_s0 + %s7911_s7]]   ;;  %s7915_s7 = smov 18  }
  0x14   :  { %s8024_s20 = sld [smem:[%s10255_s0 + %s7912_s15]]   ;;  %s7916_s15 = smov 19  }
  0x15   :  { %s8029_s27 = sld [smem:[%s10255_s0 + %s7913_s22]]   ;;  %s7917_s22 = smov 20  }
  0x16   :  { %s8034_s4 = sld [smem:[%s10255_s0 + %s7914_s28]]   ;;  %s7918_s28 = smov 21  }
  0x18   :  { %10314 = sst [smem:[#allocation9_spill]] %s8014_s6 }
  0x19   :  { %10315 = sst [smem:[#allocation10_spill]] %s8019_s12 }
  0x1a   :  { %10316 = sst [smem:[#allocation11_spill]] %s8024_s20 }
  0x1b   :  { %10317 = sst [smem:[#allocation12_spill]] %s8029_s27 }
  0x1c   :  { %10318 = sst [smem:[#allocation13_spill]] %s8034_s4 }
  0x1d   :  { %s8039_s6 = sld [smem:[%s10255_s0 + %s7915_s7]]   ;;  %s7919_s7 = smov 22  }
  0x1e   :  { %s8044_s20 = sld [smem:[%s10255_s0 + %s7916_s15]]   ;;  %s7920_s15 = smov 23  }
  0x1f   :  { %s8049_s27 = sld [smem:[%s10255_s0 + %s7917_s22]]   ;;  %s7921_s22 = smov 24  }
  0x20   :  { %s8054_s4 = sld [smem:[%s10255_s0 + %s7918_s28]]   ;;  %s7922_s28 = smov 25  }
  0x23   :  { %10319 = sst [smem:[#allocation14_spill]] %s8039_s6 }
  0x24   :  { %10320 = sst [smem:[#allocation15_spill]] %s8044_s20 }
  0x25   :  { %10321 = sst [smem:[#allocation16_spill]] %s8049_s27 }
  0x26   :  { %10322 = sst [smem:[#allocation17_spill]] %s8054_s4 }
  0x27   :  { %s8059_s6 = sld [smem:[%s10255_s0 + %s7919_s7]]   ;;  %s7923_s7 = smov 26  }
  0x28   :  { %s8064_s20 = sld [smem:[%s10255_s0 + %s7920_s15]]   ;;  %s7924_s15 = smov 27  }
  0x29   :  { %s8069_s27 = sld [smem:[%s10255_s0 + %s7921_s22]]   ;;  %s7925_s22 = smov 28  }
  0x2a   :  { %s8074_s4 = sld [smem:[%s10255_s0 + %s7922_s28]]   ;;  %s7926_s28 = smov 29  }
  0x2d   :  { %10323 = sst [smem:[#allocation18_spill]] %s8059_s6 }
  0x2e   :  { %10324 = sst [smem:[#allocation19_spill]] %s8064_s20 }
  0x2f   :  { %10325 = sst [smem:[#allocation20_spill]] %s8069_s27 }
  0x30   :  { %10326 = sst [smem:[#allocation21_spill]] %s8074_s4 }
  0x31   :  { %s8079_s6 = sld [smem:[%s10255_s0 + %s7923_s7]]   ;;  %s7927_s7 = smov 30  }
  0x32   :  { %s8084_s20 = sld [smem:[%s10255_s0 + %s7924_s15]]  }
  0x33   :  { %s8089_s27 = sld [smem:[%s10255_s0 + %s7925_s22]]  }
  0x34   :  { %s8094_s4 = sld [smem:[%s10255_s0 + %s7926_s28]]  }
  0x37   :  { %10327 = sst [smem:[#allocation22_spill]] %s8079_s6 }
  0x38   :  { %s8099_s6 = sld [smem:[%s10255_s0 + %s7927_s7]]  }
  0x3a   :  { %10328 = sst [smem:[#allocation23_spill]] %s8094_s4 }
  0x3b   :  { %66 = vsyncpa [#allocation3], 0 }
  0x3c   :  { %68 = vsyncpa [#allocation3 + $0x1], 0  ;;  %s8101_s15 = smov 0   ;;  %s8103_s16 = smov 0  }
  0x3d   :  { %s8105_s18 = smov 0   ;;  %s8107_s22 = smov 0  }
  0x3e LB: > { %s10329_s12 = sld [smem:[#allocation10_spill]]  ;;  %s10330_s9 = sld [smem:[#allocation6_spill]]  ;;  %s7892_s18 = sphi %s8105_s18, %s10423_s18   ;;  %s7888_s16 = sphi %s8103_s16, %s10422_s16   ;;  %s7884_s15 = sphi %s8101_s15, %s10421_s15   ;;  %s7896_s22 = sphi %s8107_s22, %s10424_s22  }
  0x3f   : > { %s10331_s8 = sld [smem:[#allocation8_spill]]  ;;  %s8122_s0 = sadd.s32 4294967295, %s7896_s22  }
  0x40   : > { %s6743_s23 = sadd.s32 4294967294, %s7896_s22   ;;  %s8126_s26 = sadd.s32 1, %s7896_s22  }
  0x41   : > { %s716_s28 = sadd.s32 1, %s7892_s18  ;;  %s713_s1 = ssub.s32 %s7896_s22, %s8126_s26 }
  0x42   : > { %p726_p0 = scmp.ne.s32.totalorder %s7892_s18, %s7888_s16  ;;  %p714_p1 = scmp.eq.s32.totalorder %s713_s1, 0 }
  0x43   : > { %p727_p2 = scmp.eq.s32.totalorder %s8122_s0, 1  ;;  %p732_p3 = scmp.ne.s32.totalorder %s7888_s16, %s7884_s15 }
  0x44   : > { %p733_p4 = scmp.eq.s32.totalorder %s6743_s23, 1  ;;  %p6746_p7 = scmp.ge.s32.totalorder %s7896_s22, 1 }
  0x45   : > { %s8137_s2 = scalar_select %p714_p1, %s7892_s18, %s716_s28  }
  0x46   : > { %p8139_p5 = por %p727_p2, %p726_p0  ;;  %p8143_p6 = por %p733_p4, %p732_p3 }
  0x47   : > { %p846_p8 = scmp.lt.s32.totalorder %s7896_s22, 3 }
  0x49   : > { %p847_p9 = pnand %p6746_p7, %p846_p8 }
  0x4b   : > { %850 = sbr.rel (%p847_p9) target bundleno = 4339 (0x10f3), region = 140 }
  0x52   : > { %v7384_v0 = vld [vmem:[%s10330_s9 + $0x4] ss:$16 sps:$4 sm:$0xff]   ;;  %v7386_v1 = vld [vmem:[%s10330_s9 + $0xc] ss:$16 sps:$4 sm:$0xff]   ;;  %v7388_v2 = vld [vmem:[%s10330_s9] ss:$16 sps:$4 sm:$0xff]  }
  0x53   : > { %2133 = vmatprep.subr.bf16.mxu0 %v7384_v0  ;;  %v7389_v3 = vld [vmem:[%s10330_s9 + $0x8] ss:$16 sps:$4 sm:$0xff]   ;;  %2286 = vmatprep.subr.bf16.mxu1 %v7386_v1  ;;  %v7390_v4 = vld [vmem:[%s10330_s9 + $0x24] ss:$16 sps:$4 sm:$0xff]   ;;  %v7392_v5 = vld [vmem:[%s10330_s9 + $0x2c] ss:$16 sps:$4 sm:$0xff]  }
  0x54   : > { %2134 = vmatpush1.bf16.msra.mxu0 %v7388_v2  ;;  %2287 = vmatpush1.bf16.msra.mxu1 %v7389_v3  ;;  %v7394_v6 = vld [vmem:[%s10330_s9 + $0x20] ss:$16 sps:$4 sm:$0xff]   ;;  %v7395_v7 = vld [vmem:[%s10330_s9 + $0x28] ss:$16 sps:$4 sm:$0xff]   ;;  %v7396_v8 = vld [vmem:[%s10330_s9 + $0x44] ss:$16 sps:$4 sm:$0xff]  }
  0x55   : > { %2135 = vmatprep.subr.bf16.mxu0 %v7390_v4  ;;  %2288 = vmatprep.subr.bf16.mxu1 %v7392_v5  ;;  %v7398_v9 = vld [vmem:[%s10330_s9 + $0x4c] ss:$16 sps:$4 sm:$0xff]   ;;  %v7400_v10 = vld [vmem:[%s10330_s9 + $0x40] ss:$16 sps:$4 sm:$0xff]   ;;  %v7401_v11 = vld [vmem:[%s10330_s9 + $0x48] ss:$16 sps:$4 sm:$0xff]  }
  0x56   : > { %v7402_v12 = vld [vmem:[%s10330_s9 + $0x64] ss:$16 sps:$4 sm:$0xff]   ;;  %v7404_v13 = vld [vmem:[%s10330_s9 + $0x6c] ss:$16 sps:$4 sm:$0xff]   ;;  %v7406_v14 = vld [vmem:[%s10330_s9 + $0x60] ss:$16 sps:$4 sm:$0xff]  }
  0x57   : > { %v7407_v15 = vld [vmem:[%s10330_s9 + $0x68] ss:$16 sps:$4 sm:$0xff]   ;;  %v7408_v16 = vld [vmem:[%s10330_s9 + $0x84] ss:$16 sps:$4 sm:$0xff]   ;;  %v7410_v17 = vld [vmem:[%s10330_s9 + $0x8c] ss:$16 sps:$4 sm:$0xff]  }
  0x58   : > { %2136 = vmatpush1.bf16.msra.mxu0 %v7394_v6  ;;  %2289 = vmatpush1.bf16.msra.mxu1 %v7395_v7  ;;  %v7412_v18 = vld [vmem:[%s10330_s9 + $0x80] ss:$16 sps:$4 sm:$0xff]   ;;  %v7413_v19 = vld [vmem:[%s10330_s9 + $0x88] ss:$16 sps:$4 sm:$0xff]   ;;  %v7414_v20 = vld [vmem:[%s10330_s9 + $0xa4] ss:$16 sps:$4 sm:$0xff]  }
  0x59   : > { %2137 = vmatprep.subr.bf16.mxu0 %v7396_v8  ;;  %2290 = vmatprep.subr.bf16.mxu1 %v7398_v9  ;;  %v7416_v21 = vld [vmem:[%s10330_s9 + $0xac] ss:$16 sps:$4 sm:$0xff]   ;;  %v7418_v22 = vld [vmem:[%s10330_s9 + $0xa0] ss:$16 sps:$4 sm:$0xff]   ;;  %v7419_v23 = vld [vmem:[%s10330_s9 + $0xa8] ss:$16 sps:$4 sm:$0xff]  }
  0x5a   : > { %v7420_v24 = vld [vmem:[%s10330_s9 + $0xc4] ss:$16 sps:$4 sm:$0xff]   ;;  %v7422_v25 = vld [vmem:[%s10330_s9 + $0xcc] ss:$16 sps:$4 sm:$0xff]   ;;  %v7424_v26 = vld [vmem:[%s10330_s9 + $0xc0] ss:$16 sps:$4 sm:$0xff]  }
  0x5b   : > { %v7425_v27 = vld [vmem:[%s10330_s9 + $0xc8] ss:$16 sps:$4 sm:$0xff]   ;;  %v7426_v28 = vld [vmem:[%s10330_s9 + $0xe4] ss:$16 sps:$4 sm:$0xff]   ;;  %v7428_v29 = vld [vmem:[%s10330_s9 + $0xec] ss:$16 sps:$4 sm:$0xff]  }
  0x5c   : > { %2138 = vmatpush1.bf16.msra.mxu0 %v7400_v10  ;;  %2291 = vmatpush1.bf16.msra.mxu1 %v7401_v11  ;;  %v7430_v30 = vld [vmem:[%s10330_s9 + $0xe0] ss:$16 sps:$4 sm:$0xff]   ;;  %p923_p10 = scmp.lt.s32.totalorder %s8122_s0, 1  ;;  %v7431_v31 = vld [vmem:[%s10330_s9 + $0xe8] ss:$16 sps:$4 sm:$0xff]   ;;  %s10334_s5 = sld [smem:[#allocation5_spill]] }
  0x5d   : > { %2139 = vmatprep.subr.bf16.mxu0 %v7402_v12  ;;  %2292 = vmatprep.subr.bf16.mxu1 %v7404_v13  ;;  %v7432_v32 = vld [vmem:[%s10330_s9 + $0x104] ss:$16 sps:$4 sm:$0xff]   ;;  %v7434_v33 = vld [vmem:[%s10330_s9 + $0x10c] ss:$16 sps:$4 sm:$0xff]   ;;  %v7436_v34 = vld [vmem:[%s10330_s9 + $0x100] ss:$16 sps:$4 sm:$0xff]  }
  0x5e   : > { %v7437_v35 = vld [vmem:[%s10330_s9 + $0x108] ss:$16 sps:$4 sm:$0xff]   ;;  %s924_s11 = scalar_select %p923_p10, %s8122_s0, 1  ;;  %v7438_v36 = vld [vmem:[%s10330_s9 + $0x124] ss:$16 sps:$4 sm:$0xff]   ;;  %vm2467_vm0 = vcmask 195584  }
  0x5f   : > { %v7440_v37 = vld [vmem:[%s10330_s9 + $0x12c] ss:$16 sps:$4 sm:$0xff]   ;;  %v7442_v38 = vld [vmem:[%s10330_s9 + $0x120] ss:$16 sps:$4 sm:$0xff]   ;;  %v7443_v39 = vld [vmem:[%s10330_s9 + $0x128] ss:$16 sps:$4 sm:$0xff]  }
  0x60   : > { %2140 = vmatpush1.bf16.msra.mxu0 %v7406_v14  ;;  %2293 = vmatpush1.bf16.msra.mxu1 %v7407_v15  ;;  %s7302_s23 = smul.u32 144, %s924_s11  ;;  %v7444_v40 = vld [vmem:[%s10330_s9 + $0x144] ss:$16 sps:$4 sm:$0xff]   ;;  %v7446_v41 = vld [vmem:[%s10330_s9 + $0x14c] ss:$16 sps:$4 sm:$0xff]   ;;  %s10299_s1 = smov 16  }
  0x61   : > { %2141 = vmatprep.subr.bf16.mxu0 %v7408_v16  ;;  %2294 = vmatprep.subr.bf16.mxu1 %v7410_v17  ;;  %v7448_v42 = vld [vmem:[%s10330_s9 + $0x140] ss:$16 sps:$4 sm:$0xff]   ;;  %v7449_v43 = vld [vmem:[%s10330_s9 + $0x148] ss:$16 sps:$4 sm:$0xff]   ;;  %v7450_v44 = vld [vmem:[%s10330_s9 + $0x164] ss:$16 sps:$4 sm:$0xff]  }
  0x62   : > { %s8196_s28 = scalar_lea.vmem %s10334_s5, %s7302_s23  ;;  %v7452_v45 = vld [vmem:[%s10330_s9 + $0x16c] ss:$16 sps:$4 sm:$0xff]   ;;  %v7454_v48 = vld [vmem:[%s10330_s9 + $0x160] ss:$16 sps:$4 sm:$0xff]   ;;  %v7455_v49 = vld [vmem:[%s10330_s9 + $0x168] ss:$16 sps:$4 sm:$0xff]  }
  0x63   : > { %v930_v46 = vld [vmem:[%s8196_s28 + $0x8] sm:$0xff]  ;;  %v936_v47 = vld [vmem:[%s8196_s28 + $0x38] sm:$0xff]  ;;  %v7456_v51 = vld [vmem:[%s10330_s9 + $0x184] ss:$16 sps:$4 sm:$0xff]   ;;  %s10295_s11 = smov 32   ;;  %vm2724_vm1 = vcmask 130048  }
  0x64   : > { %2142 = vmatpush1.bf16.msra.mxu0 %v7412_v18  ;;  %2295 = vmatpush1.bf16.msra.mxu1 %v7413_v19  ;;  %v948_v50 = vpack.c.bf16 %v936_v47, %v930_v46  ;;  %v7458_v52 = vld [vmem:[%s10330_s9 + $0x18c] ss:$16 sps:$4 sm:$0xff]   ;;  %v7460_v53 = vld [vmem:[%s10330_s9 + $0x180] ss:$16 sps:$4 sm:$0xff]   ;;  %v7461_v54 = vld [vmem:[%s10330_s9 + $0x188] ss:$16 sps:$4 sm:$0xff]  }
  0x65   : > { %2143 = vmatprep.subr.bf16.mxu0 %v7414_v20  ;;  %2296 = vmatprep.subr.bf16.mxu1 %v7416_v21  ;;  %v7462_v55 = vld [vmem:[%s10330_s9 + $0x1a4] ss:$16 sps:$4 sm:$0xff]   ;;  %v7464_v56 = vld [vmem:[%s10330_s9 + $0x1ac] ss:$16 sps:$4 sm:$0xff]   ;;  %v7466_v57 = vld [vmem:[%s10330_s9 + $0x1a0] ss:$16 sps:$4 sm:$0xff]  }
  0x66   : > { %2165 = vmatprep.mubr.bf16.mxu0 %v948_v50  ;;  %2318 = vmatprep.mubr.bf16.mxu1 %v948_v50  ;;  %v7467_v58 = vld [vmem:[%s10330_s9 + $0x1a8] ss:$16 sps:$4 sm:$0xff]   ;;  %v7468_v59 = vld [vmem:[%s10330_s9 + $0x1c4] ss:$16 sps:$4 sm:$0xff]   ;;  %v7470_v60 = vld [vmem:[%s10330_s9 + $0x1cc] ss:$16 sps:$4 sm:$0xff]  }
  0x67   : > { %v7472_v61 = vld [vmem:[%s10330_s9 + $0x1c0] ss:$16 sps:$4 sm:$0xff]   ;;  %v7473_v62 = vld [vmem:[%s10330_s9 + $0x1c8] ss:$16 sps:$4 sm:$0xff]   ;;  %v7474_v63 = vld [vmem:[%s10330_s9 + $0x1e4] ss:$16 sps:$4 sm:$0xff]  }
  0x68   : > { %2144 = vmatpush1.bf16.msra.mxu0 %v7418_v22  ;;  %2297 = vmatpush1.bf16.msra.mxu1 %v7419_v23  ;;  %v7476_v0 = vld [vmem:[%s10330_s9 + $0x1ec] ss:$16 sps:$4 sm:$0xff]   ;;  %v7478_v1 = vld [vmem:[%s10330_s9 + $0x1e0] ss:$16 sps:$4 sm:$0xff]   ;;  %v7479_v2 = vld [vmem:[%s10330_s9 + $0x1e8] ss:$16 sps:$4 sm:$0xff]  }
  0x69   : > { %2145 = vmatprep.subr.bf16.mxu0 %v7420_v24  ;;  %2298 = vmatprep.subr.bf16.mxu1 %v7422_v25  ;;  %v7482_v3 = vld [vmem:[%s10330_s9 + $0x204] ss:$16 sps:$4 sm:$0xff]   ;;  %v7485_v6 = vld [vmem:[%s10330_s9 + $0x20c] ss:$16 sps:$4 sm:$0xff]   ;;  %v7480_v7 = vld [vmem:[%s10330_s9 + $0x200] ss:$16 sps:$4 sm:$0xff]  }
  0x6a   : > { %v929_v4 = vld [vmem:[%s8196_s28] sm:$0xff]  ;;  %v935_v5 = vld [vmem:[%s8196_s28 + $0x30] sm:$0xff]  ;;  %v7483_v8 = vld [vmem:[%s10330_s9 + $0x208] ss:$16 sps:$4 sm:$0xff]   ;;  %vm2835_vm2 = vcmask 261120   ;;  %s10297_s23 = smov 112  }
  0x6b   : > { %v947_v9 = vpack.c.bf16 %v935_v5, %v929_v4  ;;  %v7488_v10 = vld [vmem:[%s10330_s9 + $0x224] ss:$16 sps:$4 sm:$0xff]   ;;  %v7491_v11 = vld [vmem:[%s10330_s9 + $0x22c] ss:$16 sps:$4 sm:$0xff]   ;;  %v7486_v12 = vld [vmem:[%s10330_s9 + $0x220] ss:$16 sps:$4 sm:$0xff]  }
  0x6c   : > { %2146 = vmatpush1.bf16.msra.mxu0 %v7424_v26  ;;  %2299 = vmatpush1.bf16.msra.mxu1 %v7425_v27  ;;  %v7489_v13 = vld [vmem:[%s10330_s9 + $0x228] ss:$16 sps:$4 sm:$0xff]   ;;  %v7494_v14 = vld [vmem:[%s10330_s9 + $0x244] ss:$16 sps:$4 sm:$0xff]   ;;  %v7497_v15 = vld [vmem:[%s10330_s9 + $0x24c] ss:$16 sps:$4 sm:$0xff]  }
  0x6d   : > { %2147 = vmatprep.subr.bf16.mxu0 %v7426_v28  ;;  %2300 = vmatprep.subr.bf16.mxu1 %v7428_v29  ;;  %v7492_v16 = vld [vmem:[%s10330_s9 + $0x240] ss:$16 sps:$4 sm:$0xff]   ;;  %v7495_v17 = vld [vmem:[%s10330_s9 + $0x248] ss:$16 sps:$4 sm:$0xff]   ;;  %v7500_v18 = vld [vmem:[%s10330_s9 + $0x264] ss:$16 sps:$4 sm:$0xff]  }
  0x6e   : > { %v7503_v19 = vld [vmem:[%s10330_s9 + $0x26c] ss:$16 sps:$4 sm:$0xff]   ;;  %v7498_v20 = vld [vmem:[%s10330_s9 + $0x260] ss:$16 sps:$4 sm:$0xff]   ;;  %v7501_v21 = vld [vmem:[%s10330_s9 + $0x268] ss:$16 sps:$4 sm:$0xff]  }
  0x6f   : > { %v7506_v22 = vld [vmem:[%s10330_s9 + $0x284] ss:$16 sps:$4 sm:$0xff]   ;;  %v7509_v23 = vld [vmem:[%s10330_s9 + $0x28c] ss:$16 sps:$4 sm:$0xff]   ;;  %v7504_v24 = vld [vmem:[%s10330_s9 + $0x280] ss:$16 sps:$4 sm:$0xff]  }
  0x70   : > { %2148 = vmatpush1.bf16.msra.mxu0 %v7430_v30  ;;  %2301 = vmatpush1.bf16.msra.mxu1 %v7431_v31  ;;  %v7507_v25 = vld [vmem:[%s10330_s9 + $0x288] ss:$16 sps:$4 sm:$0xff]   ;;  %v7512_v26 = vld [vmem:[%s10330_s9 + $0x2a4] ss:$16 sps:$4 sm:$0xff]   ;;  %v7515_v27 = vld [vmem:[%s10330_s9 + $0x2ac] ss:$16 sps:$4 sm:$0xff]  }
  0x71   : > { %2149 = vmatprep.subr.bf16.mxu0 %v7432_v32  ;;  %2302 = vmatprep.subr.bf16.mxu1 %v7434_v33  ;;  %v942_v28 = vld [vmem:[%s8196_s28 + $0x68] sm:$0xff]  ;;  %v7510_v30 = vld [vmem:[%s10330_s9 + $0x2a0] ss:$16 sps:$4 sm:$0xff]   ;;  %v7518_v33 = vld [vmem:[%s10330_s9 + $0x2c4] ss:$16 sps:$4 sm:$0xff]   ;;  %vm2658_vm3 = vcmask 1047808  }
  0x72   : > { %v954_v29 = vpack.c.bf16 %v942_v28, %v942_v28  ;;  %v7513_v31 = vld [vmem:[%s10330_s9 + $0x2a8] ss:$16 sps:$4 sm:$0xff]   ;;  %v941_v32 = vld [vmem:[%s8196_s28 + $0x60] sm:$0xff]  ;;  %v7533_v46 = vld [vmem:[%s10330_s9 + $0x30c] ss:$16 sps:$4 sm:$0xff]   ;;  %vm2780_vm4 = vcmask 916480  }
  0x73   : > { %v7528_v47 = vld [vmem:[%s10330_s9 + $0x300] ss:$16 sps:$4 sm:$0xff]   ;;  %v7539_v50 = vld [vmem:[%s10330_s9 + $0x32c] ss:$16 sps:$4 sm:$0xff]   ;;  %v7561_v4 = vld [vmem:[%s10330_s9 + $0x3a8] ss:$16 sps:$4 sm:$0xff]  }
  0x74   : > { %2150 = vmatpush1.bf16.msra.mxu0 %v7436_v34  ;;  %2303 = vmatpush1.bf16.msra.mxu1 %v7437_v35  ;;  %v7521_v34 = vld [vmem:[%s10330_s9 + $0x2cc] ss:$16 sps:$4 sm:$0xff]   ;;  %v953_v35 = vpack.c.bf16 %v941_v32, %v941_v32  ;;  %v7566_v5 = vld [vmem:[%s10330_s9 + $0x3c4] ss:$16 sps:$4 sm:$0xff]   ;;  %vm2891_vm5 = vcmask 785408   ;;  %vm3579_vm6 = vcmask 1045504  }
  0x75   : > { %2151 = vmatprep.subr.bf16.mxu0 %v7438_v36  ;;  %2304 = vmatprep.subr.bf16.mxu1 %v7440_v37  ;;  %v7516_v36 = vld [vmem:[%s10330_s9 + $0x2c0] ss:$16 sps:$4 sm:$0xff]   ;;  %v7519_v37 = vld [vmem:[%s10330_s9 + $0x2c8] ss:$16 sps:$4 sm:$0xff]   ;;  %v7593_v28 = vld [vmem:[%s10330_s9 + $0x44c] ss:$16 sps:$4 sm:$0xff]  }
  0x76   : > { %v940_v32 = vld [vmem:[%s8196_s28 + $0x58] sm:$0xff]  ;;  %vm3229_vm7 = vcmask 1046528   ;;  %s10399_s3 = sld [smem:[#allocation7_spill]]  ;;  %vm4234_vm8 = vcmask 64512   ;;  %vm4188_vm9 = vcmask 1048192   ;;  %vm4262_vm10 = vcmask 982016  }
  0x77   : > { %vm4915_vm11 = vcmask 523264   ;;  %vm5070_vm12 = vcmask 1048320   ;;  %s10408_s5 = sld [smem:[#allocation13_spill]]  ;;  %vm5672_vm13 = vcmask 1043456   ;;  %vm7937_vm14 = vmmov 1   ;;  %s10420_s4 = sld [smem:[#allocation23_spill]] }
  0x78   : > { %2152 = vmatpush1.bf16.msra.mxu0 %v7442_v38  ;;  %2305 = vmatpush1.bf16.msra.mxu1 %v7443_v39  ;;  %v932_v38 = vld [vmem:[%s8196_s28 + $0x18] sm:$0xff]  ;;  %v938_v39 = vld [vmem:[%s8196_s28 + $0x48] sm:$0xff]  ;;  %vm10009_vm15 = vmpackc.low %vm5672_vm13, %vm7937_vm14 }
  0x79   : > { %2153 = vmatprep.subr.bf16.mxu0 %v7444_v40  ;;  %2306 = vmatprep.subr.bf16.mxu1 %v7446_v41  ;;  %v7524_v40 = vld [vmem:[%s10330_s9 + $0x2e4] ss:$16 sps:$4 sm:$0xff]   ;;  %v950_v41 = vpack.c.bf16 %v938_v39, %v932_v38 }
  0x7a   : > { %v7602_v39 = vld [vmem:[%s10330_s9 + $0x484] ss:$16 sps:$4 sm:$0xff]  }
  0x7c   : > { %2154 = vmatpush1.bf16.msra.mxu0 %v7448_v42  ;;  %2307 = vmatpush1.bf16.msra.mxu1 %v7449_v43  ;;  %v7527_v42 = vld [vmem:[%s10330_s9 + $0x2ec] ss:$16 sps:$4 sm:$0xff]   ;;  %v7522_v43 = vld [vmem:[%s10330_s9 + $0x2e0] ss:$16 sps:$4 sm:$0xff]  }
  0x7d   : > { %2155 = vmatprep.subr.bf16.mxu0 %v7450_v44  ;;  %2308 = vmatprep.subr.bf16.mxu1 %v7452_v45  ;;  %v7525_v44 = vld [vmem:[%s10330_s9 + $0x2e8] ss:$16 sps:$4 sm:$0xff]   ;;  %v7530_v45 = vld [vmem:[%s10330_s9 + $0x304] ss:$16 sps:$4 sm:$0xff]  }
  0x80   : > { %2156 = vmatpush1.bf16.msra.mxu0 %v7454_v48  ;;  %2309 = vmatpush1.bf16.msra.mxu1 %v7455_v49  ;;  %v7531_v48 = vld [vmem:[%s10330_s9 + $0x308] ss:$16 sps:$4 sm:$0xff]   ;;  %v7536_v49 = vld [vmem:[%s10330_s9 + $0x324] ss:$16 sps:$4 sm:$0xff]  }
  0x81   : > { %2157 = vmatprep.subr.bf16.mxu0 %v7456_v51  ;;  %2310 = vmatprep.subr.bf16.mxu1 %v7458_v52  ;;  %v7534_v51 = vld [vmem:[%s10330_s9 + $0x320] ss:$16 sps:$4 sm:$0xff]   ;;  %v7537_v52 = vld [vmem:[%s10330_s9 + $0x328] ss:$16 sps:$4 sm:$0xff]  }
  0x84   : > { %2158 = vmatpush1.bf16.msra.mxu0 %v7460_v53  ;;  %2311 = vmatpush1.bf16.msra.mxu1 %v7461_v54  ;;  %v7542_v53 = vld [vmem:[%s10330_s9 + $0x344] ss:$16 sps:$4 sm:$0xff]   ;;  %v7545_v54 = vld [vmem:[%s10330_s9 + $0x34c] ss:$16 sps:$4 sm:$0xff]  }
  0x85   : > { %2159 = vmatprep.subr.bf16.mxu0 %v7462_v55  ;;  %2312 = vmatprep.subr.bf16.mxu1 %v7464_v56  ;;  %v7540_v55 = vld [vmem:[%s10330_s9 + $0x340] ss:$16 sps:$4 sm:$0xff]   ;;  %v7543_v56 = vld [vmem:[%s10330_s9 + $0x348] ss:$16 sps:$4 sm:$0xff]  }
  0x88   : > { %2160 = vmatpush1.bf16.msra.mxu0 %v7466_v57  ;;  %2313 = vmatpush1.bf16.msra.mxu1 %v7467_v58  ;;  %v7548_v57 = vld [vmem:[%s10330_s9 + $0x364] ss:$16 sps:$4 sm:$0xff]   ;;  %v7551_v58 = vld [vmem:[%s10330_s9 + $0x36c] ss:$16 sps:$4 sm:$0xff]  }
  0x89   : > { %2161 = vmatprep.subr.bf16.mxu0 %v7468_v59  ;;  %2314 = vmatprep.subr.bf16.mxu1 %v7470_v60  ;;  %v7546_v59 = vld [vmem:[%s10330_s9 + $0x360] ss:$16 sps:$4 sm:$0xff]   ;;  %v7549_v60 = vld [vmem:[%s10330_s9 + $0x368] ss:$16 sps:$4 sm:$0xff]  }
  0x8c   : > { %2162 = vmatpush1.bf16.msra.mxu0 %v7472_v61  ;;  %2315 = vmatpush1.bf16.msra.mxu1 %v7473_v62  ;;  %v7554_v61 = vld [vmem:[%s10330_s9 + $0x384] ss:$16 sps:$4 sm:$0xff]   ;;  %v7557_v62 = vld [vmem:[%s10330_s9 + $0x38c] ss:$16 sps:$4 sm:$0xff]  }
  0x8d   : > { %2163 = vmatprep.subr.bf16.mxu0 %v7474_v63  ;;  %2316 = vmatprep.subr.bf16.mxu1 %v7476_v0  ;;  %v7552_v63 = vld [vmem:[%s10330_s9 + $0x380] ss:$16 sps:$4 sm:$0xff]   ;;  %v7555_v0 = vld [vmem:[%s10330_s9 + $0x388] ss:$16 sps:$4 sm:$0xff]  }
  0x90   : > { %2164 = vmatpush1.bf16.msra.mxu0 %v7478_v1  ;;  %2317 = vmatpush1.bf16.msra.mxu1 %v7479_v2  ;;  %v7560_v1 = vld [vmem:[%s10330_s9 + $0x3a4] ss:$16 sps:$4 sm:$0xff]   ;;  %v7563_v2 = vld [vmem:[%s10330_s9 + $0x3ac] ss:$16 sps:$4 sm:$0xff]  }
  0x91   : > { %2184 = vmatprep.subr.bf16.mxu0 %v7482_v3  ;;  %2337 = vmatprep.subr.bf16.mxu1 %v7485_v6  ;;  %v7558_v3 = vld [vmem:[%s10330_s9 + $0x3a0] ss:$16 sps:$4 sm:$0xff]   ;;  %v7569_v6 = vld [vmem:[%s10330_s9 + $0x3cc] ss:$16 sps:$4 sm:$0xff]  }
  0x93   : > { %2166 = vmatmul.mubr.bf16.vlgmr.msra.gmra.mrb[0].mxu0 %v947_v9  ;;  %2319 = vmatmul.mubr.bf16.vlgmr.msra.gmra.mrb[0].mxu1 %v947_v9  ;;  %v7572_v9 = vld [vmem:[%s10330_s9 + $0x3e4] ss:$16 sps:$4 sm:$0xff]  }
  0x94   : > { %2185 = vmatpush1.bf16.msra.mxu0 %v7480_v7  ;;  %2338 = vmatpush1.bf16.msra.mxu1 %v7483_v8  ;;  %v7564_v7 = vld [vmem:[%s10330_s9 + $0x3c0] ss:$16 sps:$4 sm:$0xff]   ;;  %v7567_v8 = vld [vmem:[%s10330_s9 + $0x3c8] ss:$16 sps:$4 sm:$0xff]  }
  0x95   : > { %2186 = vmatprep.subr.bf16.mxu0 %v7488_v10  ;;  %2339 = vmatprep.subr.bf16.mxu1 %v7491_v11  ;;  %v7575_v10 = vld [vmem:[%s10330_s9 + $0x3ec] ss:$16 sps:$4 sm:$0xff]   ;;  %v7570_v11 = vld [vmem:[%s10330_s9 + $0x3e0] ss:$16 sps:$4 sm:$0xff]  }
  0x96   : > { %2175 = vmatprep.mubr.bf16.mxu0 %v954_v29  ;;  %2328 = vmatprep.mubr.bf16.mxu1 %v954_v29  ;;  %v934_v29 = vld [vmem:[%s8196_s28 + $0x28] sm:$0xff] }
  0x97   : > { %v952_v38 = vpack.c.bf16 %v940_v32, %v934_v29 }
  0x98   : > { %2187 = vmatpush1.bf16.msra.mxu0 %v7486_v12  ;;  %2340 = vmatpush1.bf16.msra.mxu1 %v7489_v13  ;;  %v7573_v12 = vld [vmem:[%s10330_s9 + $0x3e8] ss:$16 sps:$4 sm:$0xff]   ;;  %v931_v13 = vld [vmem:[%s8196_s28 + $0x10] sm:$0xff] }
  0x99   : > { %2188 = vmatprep.subr.bf16.mxu0 %v7494_v14  ;;  %2341 = vmatprep.subr.bf16.mxu1 %v7497_v15  ;;  %v937_v14 = vld [vmem:[%s8196_s28 + $0x40] sm:$0xff] }
  0x9a   : > { %v7578_v15 = vld [vmem:[%s10330_s9 + $0x404] ss:$16 sps:$4 sm:$0xff]  }
  0x9b   : > { %2176 = vmatmul.mubr.bf16.gmra.mrb[4].mxu0 %v953_v35  ;;  %2329 = vmatmul.mubr.bf16.gmra.mrb[4].mxu1 %v953_v35 }
  0x9c   : > { %2189 = vmatpush1.bf16.msra.mxu0 %v7492_v16  ;;  %2342 = vmatpush1.bf16.msra.mxu1 %v7495_v17  ;;  %v7581_v16 = vld [vmem:[%s10330_s9 + $0x40c] ss:$16 sps:$4 sm:$0xff]   ;;  %v7576_v17 = vld [vmem:[%s10330_s9 + $0x400] ss:$16 sps:$4 sm:$0xff]  }
  0x9d   : > { %2190 = vmatprep.subr.bf16.mxu0 %v7500_v18  ;;  %2343 = vmatprep.subr.bf16.mxu1 %v7503_v19  ;;  %v7579_v18 = vld [vmem:[%s10330_s9 + $0x408] ss:$16 sps:$4 sm:$0xff]   ;;  %v949_v19 = vpack.c.bf16 %v937_v14, %v931_v13  ;;  %v7654_v13 = vld [vmem:[%s10330_s9 + $0x5a0] ss:$16 sps:$4 sm:$0xff]  }
  0x9e   : > { %2216 = vmatprep.mubr.bf16.mxu0 %v950_v41  ;;  %2369 = vmatprep.mubr.bf16.mxu1 %v950_v41  ;;  %v7600_v41 = vld [vmem:[%s10330_s9 + $0x480] ss:$16 sps:$4 sm:$0xff]   ;;  %v7657_v14 = vld [vmem:[%s10330_s9 + $0x5a8] ss:$16 sps:$4 sm:$0xff]  }
  0xa0   : > { %2191 = vmatpush1.bf16.msra.mxu0 %v7498_v20  ;;  %2344 = vmatpush1.bf16.msra.mxu1 %v7501_v21  ;;  %v944_v20 = vld [vmem:[%s8196_s28 + $0x78] sm:$0xff]  ;;  %v7584_v21 = vld [vmem:[%s10330_s9 + $0x424] ss:$16 sps:$4 sm:$0xff]  }
  0xa1   : > { %2192 = vmatprep.subr.bf16.mxu0 %v7506_v22  ;;  %2345 = vmatprep.subr.bf16.mxu1 %v7509_v23  ;;  %v7587_v22 = vld [vmem:[%s10330_s9 + $0x42c] ss:$16 sps:$4 sm:$0xff]   ;;  %v956_v23 = vpack.c.bf16 %v944_v20, %v944_v20 }
  0xa2   : > { %v7671_v20 = vld [vmem:[%s10330_s9 + $0x5ec] ss:$16 sps:$4 sm:$0xff]  }
  0xa4   : > { %2193 = vmatpush1.bf16.msra.mxu0 %v7504_v24  ;;  %2346 = vmatpush1.bf16.msra.mxu1 %v7507_v25  ;;  %v7582_v24 = vld [vmem:[%s10330_s9 + $0x420] ss:$16 sps:$4 sm:$0xff]   ;;  %v7585_v25 = vld [vmem:[%s10330_s9 + $0x428] ss:$16 sps:$4 sm:$0xff]  }
  0xa5   : > { %2194 = vmatprep.subr.bf16.mxu0 %v7512_v26  ;;  %2347 = vmatprep.subr.bf16.mxu1 %v7515_v27  ;;  %v943_v26 = vld [vmem:[%s8196_s28 + $0x70] sm:$0xff] }
  0xa6   : > { %v7590_v27 = vld [vmem:[%s10330_s9 + $0x444] ss:$16 sps:$4 sm:$0xff]   ;;  %v955_v35 = vpack.c.bf16 %v943_v26, %v943_v26 }
  0xa8   : > { %2195 = vmatpush1.bf16.msra.mxu0 %v7510_v30  ;;  %2348 = vmatpush1.bf16.msra.mxu1 %v7513_v31  ;;  %v7588_v30 = vld [vmem:[%s10330_s9 + $0x440] ss:$16 sps:$4 sm:$0xff]   ;;  %v7591_v31 = vld [vmem:[%s10330_s9 + $0x448] ss:$16 sps:$4 sm:$0xff]  }
  0xa9   : > { %2196 = vmatprep.subr.bf16.mxu0 %v7518_v33  ;;  %2349 = vmatprep.subr.bf16.mxu1 %v7521_v34  ;;  %v7596_v33 = vld [vmem:[%s10330_s9 + $0x464] ss:$16 sps:$4 sm:$0xff]   ;;  %v7599_v34 = vld [vmem:[%s10330_s9 + $0x46c] ss:$16 sps:$4 sm:$0xff]  }
  0xac   : > { %2197 = vmatpush1.bf16.msra.mxu0 %v7516_v36  ;;  %2350 = vmatpush1.bf16.msra.mxu1 %v7519_v37  ;;  %v7594_v36 = vld [vmem:[%s10330_s9 + $0x460] ss:$16 sps:$4 sm:$0xff]   ;;  %v7597_v37 = vld [vmem:[%s10330_s9 + $0x468] ss:$16 sps:$4 sm:$0xff]  }
  0xad   : > { %2198 = vmatprep.subr.bf16.mxu0 %v7524_v40  ;;  %2351 = vmatprep.subr.bf16.mxu1 %v7527_v42  ;;  %v7605_v40 = vld [vmem:[%s10330_s9 + $0x48c] ss:$16 sps:$4 sm:$0xff]   ;;  %v7603_v42 = vld [vmem:[%s10330_s9 + $0x488] ss:$16 sps:$4 sm:$0xff]  }
  0xb0   : > { %2199 = vmatpush1.bf16.msra.mxu0 %v7522_v43  ;;  %2352 = vmatpush1.bf16.msra.mxu1 %v7525_v44  ;;  %v7608_v43 = vld [vmem:[%s10330_s9 + $0x4a4] ss:$16 sps:$4 sm:$0xff]   ;;  %v7611_v44 = vld [vmem:[%s10330_s9 + $0x4ac] ss:$16 sps:$4 sm:$0xff]  }
  0xb1   : > { %2200 = vmatprep.subr.bf16.mxu0 %v7530_v45  ;;  %2353 = vmatprep.subr.bf16.mxu1 %v7533_v46  ;;  %v7606_v45 = vld [vmem:[%s10330_s9 + $0x4a0] ss:$16 sps:$4 sm:$0xff]   ;;  %v7609_v46 = vld [vmem:[%s10330_s9 + $0x4a8] ss:$16 sps:$4 sm:$0xff]  }
  0xb4   : > { %2201 = vmatpush1.bf16.msra.mxu0 %v7528_v47  ;;  %2354 = vmatpush1.bf16.msra.mxu1 %v7531_v48  ;;  %v7614_v47 = vld [vmem:[%s10330_s9 + $0x4c4] ss:$16 sps:$4 sm:$0xff]   ;;  %v7617_v48 = vld [vmem:[%s10330_s9 + $0x4cc] ss:$16 sps:$4 sm:$0xff]  }
  0xb5   : > { %2202 = vmatprep.subr.bf16.mxu0 %v7536_v49  ;;  %2355 = vmatprep.subr.bf16.mxu1 %v7539_v50  ;;  %v7612_v49 = vld [vmem:[%s10330_s9 + $0x4c0] ss:$16 sps:$4 sm:$0xff]   ;;  %v7615_v50 = vld [vmem:[%s10330_s9 + $0x4c8] ss:$16 sps:$4 sm:$0xff]  }
  0xb8   : > { %2203 = vmatpush1.bf16.msra.mxu0 %v7534_v51  ;;  %2356 = vmatpush1.bf16.msra.mxu1 %v7537_v52  ;;  %v7620_v51 = vld [vmem:[%s10330_s9 + $0x4e4] ss:$16 sps:$4 sm:$0xff]   ;;  %v7623_v52 = vld [vmem:[%s10330_s9 + $0x4ec] ss:$16 sps:$4 sm:$0xff]  }
  0xb9   : > { %2204 = vmatprep.subr.bf16.mxu0 %v7542_v53  ;;  %2357 = vmatprep.subr.bf16.mxu1 %v7545_v54  ;;  %v7618_v53 = vld [vmem:[%s10330_s9 + $0x4e0] ss:$16 sps:$4 sm:$0xff]   ;;  %v7621_v54 = vld [vmem:[%s10330_s9 + $0x4e8] ss:$16 sps:$4 sm:$0xff]  }
  0xbc   : > { %2205 = vmatpush1.bf16.msra.mxu0 %v7540_v55  ;;  %2358 = vmatpush1.bf16.msra.mxu1 %v7543_v56  ;;  %v7626_v55 = vld [vmem:[%s10330_s9 + $0x504] ss:$16 sps:$4 sm:$0xff]   ;;  %v7629_v56 = vld [vmem:[%s10330_s9 + $0x50c] ss:$16 sps:$4 sm:$0xff]  }
  0xbd   : > { %2206 = vmatprep.subr.bf16.mxu0 %v7548_v57  ;;  %2359 = vmatprep.subr.bf16.mxu1 %v7551_v58  ;;  %v7624_v57 = vld [vmem:[%s10330_s9 + $0x500] ss:$16 sps:$4 sm:$0xff]   ;;  %v7627_v58 = vld [vmem:[%s10330_s9 + $0x508] ss:$16 sps:$4 sm:$0xff]  }
  0xc0   : > { %2207 = vmatpush1.bf16.msra.mxu0 %v7546_v59  ;;  %2360 = vmatpush1.bf16.msra.mxu1 %v7549_v60  ;;  %v7632_v59 = vld [vmem:[%s10330_s9 + $0x524] ss:$16 sps:$4 sm:$0xff]   ;;  %v7635_v60 = vld [vmem:[%s10330_s9 + $0x52c] ss:$16 sps:$4 sm:$0xff]  }
  0xc1   : > { %2208 = vmatprep.subr.bf16.mxu0 %v7554_v61  ;;  %2361 = vmatprep.subr.bf16.mxu1 %v7557_v62  ;;  %v7630_v61 = vld [vmem:[%s10330_s9 + $0x520] ss:$16 sps:$4 sm:$0xff]   ;;  %v7633_v62 = vld [vmem:[%s10330_s9 + $0x528] ss:$16 sps:$4 sm:$0xff]  }
  0xc4   : > { %2209 = vmatpush1.bf16.msra.mxu0 %v7552_v63  ;;  %2362 = vmatpush1.bf16.msra.mxu1 %v7555_v0  ;;  %v7638_v63 = vld [vmem:[%s10330_s9 + $0x544] ss:$16 sps:$4 sm:$0xff]   ;;  %v7641_v0 = vld [vmem:[%s10330_s9 + $0x54c] ss:$16 sps:$4 sm:$0xff]  }
  0xc5   : > { %2210 = vmatprep.subr.bf16.mxu0 %v7560_v1  ;;  %2363 = vmatprep.subr.bf16.mxu1 %v7563_v2  ;;  %v7636_v1 = vld [vmem:[%s10330_s9 + $0x540] ss:$16 sps:$4 sm:$0xff]   ;;  %v7639_v2 = vld [vmem:[%s10330_s9 + $0x548] ss:$16 sps:$4 sm:$0xff]  }
  0xc8   : > { %2211 = vmatpush1.bf16.msra.mxu0 %v7558_v3  ;;  %2364 = vmatpush1.bf16.msra.mxu1 %v7561_v4  ;;  %v7644_v3 = vld [vmem:[%s10330_s9 + $0x564] ss:$16 sps:$4 sm:$0xff]   ;;  %v7647_v4 = vld [vmem:[%s10330_s9 + $0x56c] ss:$16 sps:$4 sm:$0xff]  }
  0xc9   : > { %2212 = vmatprep.subr.bf16.mxu0 %v7566_v5  ;;  %2365 = vmatprep.subr.bf16.mxu1 %v7569_v6  ;;  %v7642_v5 = vld [vmem:[%s10330_s9 + $0x560] ss:$16 sps:$4 sm:$0xff]   ;;  %v7645_v6 = vld [vmem:[%s10330_s9 + $0x568] ss:$16 sps:$4 sm:$0xff]  }
  0xcc   : > { %2213 = vmatpush1.bf16.msra.mxu0 %v7564_v7  ;;  %2366 = vmatpush1.bf16.msra.mxu1 %v7567_v8  ;;  %v7650_v7 = vld [vmem:[%s10330_s9 + $0x584] ss:$16 sps:$4 sm:$0xff]   ;;  %v7653_v8 = vld [vmem:[%s10330_s9 + $0x58c] ss:$16 sps:$4 sm:$0xff]  }
  0xcd   : > { %2214 = vmatprep.subr.bf16.mxu0 %v7572_v9  ;;  %2367 = vmatprep.subr.bf16.mxu1 %v7575_v10  ;;  %v7648_v9 = vld [vmem:[%s10330_s9 + $0x580] ss:$16 sps:$4 sm:$0xff]   ;;  %v7651_v10 = vld [vmem:[%s10330_s9 + $0x588] ss:$16 sps:$4 sm:$0xff]  }
  0xd0   : > { %2215 = vmatpush1.bf16.msra.mxu0 %v7570_v11  ;;  %2368 = vmatpush1.bf16.msra.mxu1 %v7573_v12  ;;  %v7656_v11 = vld [vmem:[%s10330_s9 + $0x5a4] ss:$16 sps:$4 sm:$0xff]   ;;  %v7659_v12 = vld [vmem:[%s10330_s9 + $0x5ac] ss:$16 sps:$4 sm:$0xff]  }
  0xd1   : > { %2235 = vmatprep.subr.bf16.mxu0 %v7578_v15  ;;  %2388 = vmatprep.subr.bf16.mxu1 %v7581_v16  ;;  %v7662_v15 = vld [vmem:[%s10330_s9 + $0x5c4] ss:$16 sps:$4 sm:$0xff]   ;;  %v7665_v16 = vld [vmem:[%s10330_s9 + $0x5cc] ss:$16 sps:$4 sm:$0xff]  }
  0xd3   : > { %2217 = vmatmul.mubr.bf16.vlgmr.msra.gmra.mrb[0].mxu0 %v949_v19  ;;  %2370 = vmatmul.mubr.bf16.vlgmr.msra.gmra.mrb[0].mxu1 %v949_v19  ;;  %v7668_v19 = vld [vmem:[%s10330_s9 + $0x5e4] ss:$16 sps:$4 sm:$0xff]  }
  0xd4   : > { %2236 = vmatpush1.bf16.msra.mxu0 %v7576_v17  ;;  %2389 = vmatpush1.bf16.msra.mxu1 %v7579_v18  ;;  %v7660_v17 = vld [vmem:[%s10330_s9 + $0x5c0] ss:$16 sps:$4 sm:$0xff]   ;;  %v7663_v18 = vld [vmem:[%s10330_s9 + $0x5c8] ss:$16 sps:$4 sm:$0xff]  }
  0xd5   : > { %2237 = vmatprep.subr.bf16.mxu0 %v7584_v21  ;;  %2390 = vmatprep.subr.bf16.mxu1 %v7587_v22  ;;  %v7666_v21 = vld [vmem:[%s10330_s9 + $0x5e0] ss:$16 sps:$4 sm:$0xff]   ;;  %v7669_v22 = vld [vmem:[%s10330_s9 + $0x5e8] ss:$16 sps:$4 sm:$0xff]   ;;  %s10410_s9 = sld [smem:[#allocation14_spill]] }
  0xd6   : > { %2226 = vmatprep.mubr.bf16.mxu0 %v956_v23  ;;  %2379 = vmatprep.mubr.bf16.mxu1 %v956_v23  ;;  %v933_v23 = vld [vmem:[%s8196_s28 + $0x20] sm:$0xff] }
  0xd8   : > { %2238 = vmatpush1.bf16.msra.mxu0 %v7582_v24  ;;  %2391 = vmatpush1.bf16.msra.mxu1 %v7585_v25  ;;  %v939_v24 = vld [vmem:[%s8196_s28 + $0x50] sm:$0xff]  ;;  %v946_v25 = vld [vmem:[%s8196_s28 + $0x88] sm:$0xff] }
  0xd9   : > { %2239 = vmatprep.subr.bf16.mxu0 %v7590_v27  ;;  %2392 = vmatprep.subr.bf16.mxu1 %v7593_v28  ;;  %v951_v26 = vpack.c.bf16 %v939_v24, %v933_v23  ;;  %v958_v27 = vpack.c.bf16 %v946_v25, %v946_v25  ;;  %v945_v28 = vld [vmem:[%s8196_s28 + $0x80] sm:$0xff]  ;;  %s10293_s28 = smov 96  }
  0xda   : > { %v957_v29 = vpack.c.bf16 %v945_v28, %v945_v28 }
  0xdb   : > { %2227 = vmatmul.mubr.bf16.gmra.mrb[4].mxu0 %v955_v35  ;;  %2380 = vmatmul.mubr.bf16.gmra.mrb[4].mxu1 %v955_v35  ;;  %v6951_v35 = vld [vmem:[%s7969_s21 + $0x4] ss:$8 sm:$0xf] }
  0xdc   : > { %2240 = vmatpush1.bf16.msra.mxu0 %v7588_v30  ;;  %2393 = vmatpush1.bf16.msra.mxu1 %v7591_v31  ;;  %v10263_v30 = vmov 0.0   ;;  %v1153_v31 = vlaneseq }
  0xdd   : > { %2241 = vmatprep.subr.bf16.mxu0 %v7596_v33  ;;  %2394 = vmatprep.subr.bf16.mxu1 %v7599_v34 }
  0xde   : > { %2267 = vmatprep.mubr.bf16.mxu0 %v952_v38  ;;  %2420 = vmatprep.mubr.bf16.mxu1 %v952_v38  ;;  %v1154_v32 = vshrl.u32 %v1153_v31, 7  ;;  %v6952_v38 = vld [vmem:[%s7969_s21 + $0x5] ss:$8 sm:$0xf] }
  0xe0   : > { %2242 = vmatpush1.bf16.msra.mxu0 %v7594_v36  ;;  %2395 = vmatpush1.bf16.msra.mxu1 %v7597_v37  ;;  %v8366_v33 = vsub.s32 0, %v1154_v32  ;;  %v8368_v34 = vsub.s32 2, %v1154_v32  ;;  %v8371_v36 = vsub.s32 1, %v1154_v32 }
  0xe1   : > { %2243 = vmatprep.subr.bf16.mxu0 %v7602_v39  ;;  %2396 = vmatprep.subr.bf16.mxu1 %v7605_v40 }
  0xe2   : > { %10335 = vst [vmem:[#allocation24_spill] sm:$0xff] %v8366_v33  ;;  %10336 = vst [vmem:[#allocation25_spill] sm:$0xff] %v8368_v34  ;;  %v2963_v37 = vrot.slane %v6951_v35, %v8368_v34  ;;  %v2955_v39 = vrot.slane %v6951_v35, %v8366_v33  ;;  %v3089_v40 = vrot.slane %v6952_v38, %v8366_v33 }
  0xe3   : > { %10337 = vst [vmem:[#allocation26_spill] sm:$0xff] %v8371_v36 }
  0xe4   : > { %2244 = vmatpush1.bf16.msra.mxu0 %v7600_v41  ;;  %2397 = vmatpush1.bf16.msra.mxu1 %v7603_v42  ;;  %v2959_v41 = vrot.slane %v6951_v35, %v8371_v36  ;;  %v3097_v42 = vrot.slane %v6952_v38, %v8368_v34 }
  0xe5   : > { %2245 = vmatprep.subr.bf16.mxu0 %v7608_v43  ;;  %2398 = vmatprep.subr.bf16.mxu1 %v7611_v44  ;;  %v3093_v43 = vrot.slane %v6952_v38, %v8371_v36  ;;  %v6954_v44 = vld [vmem:[%s7969_s21 + $0x7] ss:$8 sm:$0xf] }
  0xe6   : > { %2972 = vrot.lane.b32.xlu1 %v2963_v37, %s10299_s1  ;;  %2968 = vrot.lane.b32.xlu0 %v2955_v39, %s10299_s1 }
  0xe8   : > { %2246 = vmatpush1.bf16.msra.mxu0 %v7606_v45  ;;  %2399 = vmatpush1.bf16.msra.mxu1 %v7609_v46  ;;  %v3309_v45 = vrot.slane %v6954_v44, %v8371_v36  ;;  %v3305_v46 = vrot.slane %v6954_v44, %v8366_v33 }
  0xe9   : > { %2247 = vmatprep.subr.bf16.mxu0 %v7614_v47  ;;  %2400 = vmatprep.subr.bf16.mxu1 %v7617_v48  ;;  %v6948_v47 = vld [vmem:[%s7969_s21 + $0x1] ss:$8 sm:$0xf] }
  0xea   : > { %3102 = vrot.lane.b32.xlu1 %v3089_v40, %s10295_s11  ;;  %2970 = vrot.lane.b32.xlu0 %v2959_v41, %s10299_s1  ;;  %v2703_v48 = vrot.slane %v6948_v47, %v8366_v33 }
  0xec   : > { %2248 = vmatpush1.bf16.msra.mxu0 %v7612_v49  ;;  %2401 = vmatpush1.bf16.msra.mxu1 %v7615_v50  ;;  %v3313_v49 = vrot.slane %v6954_v44, %v8368_v34  ;;  %v2711_v50 = vrot.slane %v6948_v47, %v8368_v34 }
  0xed   : > { %2249 = vmatprep.subr.bf16.mxu0 %v7620_v51  ;;  %2402 = vmatprep.subr.bf16.mxu1 %v7623_v52  ;;  %v2707_v51 = vrot.slane %v6948_v47, %v8371_v36  ;;  %v6955_v52 = vld [vmem:[%s7969_s21 + $0x20] ss:$8 sm:$0xf] }
  0xee   : > { %3106 = vrot.lane.b32.xlu1 %v3097_v42, %s10295_s11  ;;  %3104 = vrot.lane.b32.xlu0 %v3093_v43, %s10295_s11 }
  0xf0   : > { %2250 = vmatpush1.bf16.msra.mxu0 %v7618_v53  ;;  %2403 = vmatpush1.bf16.msra.mxu1 %v7621_v54  ;;  %v3443_v53 = vrot.slane %v6955_v52, %v8371_v36  ;;  %v3439_v54 = vrot.slane %v6955_v52, %v8366_v33 }
  0xf1   : > { %2251 = vmatprep.subr.bf16.mxu0 %v7626_v55  ;;  %2404 = vmatprep.subr.bf16.mxu1 %v7629_v56  ;;  %v6949_v55 = vld [vmem:[%s7969_s21 + $0x2] ss:$8 sm:$0xf] }
  0xf2   : > { %3320 = vrot.lane.b32.xlu1 %v3309_v45, %s10299_s1  ;;  %3318 = vrot.lane.b32.xlu0 %v3305_v46, %s10299_s1  ;;  %v2814_v56 = vrot.slane %v6949_v55, %v8366_v33 }
  0xf4   : > { %2252 = vmatpush1.bf16.msra.mxu0 %v7624_v57  ;;  %2405 = vmatpush1.bf16.msra.mxu1 %v7627_v58  ;;  %v3447_v57 = vrot.slane %v6955_v52, %v8368_v34  ;;  %v2822_v58 = vrot.slane %v6949_v55, %v8368_v34 }
  0xf5   : > { %2253 = vmatprep.subr.bf16.mxu0 %v7632_v59  ;;  %2406 = vmatprep.subr.bf16.mxu1 %v7635_v60  ;;  %v2818_v59 = vrot.slane %v6949_v55, %v8371_v36  ;;  %v1167_v60 = vsub.s32 3, %v1154_v32 }
  0xf6   : > { %2716 = vrot.lane.b32.xlu1 %v2703_v48, %s10299_s1  ;;  %3322 = vrot.lane.b32.xlu0 %v3313_v49, %s10299_s1 }
  0xf8   : > { %2254 = vmatpush1.bf16.msra.mxu0 %v7630_v61  ;;  %2407 = vmatpush1.bf16.msra.mxu1 %v7633_v62  ;;  %v2967_v61 = vrot.slane %v6951_v35, %v1167_v60  ;;  %v3101_v62 = vrot.slane %v6952_v38, %v1167_v60 }
  0xf9   : > { %2255 = vmatprep.subr.bf16.mxu0 %v7638_v63  ;;  %2408 = vmatprep.subr.bf16.mxu1 %v7641_v0  ;;  %v3317_v63 = vrot.slane %v6954_v44, %v1167_v60  ;;  %v2715_v0 = vrot.slane %v6948_v47, %v1167_v60 }
  0xfa   : > { %2720 = vrot.lane.b32.xlu1 %v2711_v50, %s10299_s1  ;;  %2718 = vrot.lane.b32.xlu0 %v2707_v51, %s10299_s1 }
  0xfc   : > { %2256 = vmatpush1.bf16.msra.mxu0 %v7636_v1  ;;  %2409 = vmatpush1.bf16.msra.mxu1 %v7639_v2  ;;  %v3451_v1 = vrot.slane %v6955_v52, %v1167_v60  ;;  %v2826_v2 = vrot.slane %v6949_v55, %v1167_v60 }
  0xfd   : > { %2257 = vmatprep.subr.bf16.mxu0 %v7644_v3  ;;  %2410 = vmatprep.subr.bf16.mxu1 %v7647_v4  ;;  %v1151_v3 = vld [vmem:[%s7959_s13] sm:$0xf] }
  0xfe   : > { %3454 = vrot.lane.b32.xlu1 %v3443_v53, %s10295_s11  ;;  %3452 = vrot.lane.b32.xlu0 %v3439_v54, %s10295_s11  ;;  %v1156_v4 = vrot.slane %v1151_v3, %v8366_v33 }
 0x100   : > { %2258 = vmatpush1.bf16.msra.mxu0 %v7642_v5  ;;  %2411 = vmatpush1.bf16.msra.mxu1 %v7645_v6  ;;  %v1164_v5 = vrot.slane %v1151_v3, %v8368_v34  ;;  %v1160_v6 = vrot.slane %v1151_v3, %v8371_v36 }
 0x101   : > { %2259 = vmatprep.subr.bf16.mxu0 %v7650_v7  ;;  %2412 = vmatprep.subr.bf16.mxu1 %v7653_v8  ;;  %v1168_v7 = vrot.slane %v1151_v3, %v1167_v60 }
 0x102   : > { %2827 = vrot.lane.b32.xlu1 %v2814_v56, %s10295_s11  ;;  %3456 = vrot.lane.b32.xlu0 %v3447_v57, %s10295_s11 }
 0x104   : > { %2260 = vmatpush1.bf16.msra.mxu0 %v7648_v9  ;;  %2413 = vmatpush1.bf16.msra.mxu1 %v7651_v10 }
 0x105   : > { %2261 = vmatprep.subr.bf16.mxu0 %v7656_v11  ;;  %2414 = vmatprep.subr.bf16.mxu1 %v7659_v12 }
 0x106   : > { %2831 = vrot.lane.b32.xlu1 %v2822_v58, %s10295_s11  ;;  %2829 = vrot.lane.b32.xlu0 %v2818_v59, %s10295_s11 }
 0x108   : > { %2262 = vmatpush1.bf16.msra.mxu0 %v7654_v13  ;;  %2415 = vmatpush1.bf16.msra.mxu1 %v7657_v14 }
 0x109   : > { %2263 = vmatprep.subr.bf16.mxu0 %v7662_v15  ;;  %2416 = vmatprep.subr.bf16.mxu1 %v7665_v16 }
 0x10a   : > { %2974 = vrot.lane.b32.xlu1 %v2967_v61, %s10299_s1  ;;  %3108 = vrot.lane.b32.xlu0 %v3101_v62, %s10295_s11 }
 0x10c   : > { %2264 = vmatpush1.bf16.msra.mxu0 %v7660_v17  ;;  %2417 = vmatpush1.bf16.msra.mxu1 %v7663_v18 }
 0x10d   : > { %2265 = vmatprep.subr.bf16.mxu0 %v7668_v19  ;;  %2418 = vmatprep.subr.bf16.mxu1 %v7671_v20 }
 0x10e   : > { %3324 = vrot.lane.b32.xlu1 %v3317_v63, %s10299_s1  ;;  %2722 = vrot.lane.b32.xlu0 %v2715_v0, %s10299_s1 }
 0x110   : > { %2266 = vmatpush1.bf16.msra.mxu0 %v7666_v21  ;;  %2419 = vmatpush1.bf16.msra.mxu1 %v7669_v22 }
 0x112   : > { %3458 = vrot.lane.b32.xlu1 %v3451_v1, %s10295_s11  ;;  %2833 = vrot.lane.b32.xlu0 %v2826_v2, %s10295_s11 }
 0x113   : > { %2268 = vmatmul.mubr.bf16.vlgmr.msra.gmra.mrb[0].mxu0 %v951_v26  ;;  %2421 = vmatmul.mubr.bf16.vlgmr.msra.gmra.mrb[0].mxu1 %v951_v26 }
 0x114   : > { %2277 = vmatprep.mubr.bf16.mxu0 %v958_v27  ;;  %2430 = vmatprep.mubr.bf16.mxu1 %v958_v27 }
 0x11b   : > { %2278 = vmatmul.mubr.bf16.gmra.mrb[4].mxu0 %v957_v29  ;;  %2431 = vmatmul.mubr.bf16.gmra.mrb[4].mxu1 %v957_v29 }
 0x11c   : > { %2544 = vmatprep.mubr.f32.mxu0 %v10263_v30  ;;  %2633 = vmatprep.mubr.f32.mxu1 %v10263_v30 }
 0x1e6   : > { %v2269_v8 = vpop.f32.mrb[0].mxu0  ;;  %v2422_v9 = vpop.f32.mrb[0].mxu1 }
 0x1e7   : > { %v7244_v10 = vadd.f32 %v2269_v8, %v1156_v4  ;;  %v7250_v11 = vadd.f32 %v2422_v9, %v1164_v5  ;;  %v2271_v12 = vpop.f32.mrb[1].mxu0  ;;  %v2424_v13 = vpop.f32.mrb[1].mxu1 }
 0x1e8   : > { %v7245_v14 = vadd.f32 %v2271_v12, %v1160_v6  ;;  %v7251_v15 = vadd.f32 %v2424_v13, %v1168_v7  ;;  %v2273_v16 = vpop.f32.mrb[2].mxu0  ;;  %v2426_v17 = vpop.f32.mrb[2].mxu1 }
 0x1e9   : > { %v2439_v18 = vmax.f32 %v7244_v10, 0.0  ;;  %v2441_v19 = vmax.f32 %v7250_v11, 0.0  ;;  %v7246_v20 = vadd.f32 %v2273_v16, %v1156_v4  ;;  %v7252_v21 = vadd.f32 %v2426_v17, %v1164_v5  ;;  %v2275_v22 = vpop.f32.mrb[3].mxu0  ;;  %v2428_v23 = vpop.f32.mrb[3].mxu1 }
 0x1ea   : > { %v2440_v24 = vmax.f32 %v7245_v14, 0.0  ;;  %v2442_v25 = vmax.f32 %v7251_v15, 0.0  ;;  %v7247_v26 = vadd.f32 %v2275_v22, %v1160_v6  ;;  %v7253_v27 = vadd.f32 %v2428_v23, %v1168_v7  ;;  %v8443_v8 = vpop.permute.xlu1 %2972  ;;  %v8445_v9 = vpop.permute.xlu0 %2968 }
 0x1eb   : > { %v2443_v28 = vmax.f32 %v7246_v20, 0.0  ;;  %v2445_v29 = vmax.f32 %v7252_v21, 0.0  ;;  %v2451_v35 = vmin.f32 %v2439_v18, 6.0  ;;  %v2453_v37 = vmin.f32 %v2441_v19, 6.0 }
 0x1ec   : > { %v2444_v31 = vmax.f32 %v7247_v26, 0.0  ;;  %v2446_v32 = vmax.f32 %v7253_v27, 0.0  ;;  %v2452_v40 = vmin.f32 %v2440_v24, 6.0  ;;  %v2454_v41 = vmin.f32 %v2442_v25, 6.0 }
 0x1ed   : > { %v2455_v38 = vmin.f32 %v2443_v28, 6.0  ;;  %v2457_v39 = vmin.f32 %v2445_v29, 6.0 }
 0x1ee   : > { %v2456_v42 = vmin.f32 %v2444_v31, 6.0  ;;  %v2458_v43 = vmin.f32 %v2446_v32, 6.0  ;;  %v2279_v44 = vpop.f32.mrb[4].mxu0  ;;  %v2432_v45 = vpop.f32.mrb[4].mxu1 }
 0x1ef   : > { %v7202_v46 = vpack.c.bf16 %v2455_v38, %v2451_v35  ;;  %v7206_v47 = vpack.c.bf16 %v2457_v39, %v2453_v37  ;;  %v7248_v48 = vadd.f32 %v2279_v44, %v1156_v4  ;;  %v7254_v49 = vadd.f32 %v2432_v45, %v1164_v5  ;;  %v2281_v50 = vpop.f32.mrb[5].mxu0  ;;  %v2434_v51 = vpop.f32.mrb[5].mxu1  ;;  %v2463_v4 = vld [vmem:[%s7964_s17] sm:$0xff]  ;;  %v2464_v5 = vld [vmem:[%s7964_s17 + $0x8] sm:$0xff] }
 0x1f0   : > { %v7200_v52 = vpack.c.bf16 %v2456_v42, %v2452_v40  ;;  %v7204_v53 = vpack.c.bf16 %v2458_v43, %v2454_v41  ;;  %v7249_v54 = vadd.f32 %v2281_v50, %v1160_v6  ;;  %v7255_v55 = vadd.f32 %v2434_v51, %v1168_v7  ;;  %v2283_v56 = vpop.f32.mrb[6].mxu0  ;;  %v2436_v57 = vpop.f32.mrb[6].mxu1  ;;  %v2465_v6 = vld [vmem:[%s7964_s17 + $0x10] sm:$0xff]  ;;  %v2466_v7 = vld [vmem:[%s7964_s17 + $0x18] sm:$0x3] }
 0x1f1   : > { %v2447_v58 = vmax.f32 %v7248_v48, 0.0  ;;  %v2449_v59 = vmax.f32 %v7254_v49, 0.0  ;;  %v2284_v60 = vpop.f32.mrb[7].mxu0  ;;  %v2437_v61 = vpop.f32.mrb[7].mxu1 }
 0x1f2   : > { %v2448_v62 = vmax.f32 %v7249_v54, 0.0  ;;  %v2450_v63 = vmax.f32 %v7255_v55, 0.0  ;;  %7201 = vmatprep.subr.bf16.mxu0 %v7200_v52  ;;  %7205 = vmatprep.subr.bf16.mxu1 %v7204_v53  ;;  %v8447_v10 = vpop.permute.xlu1 %3102  ;;  %v2971_v11 = vpop.permute.xlu0 %2970 }
 0x1f3   : > { %7203 = vmatpush1.bf16.msra.mxu0 %v7202_v46  ;;  %7207 = vmatpush1.bf16.msra.mxu1 %v7206_v47  ;;  %v2459_v2 = vmin.f32 %v2447_v58, 6.0  ;;  %v2461_v3 = vmin.f32 %v2449_v59, 6.0  ;;  %v8467_v24 = vsel %vm2724_vm1, %v2971_v11, %v8443_v8  ;;  %v8506_v44 = vsel %vm2724_vm1, %v8445_v9, %v2971_v11 }
 0x1f4   : > { %v2460_v0 = vmin.f32 %v2448_v62, 6.0  ;;  %v2462_v1 = vmin.f32 %v2450_v63, 6.0 }
 0x1f6   : > { %2484 = vmatprep.subr.mxu0 %v2460_v0  ;;  %2573 = vmatprep.subr.mxu1 %v2462_v1  ;;  %v8449_v12 = vpop.permute.xlu1 %3106  ;;  %v3105_v13 = vpop.permute.xlu0 %3104 }
 0x1f7   : > { %2485 = vmatpush1.msra.mxu0 %v2459_v2  ;;  %2574 = vmatpush1.msra.mxu1 %v2461_v3  ;;  %v8497_v40 = vsel %vm2835_vm2, %v3105_v13, %v8449_v12  ;;  %v8510_v45 = vsel %vm2835_vm2, %v8447_v10, %v3105_v13 }
 0x1f8   : > { %6940 = vmatmul.mubr.msk.f32.vlgmr.msra.gmra.mrb[8].mxu0 %vm2467_vm0, %v2463_v4  ;;  %6944 = vmatmul.mubr.msk.f32.vlgmr.msra.gmra.mrb[8].mxu1 %vm2467_vm0, %v2463_v4 }
 0x1f9   : > { %2550 = vmatprep.mubr.f32.mxu0 %v10263_v30  ;;  %2639 = vmatprep.mubr.f32.mxu1 %v10263_v30 }
 0x1fa   : > { %v3321_v14 = vpop.permute.xlu1 %3320  ;;  %v8451_v15 = vpop.permute.xlu0 %3318 }
 0x1fb   : > { %v8549_v57 = vsel %vm2724_vm1, %v8451_v15, %v3321_v14 }
 0x1fc   : > { %6941 = vmatmul.mubr.msk.f32.gmra.mrb[10].mxu0 %vm2467_vm0, %v2464_v5  ;;  %6945 = vmatmul.mubr.msk.f32.gmra.mrb[10].mxu1 %vm2467_vm0, %v2464_v5 }
 0x1fd   : > { %2556 = vmatprep.mubr.f32.mxu0 %v10263_v30  ;;  %2645 = vmatprep.mubr.f32.mxu1 %v10263_v30 }
 0x1fe   : > { %v8453_v16 = vpop.permute.xlu1 %2716  ;;  %v8455_v17 = vpop.permute.xlu0 %3322 }
 0x1ff   : > { %v8514_v46 = vsel %vm2724_vm1, %v3321_v14, %v8455_v17 }
 0x200   : > { %6942 = vmatmul.mubr.msk.f32.gmra.mrb[12].mxu0 %vm2467_vm0, %v2465_v6  ;;  %6946 = vmatmul.mubr.msk.f32.gmra.mrb[12].mxu1 %vm2467_vm0, %v2465_v6 }
 0x201   : > { %2562 = vmatprep.mubr.f32.mxu0 %v10263_v30  ;;  %2651 = vmatprep.mubr.f32.mxu1 %v10263_v30 }
 0x202   : > { %v8457_v18 = vpop.permute.xlu1 %2720  ;;  %v2719_v19 = vpop.permute.xlu0 %2718 }
 0x203   : > { %v8518_v47 = vsel %vm2724_vm1, %v8453_v16, %v2719_v19  ;;  %v8526_v50 = vsel %vm2724_vm1, %v2719_v19, %v8457_v18 }
 0x204   : > { %6943 = vmatmul.mubr.msk.f32.gmra.mrb[14].mxu0 %vm2467_vm0, %v2466_v7  ;;  %6947 = vmatmul.mubr.msk.f32.gmra.mrb[14].mxu1 %vm2467_vm0, %v2466_v7 }
 0x205   : > { %4163 = vmatprep.mubr.f32.mxu1 %v10263_v30 }
 0x206   : > { %v3455_v20 = vpop.permute.xlu1 %3454  ;;  %v8459_v21 = vpop.permute.xlu0 %3452 }
 0x207   : > { %v8566_v62 = vsel %vm2835_vm2, %v8459_v21, %v3455_v20 }
 0x20a   : > { %v8461_v22 = vpop.permute.xlu1 %2827  ;;  %v8463_v23 = vpop.permute.xlu0 %3456 }
 0x20b   : > { %10338 = vst [vmem:[#allocation27_spill] sm:$0xff] %v8463_v23  ;;  %v8530_v51 = vsel %vm2835_vm2, %v3455_v20, %v8463_v23 }
 0x20e   : > { %v8499_v41 = vpop.permute.xlu1 %2831  ;;  %v2830_v42 = vpop.permute.xlu0 %2829 }
 0x20f   : > { %v8534_v52 = vsel %vm2835_vm2, %v8461_v22, %v2830_v42  ;;  %v8545_v56 = vsel %vm2835_vm2, %v2830_v42, %v8499_v41 }
 0x2cb   : > { %v8469_v25 = vpop.f32.mrb[8].mxu0  ;;  %v8471_v26 = vpop.f32.mrb[8].mxu1 }
 0x2cc   : > { %2659 = vrot.lane.b32.xlu0 %v8469_v25, %s10295_s11  ;;  %v8475_v27 = vpop.f32.mrb[9].mxu0  ;;  %v2985_v28 = vmul.f32 %v8467_v24, %v8471_v26  ;;  %v8479_v29 = vpop.f32.mrb[9].mxu1  ;;  %v2983_v31 = vmul.f32 %v8445_v9, %v8469_v25  ;;  %v3117_v39 = vmul.f32 %v8447_v10, %v8469_v25  ;;  %v3119_v43 = vmul.f32 %v8497_v40, %v8471_v26 }
 0x2cd   : > { %v2732_v55 = vmul.f32 %v8453_v16, %v8469_v25  ;;  %v3335_v60 = vmul.f32 %v8514_v46, %v8471_v26  ;;  %v3467_v61 = vmul.f32 %v8459_v21, %v8469_v25 }
 0x2ce   : > { %3019 = vrot.lane.b32.xlu1 %v2985_v28, %s10297_s23  ;;  %v2734_v28 = vmul.f32 %v8526_v50, %v8471_v26 }
 0x2cf   : > { %v8484_v32 = vpop.f32.mrb[10].mxu0  ;;  %v8486_v35 = vpop.f32.mrb[10].mxu1 }
 0x2d0   : > { %3015 = vrot.lane.b32.xlu0 %v2983_v31, %s10297_s23  ;;  %v8489_v37 = vpop.f32.mrb[11].mxu0  ;;  %v8491_v38 = vpop.f32.mrb[11].mxu1 }
 0x2d1   : > { %10339 = vst [vmem:[#allocation28_spill] sm:$0xff] %v8491_v38 }
 0x2d2   : > { %3149 = vrot.lane.b32.xlu1 %v3117_v39, %s10293_s28 }
 0x2d3   : > { %v8520_v48 = vpop.f32.mrb[12].mxu0  ;;  %v8522_v49 = vpop.f32.mrb[12].mxu1 }
 0x2d4   : > { %3153 = vrot.lane.b32.xlu0 %v3119_v43, %s10293_s28  ;;  %v8537_v53 = vpop.f32.mrb[13].mxu0  ;;  %v8539_v54 = vpop.f32.mrb[13].mxu1  ;;  %v8553_v58 = vmul.f32 %v8467_v24, %v8522_v49  ;;  %v8557_v59 = vmul.f32 %v8497_v40, %v8522_v49  ;;  %v8570_v63 = vmul.f32 %v8514_v46, %v8522_v49  ;;  %v8578_v2 = vmul.f32 %v8545_v56, %v8522_v49 }
 0x2d5   : > { %10340 = vst [vmem:[#allocation29_spill] sm:$0xff] %v8537_v53  ;;  %10341 = vst [vmem:[#allocation30_spill] sm:$0xff] %v8539_v54  ;;  %v8582_v3 = vmul.f32 %v8530_v51, %v8522_v49  ;;  %v8586_v4 = vmul.f32 %v8510_v45, %v8537_v53  ;;  %v8590_v5 = vmul.f32 %v8526_v50, %v8522_v49 }
 0x2d6   : > { %2756 = vrot.lane.b32.xlu1 %v2732_v55, %s10297_s23  ;;  %v8597_v7 = vmul.f32 %v8549_v57, %v8537_v53  ;;  %v8601_v11 = vmul.f32 %v8506_v44, %v8537_v53  ;;  %v8605_v13 = vmul.f32 %v8566_v62, %v8537_v53  ;;  %v8609_v14 = vmul.f32 %v8534_v52, %v8537_v53  ;;  %v8639_v55 = vld [vmem:[%s7969_s21 + $0x6] ss:$8 sm:$0xf] }
 0x2d7   : > { %v8572_v0 = vpop.f32.mrb[14].mxu0  ;;  %v8574_v1 = vpop.f32.mrb[14].mxu1  ;;  %v8613_v19 = vmul.f32 %v8518_v47, %v8537_v53  ;;  %10343 = vst [vmem:[#allocation32_spill] sm:$0xff] %v8639_v55  ;;  %v8652_v53 = vld [vmem:[%s7969_s21] ss:$8 sm:$0xf]  ;;  %v8671_v38 = vrot.slane %v8639_v55, %v8368_v34 }
 0x2d8   : > { %3369 = vrot.lane.b32.xlu0 %v3335_v60, %s10297_s23  ;;  %v8593_v6 = vpop.f32.mrb[15].mxu0  ;;  %v8617_v20 = vmul.f32 %v8497_v40, %v8574_v1  ;;  %v8624_v31 = vmul.f32 %v8514_v46, %v8574_v1  ;;  %v8628_v39 = vmul.f32 %v8467_v24, %v8574_v1  ;;  %v8632_v42 = vmul.f32 %v8530_v51, %v8574_v1  ;;  %v8642_v60 = vld [vmem:[%s7969_s21 + $0x3] ss:$8 sm:$0xf] }
 0x2d9   : > { %10342 = vst [vmem:[#allocation31_spill] sm:$0xff] %v8593_v6  ;;  %v8636_v43 = vmul.f32 %v8506_v44, %v8593_v6  ;;  %10344 = vst [vmem:[#allocation33_spill] sm:$0xff] %v8642_v60  ;;  %v8649_v30 = vmul.f32 %v8510_v45, %v8593_v6  ;;  %v8656_v54 = vmul.f32 %v8566_v62, %v8593_v6 }
 0x2da   : > { %3499 = vrot.lane.b32.xlu1 %v3467_v61, %s10293_s28  ;;  %v3118_v61 = vmul.f32 %v8510_v45, %v8475_v27  ;;  %10345 = vst [vmem:[#allocation34_spill] sm:$0xff] %v8652_v53  ;;  %v8660_v36 = vmul.f32 %v8549_v57, %v8593_v6  ;;  %v8667_v33 = vrot.slane %v8642_v60, %v8368_v34 }
 0x2db   : > { %v2684_v23 = vrot.slane %v8652_v53, %v8368_v34  ;;  %v3334_v6 = vmul.f32 %v8549_v57, %v8475_v27  ;;  %v8687_v55 = vmul.f32 %v8671_v38, %v8471_v26 }
 0x2dc   : > { %2760 = vrot.lane.b32.xlu0 %v2734_v28, %s10297_s23  ;;  %v3333_v28 = vmul.f32 %v8451_v15, %v8469_v25  ;;  %v8683_v60 = vmul.f32 %v8667_v33, %v8471_v26 }
 0x2dd   : > { %10347 = vst [vmem:[#allocation36_spill] sm:$0xff] %v8687_v55  ;;  %v8690_v34 = vmul.f32 %v2684_v23, %v8471_v26  ;;  %v8701_v53 = vmul.f32 %v2684_v23, %v8486_v35  ;;  %v8708_v55 = vmul.f32 %v8667_v33, %v8522_v49 }
 0x2de   : > { %3151 = vrot.lane.b32.xlu1 %v3118_v61, %s10293_s28  ;;  %v3469_v61 = vmul.f32 %v8530_v51, %v8471_v26  ;;  %10346 = vst [vmem:[#allocation35_spill] sm:$0xff] %v8683_v60  ;;  %v2733_v60 = vmul.f32 %v8518_v47, %v8475_v27 }
 0x2df   : > { %10348 = vst [vmem:[#allocation37_spill] sm:$0xff] %v8690_v34  ;;  %10351 = vst [vmem:[#allocation40_spill] sm:$0xff] %v8701_v53  ;;  %v8712_v34 = vmul.f32 %v8671_v38, %v8522_v49  ;;  %v2845_v53 = vmul.f32 %v8545_v56, %v8471_v26  ;;  %v2984_v26 = vmul.f32 %v8506_v44, %v8475_v27 }
 0x2e0   : > { %3365 = vrot.lane.b32.xlu0 %v3333_v28, %s10297_s23  ;;  %v8694_v28 = vmul.f32 %v8667_v33, %v8486_v35  ;;  %10352 = vst [vmem:[#allocation41_spill] sm:$0xff] %v8708_v55  ;;  %v2843_v55 = vmul.f32 %v8461_v22, %v8469_v25 }
 0x2e1   : > { %10353 = vst [vmem:[#allocation42_spill] sm:$0xff] %v8712_v34 }
 0x2e2   : > { %3367 = vrot.lane.b32.xlu1 %v3334_v6, %s10297_s23  ;;  %10349 = vst [vmem:[#allocation38_spill] sm:$0xff] %v8694_v28  ;;  %v8698_v6 = vmul.f32 %v8671_v38, %v8486_v35  ;;  %v8715_v28 = vmul.f32 %v2684_v23, %v8522_v49  ;;  %v2844_v23 = vmul.f32 %v8534_v52, %v8475_v27 }
 0x2e3   : > { %v3123_v49 = vmul.f32 %v8497_v40, %v8486_v35  ;;  %v2738_v40 = vmul.f32 %v8526_v50, %v8486_v35  ;;  %v7677_v50 = vld [vmem:[%s7979_s29 + $0x14] ss:$8 sps:$4 sm:$0xff]  }
 0x2e4   : > { %10350 = vst [vmem:[#allocation39_spill] sm:$0xff] %v8698_v6  ;;  %3503 = vrot.lane.b32.xlu0 %v3469_v61, %s10293_s28  ;;  %10354 = vst [vmem:[#allocation43_spill] sm:$0xff] %v8715_v28  ;;  %v3468_v61 = vmul.f32 %v8566_v62, %v8475_v27 }
 0x2e6   : > { %2758 = vrot.lane.b32.xlu1 %v2733_v60, %s10297_s23  ;;  %v2987_v60 = vmul.f32 %v8445_v9, %v8484_v32 }
 0x2e8   : > { %2871 = vrot.lane.b32.xlu0 %v2845_v53, %s10293_s28  ;;  %v2989_v53 = vmul.f32 %v8467_v24, %v8486_v35  ;;  %v7672_v24 = vld [vmem:[%s7979_s29] ss:$8 sps:$4 sm:$0xff]  }
 0x2ea   : > { %3501 = vrot.lane.b32.xlu1 %v3468_v61, %s10293_s28  ;;  %v8749_v61 = vpop.f32.mrb[15].mxu1 }
 0x2ec   : > { %2867 = vrot.lane.b32.xlu0 %v2843_v55, %s10293_s28  ;;  %v3339_v55 = vmul.f32 %v8514_v46, %v8486_v35  ;;  %v3337_v46 = vmul.f32 %v8451_v15, %v8484_v32 }
 0x2ee   : > { %2869 = vrot.lane.b32.xlu1 %v2844_v23, %s10293_s28  ;;  %v7674_v23 = vld [vmem:[%s7979_s29 + $0x4] ss:$8 sps:$4 sm:$0xff]  }
 0x2ef   : > { %3969 = vmatprep.subr.bf16.mxu0 %v7674_v23  ;;  %v3473_v23 = vmul.f32 %v8530_v51, %v8486_v35  ;;  %v3471_v51 = vmul.f32 %v8459_v21, %v8484_v32 }
 0x2f0   : > { %3017 = vrot.lane.b32.xlu0 %v2984_v26, %s10297_s23  ;;  %3970 = vmatpush1.bf16.msra.mxu0 %v7672_v24  ;;  %v3121_v26 = vmul.f32 %v8447_v10, %v8484_v32  ;;  %v3122_v24 = vmul.f32 %v8510_v45, %v8489_v37  ;;  %v2737_v45 = vmul.f32 %v8518_v47, %v8489_v37 }
 0x2f1   : > { %3971 = vmatprep.subr.bf16.mxu0 %v7677_v50  ;;  %v7683_v50 = vld [vmem:[%s7979_s29 + $0x34] ss:$8 sps:$4 sm:$0xff]   ;;  %v8798_v47 = vmul.f32 %v8671_v38, %v8574_v1 }
 0x2f2   : > { %2661 = vrot.lane.b32.xlu1 %v8484_v32, %s10295_s11  ;;  %v7689_v38 = vld [vmem:[%s7979_s29 + $0x54] ss:$8 sps:$4 sm:$0xff]  }
 0x2f3   : > { %10356 = vst [vmem:[#allocation45_spill] sm:$0xff] %v8798_v47 }
 0x2f4   : > { %3161 = vrot.lane.b32.xlu0 %v3123_v49, %s10293_s28  ;;  %v7675_v49 = vld [vmem:[%s7979_s29 + $0x10] ss:$8 sps:$4 sm:$0xff]  }
 0x2f5   : > { %3972 = vmatpush1.bf16.msra.mxu0 %v7675_v49  ;;  %v7681_v49 = vld [vmem:[%s7979_s29 + $0x30] ss:$8 sps:$4 sm:$0xff]  }
 0x2f6   : > { %3027 = vrot.lane.b32.xlu1 %v2989_v53, %s10297_s23  ;;  %v2847_v53 = vmul.f32 %v8461_v22, %v8484_v32 }
 0x2f8   : > { %3377 = vrot.lane.b32.xlu0 %v3339_v55, %s10297_s23  ;;  %v2736_v55 = vmul.f32 %v8453_v16, %v8484_v32 }
 0x2fa   : > { %3023 = vrot.lane.b32.xlu1 %v2987_v60, %s10297_s23  ;;  %v7678_v60 = vld [vmem:[%s7979_s29 + $0x20] ss:$8 sps:$4 sm:$0xff]  }
 0x2fc   : > { %2768 = vrot.lane.b32.xlu0 %v2738_v40, %s10297_s23  ;;  %v7680_v40 = vld [vmem:[%s7979_s29 + $0x24] ss:$8 sps:$4 sm:$0xff]  }
 0x2fd   : > { %3973 = vmatprep.subr.bf16.mxu0 %v7680_v40  ;;  %v7695_v40 = vld [vmem:[%s7979_s29 + $0x74] ss:$8 sps:$4 sm:$0xff]  }
 0x2fe   : > { %3373 = vrot.lane.b32.xlu1 %v3337_v46, %s10297_s23  ;;  %3974 = vmatpush1.bf16.msra.mxu0 %v7678_v60  ;;  %v3338_v46 = vmul.f32 %v8549_v57, %v8489_v37  ;;  %v3472_v57 = vmul.f32 %v8566_v62, %v8489_v37  ;;  %v2848_v62 = vmul.f32 %v8534_v52, %v8489_v37  ;;  %v7690_v60 = vld [vmem:[%s7979_s29 + $0x60] ss:$8 sps:$4 sm:$0xff]  }
 0x2ff   : > { %3975 = vmatprep.subr.bf16.mxu0 %v7683_v50  ;;  %v2991_v52 = vmul.f32 %v8445_v9, %v8520_v48  ;;  %v7710_v50 = vld [vmem:[%s7979_s29 + $0xc4] ss:$8 sps:$4 sm:$0xff]  }
 0x300   : > { %3157 = vrot.lane.b32.xlu0 %v3121_v26, %s10293_s28  ;;  %v2849_v26 = vmul.f32 %v8545_v56, %v8486_v35  ;;  %v8794_v35 = vmul.f32 %v8667_v33, %v8574_v1  ;;  %v2988_v56 = vmul.f32 %v8506_v44, %v8489_v37  ;;  %v7684_v33 = vld [vmem:[%s7979_s29 + $0x40] ss:$8 sps:$4 sm:$0xff]   ;;  %v7687_v44 = vld [vmem:[%s7979_s29 + $0x50] ss:$8 sps:$4 sm:$0xff]   ;;  %v7692_v1 = vld [vmem:[%s7979_s29 + $0x64] ss:$8 sps:$4 sm:$0xff]  }
 0x302   : > { %2875 = vrot.lane.b32.xlu1 %v2847_v53, %s10293_s28  ;;  %10355 = vst [vmem:[#allocation44_spill] sm:$0xff] %v8794_v35  ;;  %v7686_v53 = vld [vmem:[%s7979_s29 + $0x44] ss:$8 sps:$4 sm:$0xff]   ;;  %3976 = vmatpush1.bf16.msra.mxu0 %v7681_v49  ;;  %v7705_v49 = vld [vmem:[%s7979_s29 + $0xb0] ss:$8 sps:$4 sm:$0xff]  }
 0x303   : > { %3977 = vmatprep.subr.bf16.mxu0 %v7686_v53 }
 0x304   : > { %2764 = vrot.lane.b32.xlu0 %v2736_v55, %s10297_s23  ;;  %v3125_v55 = vmul.f32 %v8447_v10, %v8520_v48 }
 0x306   : > { %3159 = vrot.lane.b32.xlu1 %v3122_v24, %s10293_s28  ;;  %3978 = vmatpush1.bf16.msra.mxu0 %v7684_v33  ;;  %v7693_v24 = vld [vmem:[%s7979_s29 + $0x70] ss:$8 sps:$4 sm:$0xff]  }
 0x307   : > { %3979 = vmatprep.subr.bf16.mxu0 %v7689_v38  ;;  %v7714_v38 = vld [vmem:[%s7979_s29 + $0xe0] ss:$8 sps:$4 sm:$0xff]  }
 0x308   : > { %3511 = vrot.lane.b32.xlu0 %v3473_v23, %s10293_s28  ;;  %v7698_v23 = vld [vmem:[%s7979_s29 + $0x84] ss:$8 sps:$4 sm:$0xff]  }
 0x30a   : > { %3375 = vrot.lane.b32.xlu1 %v3338_v46, %s10297_s23  ;;  %3980 = vmatpush1.bf16.msra.mxu0 %v7687_v44  ;;  %v2740_v46 = vmul.f32 %v8453_v16, %v8520_v48  ;;  %v7702_v16 = vld [vmem:[%s7979_s29 + $0xa0] ss:$8 sps:$4 sm:$0xff]   ;;  %v7719_v44 = vld [vmem:[%s7979_s29 + $0xf4] ss:$8 sps:$4 sm:$0xff]  }
 0x30b   : > { %3981 = vmatprep.subr.bf16.mxu0 %v7692_v1 }
 0x30c   : > { %2879 = vrot.lane.b32.xlu0 %v2849_v26, %s10293_s28  ;;  %v7701_v26 = vld [vmem:[%s7979_s29 + $0x94] ss:$8 sps:$4 sm:$0xff]  }
 0x30e   : > { %2766 = vrot.lane.b32.xlu1 %v2737_v45, %s10297_s23  ;;  %3982 = vmatpush1.bf16.msra.mxu0 %v7690_v60  ;;  %v3341_v45 = vmul.f32 %v8451_v15, %v8520_v48 }
 0x30f   : > { %3983 = vmatprep.subr.bf16.mxu0 %v7695_v40  ;;  %v3129_v40 = vmul.f32 %v8447_v10, %v8572_v0 }
 0x310   : > { %3507 = vrot.lane.b32.xlu0 %v3471_v51, %s10293_s28  ;;  %v7699_v51 = vld [vmem:[%s7979_s29 + $0x90] ss:$8 sps:$4 sm:$0xff]  }
 0x312   : > { %3509 = vrot.lane.b32.xlu1 %v3472_v57, %s10293_s28  ;;  %3984 = vmatpush1.bf16.msra.mxu0 %v7693_v24  ;;  %v7707_v57 = vld [vmem:[%s7979_s29 + $0xb4] ss:$8 sps:$4 sm:$0xff]  }
 0x313   : > { %3985 = vmatprep.subr.bf16.mxu0 %v7698_v23 }
 0x314   : > { %3025 = vrot.lane.b32.xlu0 %v2988_v56, %s10297_s23 }
 0x316   : > { %2877 = vrot.lane.b32.xlu1 %v2848_v62, %s10293_s28  ;;  %v7716_v62 = vld [vmem:[%s7979_s29 + $0xe4] ss:$8 sps:$4 sm:$0xff]  }
 0x318   : > { %2663 = vrot.lane.b32.xlu0 %v8520_v48, %s10295_s11 }
 0x31a   : > { %3035 = vrot.lane.b32.xlu1 %v8553_v58, %s10297_s23  ;;  %v3475_v58 = vmul.f32 %v8459_v21, %v8520_v48 }
 0x31c   : > { %3031 = vrot.lane.b32.xlu0 %v2991_v52, %s10297_s23  ;;  %v7717_v52 = vld [vmem:[%s7979_s29 + $0xf0] ss:$8 sps:$4 sm:$0xff]  }
 0x31e   : > { %3165 = vrot.lane.b32.xlu1 %v3125_v55, %s10293_s28 }
 0x320   : > { %3169 = vrot.lane.b32.xlu0 %v8557_v59, %s10293_s28  ;;  %v7696_v59 = vld [vmem:[%s7979_s29 + $0x80] ss:$8 sps:$4 sm:$0xff]  }
 0x321   : > { %3986 = vmatpush1.bf16.msra.mxu0 %v7696_v59 }
 0x322   : > { %3515 = vrot.lane.b32.xlu1 %v3475_v58, %s10293_s28  ;;  %3987 = vmatprep.subr.bf16.mxu0 %v7701_v26 }
 0x324   : > { %3385 = vrot.lane.b32.xlu0 %v8570_v63, %s10297_s23  ;;  %v7704_v63 = vld [vmem:[%s7979_s29 + $0xa4] ss:$8 sps:$4 sm:$0xff]  }
 0x325   : > { %3988 = vmatpush1.bf16.msra.mxu0 %v7699_v51 }
 0x326   : > { %2772 = vrot.lane.b32.xlu1 %v2740_v46, %s10297_s23  ;;  %3989 = vmatprep.subr.bf16.mxu0 %v7704_v63 }
 0x328   : > { %3381 = vrot.lane.b32.xlu0 %v3341_v45, %s10297_s23 }
 0x329   : > { %3990 = vmatpush1.bf16.msra.mxu0 %v7702_v16  ;;  %v10361_v16 = vld [vmem:[#allocation27_spill] sm:$0xff] }
 0x32a   : > { %2887 = vrot.lane.b32.xlu1 %v8578_v2, %s10293_s28  ;;  %3991 = vmatprep.subr.bf16.mxu0 %v7707_v57  ;;  %v8854_v2 = vpop.permute.xlu0 %3108 }
 0x32c   : > { %3519 = vrot.lane.b32.xlu0 %v8582_v3, %s10293_s28  ;;  %v2975_v3 = vpop.permute.xlu1 %2974 }
 0x32d   : > { %3992 = vmatpush1.bf16.msra.mxu0 %v7705_v49 }
 0x32e   : > { %3167 = vrot.lane.b32.xlu1 %v8586_v4, %s10293_s28  ;;  %v8860_v4 = vpop.permute.xlu0 %2722  ;;  %3993 = vmatprep.subr.bf16.mxu0 %v7710_v50 }
 0x330   : > { %2776 = vrot.lane.b32.xlu0 %v8590_v5, %s10297_s23  ;;  %v7708_v5 = vld [vmem:[%s7979_s29 + $0xc0] ss:$8 sps:$4 sm:$0xff]   ;;  %v3325_v56 = vpop.permute.xlu1 %3324 }
 0x331   : > { %3994 = vmatpush1.bf16.msra.mxu0 %v7708_v5 }
 0x332   : > { %3383 = vrot.lane.b32.xlu1 %v8597_v7, %s10297_s23  ;;  %v7713_v7 = vld [vmem:[%s7979_s29 + $0xd4] ss:$8 sps:$4 sm:$0xff]   ;;  %v8869_v53 = vpop.permute.xlu0 %2833 }
 0x333   : > { %3995 = vmatprep.subr.bf16.mxu0 %v7713_v7 }
 0x334   : > { %3033 = vrot.lane.b32.xlu0 %v8601_v11, %s10297_s23  ;;  %v2995_v11 = vmul.f32 %v8445_v9, %v8572_v0  ;;  %v3459_v33 = vpop.permute.xlu1 %3458  ;;  %v2851_v9 = vmul.f32 %v8461_v22, %v8520_v48  ;;  %v3345_v22 = vmul.f32 %v8451_v15, %v8572_v0 }
 0x336   : > { %3517 = vrot.lane.b32.xlu1 %v8605_v13, %s10293_s28  ;;  %v7711_v13 = vld [vmem:[%s7979_s29 + $0xd0] ss:$8 sps:$4 sm:$0xff]  }
 0x337   : > { %3996 = vmatpush1.bf16.msra.mxu0 %v7711_v13 }
 0x338   : > { %2885 = vrot.lane.b32.xlu0 %v8609_v14, %s10293_s28  ;;  %3997 = vmatprep.subr.bf16.mxu0 %v7716_v62 }
 0x33a   : > { %2774 = vrot.lane.b32.xlu1 %v8613_v19, %s10297_s23 }
 0x33b   : > { %3998 = vmatpush1.bf16.msra.mxu0 %v7714_v38 }
 0x33c   : > { %3039 = vrot.lane.b32.xlu0 %v2995_v11, %s10297_s23  ;;  %3999 = vmatprep.subr.bf16.mxu0 %v7719_v44  ;;  %v7722_v44 = vld [vmem:[%s7979_s29 + $0x104] ss:$8 sps:$4 sm:$0xff]  }
 0x33e   : > { %v2660_v14 = vpop.permute.xlu0 %2659  ;;  %2665 = vrot.lane.b32.xlu1 %v8572_v0, %s10295_s11  ;;  %s7936_s11 = smov 120  }
 0x33f   : > { %4000 = vmatpush1.bf16.msra.mxu0 %v7717_v52 }
 0x340   : > { %v8882_v19 = vpop.permute.xlu1 %3019  ;;  %3177 = vrot.lane.b32.xlu0 %v8617_v20, %s10293_s28  ;;  %4020 = vmatprep.subr.bf16.mxu0 %v7722_v44 }
 0x341   : > { %10357 = vst [vmem:[#allocation46_spill] sm:$0xff] %v8882_v19 }
 0x342   : > { %v8888_v1 = vpop.permute.xlu0 %3015  ;;  %2883 = vrot.lane.b32.xlu1 %v2851_v9, %s10293_s28 }
 0x344   : > { %v8892_v55 = vpop.permute.xlu1 %3149  ;;  %3393 = vrot.lane.b32.xlu0 %v8624_v31, %s10297_s23  ;;  %v3479_v31 = vmul.f32 %v8459_v21, %v8572_v0  ;;  %v2667_v21 = vsel %vm2658_vm3, %v2660_v14, %v8479_v29 }
 0x346   : > { %v8896_v60 = vpop.permute.xlu0 %3153  ;;  %3043 = vrot.lane.b32.xlu1 %v8628_v39, %s10297_s23 }
 0x348   : > { %v8902_v20 = vpop.permute.xlu1 %2756  ;;  %3389 = vrot.lane.b32.xlu0 %v3345_v22, %s10297_s23 }
 0x34a   : > { %v8907_v58 = vpop.permute.xlu0 %3369  ;;  %3173 = vrot.lane.b32.xlu1 %v3129_v40, %s10293_s28 }
 0x34b   : > { %10358 = vst [vmem:[#allocation47_spill] sm:$0xff] %v8907_v58 }
 0x34c   : > { %v8912_v24 = vpop.permute.xlu1 %3499  ;;  %3523 = vrot.lane.b32.xlu0 %v3479_v31, %s10293_s28 }
 0x34e   : > { %v8915_v15 = vpop.permute.xlu0 %2760  ;;  %3527 = vrot.lane.b32.xlu1 %v8632_v42, %s10293_s28  ;;  %v8935_v42 = vsel %vm2724_vm1, %v8443_v8, %v2975_v3  ;;  %v8953_v8 = vsel %vm2724_vm1, %v8455_v17, %v3325_v56  ;;  %v8969_v17 = vsel %vm2835_vm2, %v8499_v41, %v8869_v53  ;;  %v10362_v3 = vld [vmem:[#allocation28_spill] sm:$0xff] }
 0x34f   : > { %v2846_v63 = vmul.f32 %v8969_v17, %v2667_v21 }
 0x350   : > { %v8919_v39 = vpop.permute.xlu1 %3151  ;;  %3041 = vrot.lane.b32.xlu0 %v8636_v43, %s10297_s23  ;;  %v2986_v43 = vmul.f32 %v8935_v42, %v2667_v21 }
 0x352   : > { %v8923_v10 = vpop.permute.xlu0 %3365  ;;  %3175 = vrot.lane.b32.xlu1 %v8649_v30, %s10293_s28  ;;  %v8945_v30 = vsel %vm2835_vm2, %v8449_v12, %v8854_v2  ;;  %v8962_v12 = vsel %vm2724_vm1, %v8457_v18, %v8860_v4  ;;  %v8977_v18 = vsel %vm2835_vm2, %v10361_v16, %v3459_v33 }
 0x353   : > { %v2735_v45 = vmul.f32 %v8962_v12, %v2667_v21  ;;  %v3470_v49 = vmul.f32 %v8977_v18, %v2667_v21 }
 0x354   : > { %v8929_v23 = vpop.permute.xlu1 %3367  ;;  %3525 = vrot.lane.b32.xlu0 %v8656_v54, %s10293_s28  ;;  %v3120_v54 = vmul.f32 %v8945_v30, %v2667_v21 }
 0x356   : > { %v8937_v46 = vpop.permute.xlu0 %3503  ;;  %3391 = vrot.lane.b32.xlu1 %v8660_v36, %s10297_s23  ;;  %v3336_v36 = vmul.f32 %v8953_v8, %v2667_v21  ;;  %v10365_v21 = vld [vmem:[#allocation24_spill] sm:$0xff] }
 0x357   : > { %10359 = vst [vmem:[#allocation48_spill] sm:$0xff] %v8937_v46 }
 0x358   : > { %v8947_v29 = vpop.permute.xlu1 %2758  ;;  %3021 = vrot.lane.b32.xlu0 %v2986_v43, %s10297_s23  ;;  %v10366_v43 = vld [vmem:[#allocation32_spill] sm:$0xff] }
 0x35a   : > { %v8955_v59 = vpop.permute.xlu0 %2871  ;;  %3155 = vrot.lane.b32.xlu1 %v3120_v54, %s10293_s28  ;;  %v9019_v54 = vrot.slane %v10366_v43, %v10365_v21 }
 0x35b   : > { %10360 = vst [vmem:[#allocation49_spill] sm:$0xff] %v8955_v59 }
 0x35c   : > { %v3502_v26 = vpop.permute.xlu1 %3501  ;;  %3371 = vrot.lane.b32.xlu0 %v3336_v36, %s10297_s23  ;;  %v10367_v36 = vld [vmem:[#allocation26_spill] sm:$0xff]  ;;  %v3290_v28 = vmul.f32 %v9019_v54, %v8484_v32 }
 0x35e   : > { %v8971_v51 = vpop.permute.xlu0 %2867  ;;  %2762 = vrot.lane.b32.xlu1 %v2735_v45, %s10297_s23  ;;  %v9023_v45 = vrot.slane %v10366_v43, %v10367_v36 }
 0x360   : > { %v8979_v57 = vpop.permute.xlu1 %2869  ;;  %2873 = vrot.lane.b32.xlu0 %v2846_v63, %s10293_s28  ;;  %v10368_v63 = vld [vmem:[#allocation34_spill] sm:$0xff] }
 0x361   : > { %v9027_v16 = vrot.slane %v10368_v63, %v10365_v21 }
 0x362   : > { %v3018_v2 = vpop.permute.xlu0 %3017  ;;  %3505 = vrot.lane.b32.xlu1 %v3470_v49, %s10293_s28  ;;  %v9031_v49 = vrot.slane %v10368_v63, %v10367_v36 }
 0x363   : > { %v2688_v44 = vmul.f32 %v9027_v16, %v8469_v25  ;;  %v3047_v6 = vsel %vm2780_vm4, %v8888_v1, %v3018_v2  ;;  %v2781_v1 = vsel %vm2780_vm4, %v8902_v20, %v8947_v29 }
 0x364   : > { %v2662_v41 = vpop.permute.xlu1 %2661  ;;  %v2689_v43 = vmul.f32 %v9031_v49, %v8475_v27 }
 0x365   : > { %v2668_v4 = vsel %vm2658_vm3, %v2662_v41, %v10362_v3  ;;  %v10369_v41 = vld [vmem:[#allocation33_spill] sm:$0xff] }
 0x366   : > { %v8986_v5 = vpop.permute.xlu0 %3161  ;;  %v2990_v50 = vmul.f32 %v8935_v42, %v2668_v4  ;;  %v3124_v56 = vmul.f32 %v8945_v30, %v2668_v4  ;;  %v3340_v11 = vmul.f32 %v8953_v8, %v2668_v4  ;;  %v2739_v13 = vmul.f32 %v8962_v12, %v2668_v4 }
 0x367   : > { %v2850_v14 = vmul.f32 %v8969_v17, %v2668_v4  ;;  %v3474_v38 = vmul.f32 %v8977_v18, %v2668_v4  ;;  %v9035_v3 = vrot.slane %v10369_v41, %v10365_v21 }
 0x368   : > { %v8990_v7 = vpop.permute.xlu1 %3027  ;;  %3029 = vrot.lane.b32.xlu1 %v2990_v50, %s10297_s23  ;;  %3163 = vrot.lane.b32.xlu0 %v3124_v56, %s10293_s28  ;;  %v9041_v50 = vrot.slane %v10369_v41, %v10367_v36 }
 0x369   : > { %v2937_v63 = vmul.f32 %v9035_v3, %v8469_v25 }
 0x36a   : > { %v8994_v53 = vpop.permute.xlu0 %3377  ;;  %v2938_v47 = vmul.f32 %v9041_v50, %v8475_v27 }
 0x36b   : > { %10363 = vst [vmem:[#allocation27_spill] sm:$0xff] %v8994_v53 }
 0x36c   : > { %v8998_v62 = vpop.permute.xlu1 %3023  ;;  %3379 = vrot.lane.b32.xlu1 %v3340_v11, %s10297_s23  ;;  %2770 = vrot.lane.b32.xlu0 %v2739_v13, %s10297_s23  ;;  %v3287_v11 = vmul.f32 %v9019_v54, %v8469_v25  ;;  %v3397_v13 = vsel %vm2780_vm4, %v8923_v10, %v8929_v23  ;;  %v3531_v10 = vsel %vm2891_vm5, %v8912_v24, %v3502_v26 }
 0x36d   : > { %v3048_v25 = vsel %vm2780_vm4, %v3018_v2, %v8882_v19  ;;  %v3291_v24 = vmul.f32 %v9023_v45, %v8489_v37 }
 0x36e   : > { %v9002_v33 = vpop.permute.xlu0 %2768  ;;  %v3421_v35 = vadd.f32 %v3397_v13, %v3287_v11  ;;  %v2940_v11 = vmul.f32 %v9035_v3, %v8484_v32  ;;  %v3072_v19 = vadd.f32 %v3048_v25, %v2938_v47 }
 0x36f   : > { %10364 = vst [vmem:[#allocation28_spill] sm:$0xff] %v9002_v33 }
 0x370   : > { %v3374_v9 = vpop.permute.xlu1 %3373  ;;  %2881 = vrot.lane.b32.xlu1 %v2850_v14, %s10293_s28  ;;  %3513 = vrot.lane.b32.xlu0 %v3474_v38, %s10293_s28  ;;  %v3398_v14 = vsel %vm2780_vm4, %v8929_v23, %v8907_v58  ;;  %v3288_v38 = vmul.f32 %v9023_v45, %v8475_v27  ;;  %v3532_v23 = vsel %vm2891_vm5, %v3502_v26, %v8937_v46 }
 0x371   : > { %v3555_v13 = vadd.f32 %v3531_v10, %v3421_v35  ;;  %v3071_v46 = vadd.f32 %v3047_v6, %v2937_v63  ;;  %v2799_v10 = vadd.f32 %v2781_v1, %v2688_v44 }
 0x372   : > { %v9009_v52 = vpop.permute.xlu0 %3157  ;;  %v3422_v34 = vadd.f32 %v3398_v14, %v3288_v38  ;;  %v2941_v38 = vmul.f32 %v9041_v50, %v8489_v37 }
 0x373   : > { %v3580_v63 = vrot.slane %v3555_v13, 2 }
 0x374   : > { %v9011_v22 = vpop.permute.xlu1 %2875  ;;  %v3556_v14 = vadd.f32 %v3532_v23, %v3422_v34  ;;  %v2782_v34 = vsel %vm2780_vm4, %v8947_v29, %v8915_v15 }
 0x376   : > { %v9013_v40 = vpop.permute.xlu0 %2764  ;;  %v3583_v23 = vrot.slane %v3556_v14, 2 }
 0x378   : > { %v9015_v31 = vpop.permute.xlu1 %3159 }
 0x37a   : > { %v9037_v4 = vpop.permute.xlu0 %3511 }
 0x37b   : > { %10370 = vst [vmem:[#allocation24_spill] sm:$0xff] %v9037_v4 }
 0x37c   : > { %v3376_v56 = vpop.permute.xlu1 %3375 }
 0x37d   : > { %v3400_v26 = vsel %vm2780_vm4, %v3374_v9, %v3376_v56  ;;  %v3401_v27 = vsel %vm2780_vm4, %v3376_v56, %v8994_v53  ;;  %v3181_v9 = vsel %vm2891_vm5, %v8892_v55, %v8919_v39  ;;  %v3182_v56 = vsel %vm2891_vm5, %v8919_v39, %v8896_v60 }
 0x37e   : > { %v9059_v41 = vpop.permute.xlu0 %2879  ;;  %v3424_v53 = vadd.f32 %v3400_v26, %v3290_v28  ;;  %v3425_v20 = vadd.f32 %v3401_v27, %v3291_v24  ;;  %v3205_v28 = vadd.f32 %v3181_v9, %v3071_v46  ;;  %v3206_v24 = vadd.f32 %v3182_v56, %v3072_v19 }
 0x37f   : > { %v2893_v19 = vsel %vm2891_vm5, %v8979_v57, %v8955_v59  ;;  %v3184_v46 = vsel %vm2891_vm5, %v9009_v52, %v9015_v31  ;;  %v2800_v9 = vadd.f32 %v2782_v34, %v2689_v43 }
 0x380   : > { %v9073_v58 = vpop.permute.xlu1 %2766  ;;  %v3230_v56 = vrot.slane %v3205_v28, 1  ;;  %v3233_v52 = vrot.slane %v3206_v24, 1 }
 0x381   : > { %v2911_v43 = vadd.f32 %v2893_v19, %v2800_v9 }
 0x382   : > { %v3508_v2 = vpop.permute.xlu0 %3507 }
 0x384   : > { %v3510_v35 = vpop.permute.xlu1 %3509 }
 0x385   : > { %v3534_v6 = vsel %vm2891_vm5, %v3508_v2, %v3510_v35  ;;  %v3535_v47 = vsel %vm2891_vm5, %v3510_v35, %v9037_v4 }
 0x386   : > { %v9099_v55 = vadd.f32 %v3534_v6, %v3424_v53  ;;  %v9101_v25 = vadd.f32 %v3535_v47, %v3425_v20  ;;  %v3026_v39 = vpop.permute.xlu0 %3025  ;;  %v2892_v53 = vsel %vm2891_vm5, %v8971_v51, %v8979_v57  ;;  %v10371_v20 = vld [vmem:[#allocation30_spill] sm:$0xff] }
 0x387   : > { %v3050_v26 = vsel %vm2780_vm4, %v8998_v62, %v3026_v39  ;;  %v3051_v29 = vsel %vm2780_vm4, %v3026_v39, %v8990_v7  ;;  %v3185_v62 = vsel %vm2891_vm5, %v9015_v31, %v8986_v5  ;;  %v2910_v39 = vadd.f32 %v2892_v53, %v2799_v10 }
 0x388   : > { %v10286_v44 = vrot.slane %v9099_v55, 2  ;;  %v10285_v27 = vrot.slane %v9101_v25, 2  ;;  %v3074_v1 = vadd.f32 %v3050_v26, %v2940_v11  ;;  %v3075_v13 = vadd.f32 %v3051_v29, %v2941_v38  ;;  %v2878_v14 = vpop.permute.xlu1 %2877 }
 0x38a   : > { %v3582_v11 = vsel %vm3579_vm6, %v3580_v63, %v10286_v44  ;;  %v3585_v51 = vsel %vm3579_vm6, %v3583_v23, %v10285_v27  ;;  %v9127_v2 = vadd.f32 %v3184_v46, %v3074_v1  ;;  %v9129_v38 = vadd.f32 %v3185_v62, %v3075_v13  ;;  %v2664_v57 = vpop.permute.xlu0 %2663 }
 0x38b   : > { %v9133_v35 = vsel %vm2658_vm3, %v2664_v57, %v10371_v20 }
 0x38c   : > { %v10288_v31 = vrot.slane %v9127_v2, 1  ;;  %v10287_v6 = vrot.slane %v9129_v38, 1  ;;  %v9137_v47 = vpop.permute.xlu1 %3035  ;;  %v3128_v63 = vmul.f32 %v8945_v30, %v9133_v35  ;;  %v2994_v23 = vmul.f32 %v8935_v42, %v9133_v35 }
 0x38d   : > { %v3478_v10 = vmul.f32 %v8977_v18, %v9133_v35  ;;  %v3344_v13 = vmul.f32 %v8953_v8, %v9133_v35  ;;  %v2743_v57 = vmul.f32 %v8962_v12, %v9133_v35  ;;  %v2692_v12 = vmul.f32 %v9031_v49, %v8489_v37 }
 0x38e   : > { %v3232_v34 = vsel %vm3229_vm7, %v3230_v56, %v10288_v31  ;;  %v3235_v28 = vsel %vm3229_vm7, %v3233_v52, %v10287_v6  ;;  %v3032_v24 = vpop.permute.xlu0 %3031  ;;  %3171 = vrot.lane.b32.xlu1 %v3128_v63, %s10293_s28  ;;  %3037 = vrot.lane.b32.xlu0 %v2994_v23, %s10297_s23  ;;  %v2691_v23 = vmul.f32 %v9027_v16, %v8484_v32 }
 0x38f   : > { %v3260_v26 = vadd.f32 %v3232_v34, %v2910_v39  ;;  %v3261_v29 = vadd.f32 %v3235_v28, %v2911_v43  ;;  %v3293_v43 = vmul.f32 %v9019_v54, %v8520_v48  ;;  %v10373_v34 = vld [vmem:[#allocation29_spill] sm:$0xff]  ;;  %v2784_v32 = vsel %vm2780_vm4, %v9013_v40, %v9073_v58 }
 0x390   : > { %v3166_v1 = vpop.permute.xlu1 %3165  ;;  %v3294_v28 = vmul.f32 %v9023_v45, %v10373_v34  ;;  %v2785_v37 = vsel %vm2780_vm4, %v9073_v58, %v9002_v33 }
 0x391   : > { %v9155_v53 = vadd.f32 %v3582_v11, %v3260_v26  ;;  %v9157_v19 = vadd.f32 %v3585_v51, %v3261_v29 }
 0x392   : > { %v9159_v46 = vpop.permute.xlu0 %3169  ;;  %3521 = vrot.lane.b32.xlu1 %v3478_v10, %s10293_s28  ;;  %3387 = vrot.lane.b32.xlu0 %v3344_v13, %s10297_s23  ;;  %v2943_v10 = vmul.f32 %v9035_v3, %v8520_v48 }
 0x394   : > { %v3516_v62 = vpop.permute.xlu1 %3515 }
 0x396   : > { %v9165_v9 = vpop.permute.xlu0 %3385  ;;  %2778 = vrot.lane.b32.xlu1 %v2743_v57, %s10297_s23  ;;  %v2944_v57 = vmul.f32 %v9041_v50, %v10373_v34 }
 0x397   : > { %10372 = vst [vmem:[#allocation32_spill] sm:$0xff] %v9165_v9 }
 0x398   : > { %v9168_v56 = vpop.permute.xlu1 %2772 }
 0x39a   : > { %v3382_v11 = vpop.permute.xlu0 %3381 }
 0x39c   : > { %v9170_v52 = vpop.permute.xlu1 %2887 }
 0x39e   : > { %v9172_v51 = vpop.permute.xlu0 %3519 }
 0x3a0   : > { %v3168_v20 = vpop.permute.xlu1 %3167 }
 0x3a1   : > { %v3187_v4 = vsel %vm2891_vm5, %v3166_v1, %v3168_v20  ;;  %v2803_v1 = vadd.f32 %v2785_v37, %v2692_v12  ;;  %v10374_v12 = vrot.slane %v9127_v2, 1 }
 0x3a2   : > { %v9174_v63 = vpop.permute.xlu0 %2776 }
 0x3a4   : > { %v3384_v39 = vpop.permute.xlu1 %3383 }
 0x3a5   : > { %v3403_v26 = vsel %vm2780_vm4, %v3382_v11, %v3384_v39  ;;  %v3404_v29 = vsel %vm2780_vm4, %v3384_v39, %v9165_v9  ;;  %v2895_v11 = vsel %vm2891_vm5, %v9011_v22, %v2878_v14  ;;  %v2896_v39 = vsel %vm2891_vm5, %v2878_v14, %v9059_v41  ;;  %v9205_v9 = vld [vmem:[%s7974_s25] sm:$0x7] }
 0x3a6   : > { %v3034_v13 = vpop.permute.xlu0 %3033  ;;  %v3427_v44 = vadd.f32 %v3403_v26, %v3293_v43  ;;  %v3428_v58 = vadd.f32 %v3404_v29, %v3294_v28  ;;  %v3188_v22 = vsel %vm2891_vm5, %v3168_v20, %v9159_v46  ;;  %v2802_v26 = vadd.f32 %v2784_v32, %v2691_v23 }
 0x3a7   : > { %v3053_v27 = vsel %vm2780_vm4, %v3032_v24, %v3034_v13  ;;  %v3054_v40 = vsel %vm2780_vm4, %v3034_v13, %v9137_v47  ;;  %v9225_v20 = vrot.slane %v9205_v9, %v10365_v21  ;;  %v2914_v23 = vadd.f32 %v2896_v39, %v2803_v1 }
 0x3a8   : > { %v3077_v6 = vadd.f32 %v3053_v27, %v2943_v10  ;;  %v3078_v31 = vadd.f32 %v3054_v40, %v2944_v57  ;;  %v3518_v33 = vpop.permute.xlu1 %3517  ;;  %v10375_v32 = vrot.slane %v9129_v38, 1  ;;  %v10376_v10 = vrot.slane %v9099_v55, 2 }
 0x3a9   : > { %v3537_v59 = vsel %vm2891_vm5, %v3516_v62, %v3518_v33  ;;  %v3538_v14 = vsel %vm2891_vm5, %v3518_v33, %v9172_v51  ;;  %v9229_v62 = vrot.slane %v9205_v9, %v10367_v36 }
 0x3aa   : > { %v9213_v24 = vadd.f32 %v3187_v4, %v3077_v6  ;;  %v9215_v13 = vadd.f32 %v3188_v22, %v3078_v31  ;;  %v9217_v43 = vadd.f32 %v3537_v59, %v3427_v44  ;;  %v9219_v27 = vadd.f32 %v3538_v14, %v3428_v58  ;;  %v9221_v28 = vpop.permute.xlu0 %2885 }
 0x3ab   : > { %v2913_v6 = vadd.f32 %v2895_v11, %v2802_v26  ;;  %v10377_v11 = vrot.slane %v9101_v25, 2  ;;  %v3637_v38 = vadd.f32 %v9229_v62, %v9157_v19  ;;  %v3636_v22 = vadd.f32 %v9225_v20, %v9155_v53 }
 0x3ac   : > { %v3239_v33 = vrot.slane %v9213_v24, 1  ;;  %v3241_v4 = vrot.slane %v9215_v13, 1  ;;  %v3589_v59 = vrot.slane %v9217_v43, 2  ;;  %v3591_v44 = vrot.slane %v9219_v27, 2  ;;  %v9235_v31 = vpop.permute.xlu1 %2774  ;;  %v7735_v13 = vld [vmem:[%s7979_s29 + $0x150] ss:$8 sps:$4 sm:$0xff]  }
 0x3ad   : > { %v3646_v19 = vmax.f32 %v3637_v38, 0.0 }
 0x3ae   : > { %v3240_v29 = vsel %vm3229_vm7, %v10374_v12, %v3239_v33  ;;  %v3242_v37 = vsel %vm3229_vm7, %v10375_v32, %v3241_v4  ;;  %v3590_v57 = vsel %vm3579_vm6, %v10376_v10, %v3589_v59  ;;  %v3592_v2 = vsel %vm3579_vm6, %v10377_v11, %v3591_v44  ;;  %v3040_v39 = vpop.permute.xlu0 %3039 }
 0x3af   : > { %v3263_v40 = vadd.f32 %v3240_v29, %v2913_v6  ;;  %v3264_v58 = vadd.f32 %v3242_v37, %v2914_v23  ;;  %v3645_v29 = vmax.f32 %v3636_v22, 0.0  ;;  %v2854_v10 = vmul.f32 %v8969_v17, %v9133_v35  ;;  %v7725_v17 = vld [vmem:[%s7979_s29 + $0x114] ss:$8 sps:$4 sm:$0xff]  }
 0x3b0   : > { %v2666_v14 = vpop.permute.xlu1 %2665  ;;  %v3655_v11 = vmin.f32 %v3646_v19, 6.0 }
 0x3b1   : > { %v3613_v26 = vadd.f32 %v3590_v57, %v3263_v40  ;;  %v2670_v55 = vsel %vm2658_vm3, %v2666_v14, %v8749_v61  ;;  %v3614_v1 = vadd.f32 %v3592_v2, %v3264_v58  ;;  %v3654_v40 = vmin.f32 %v3645_v29, 6.0  ;;  %v10378_v29 = vld [vmem:[#allocation31_spill] sm:$0xff] }
 0x3b2   : > { %v2998_v12 = vmul.f32 %v8935_v42, %v2670_v55  ;;  %v3132_v25 = vmul.f32 %v8945_v30, %v2670_v55  ;;  %v9265_v32 = vpop.permute.xlu0 %3177  ;;  %v3348_v42 = vmul.f32 %v8953_v8, %v2670_v55  ;;  %v7720_v8 = vld [vmem:[%s7979_s29 + $0x100] ss:$8 sps:$4 sm:$0xff]   ;;  %v3482_v14 = vmul.f32 %v8977_v18, %v2670_v55 }
 0x3b3   : > { %v3639_v6 = vadd.f32 %v9225_v20, %v3613_v26  ;;  %v3640_v23 = vadd.f32 %v9229_v62, %v3614_v1  ;;  %v7723_v1 = vld [vmem:[%s7979_s29 + $0x110] ss:$8 sps:$4 sm:$0xff]   ;;  %v2788_v18 = vsel %vm2780_vm4, %v9235_v31, %v9174_v63  ;;  %v2946_v55 = vmul.f32 %v9035_v3, %v8572_v0 }
 0x3b4   : > { %v2884_v37 = vpop.permute.xlu1 %2883  ;;  %3179 = vrot.lane.b32.xlu1 %v3132_v25, %s10293_s28  ;;  %3045 = vrot.lane.b32.xlu0 %v2998_v12, %s10297_s23  ;;  %v7728_v25 = vld [vmem:[%s7979_s29 + $0x124] ss:$8 sps:$4 sm:$0xff]   ;;  %v2787_v3 = vsel %vm2780_vm4, %v9168_v56, %v9235_v31  ;;  %vm6643_vm3 = vcmask 40960  }
 0x3b5   : > { %v3648_v61 = vmax.f32 %v3639_v6, 0.0  ;;  %v3649_v53 = vmax.f32 %v3640_v23, 0.0  ;;  %v7726_v23 = vld [vmem:[%s7979_s29 + $0x120] ss:$8 sps:$4 sm:$0xff]   ;;  %v7734_v31 = vld [vmem:[%s7979_s29 + $0x144] ss:$8 sps:$4 sm:$0xff]  }
 0x3b6   : > { %v9272_v30 = vpop.permute.xlu0 %3393 }
 0x3b7   : > { %v3657_v57 = vmin.f32 %v3648_v61, 6.0  ;;  %v3658_v2 = vmin.f32 %v3649_v53, 6.0  ;;  %v2947_v61 = vmul.f32 %v9041_v50, %v10378_v29  ;;  %v7731_v53 = vld [vmem:[%s7979_s29 + $0x134] ss:$8 sps:$4 sm:$0xff]   ;;  %v2694_v50 = vmul.f32 %v9027_v16, %v8520_v48 }
 0x3b8   : > { %v9276_v58 = vpop.permute.xlu1 %3043  ;;  %2889 = vrot.lane.b32.xlu1 %v2854_v10, %s10293_s28  ;;  %3395 = vrot.lane.b32.xlu0 %v3348_v42, %s10297_s23  ;;  %v2695_v42 = vmul.f32 %v9031_v49, %v10373_v34  ;;  %v7729_v34 = vld [vmem:[%s7979_s29 + $0x130] ss:$8 sps:$4 sm:$0xff]   ;;  %v3296_v48 = vmul.f32 %v9019_v54, %v8572_v0  ;;  %v2899_v16 = vsel %vm2891_vm5, %v9221_v28, %v9170_v52  ;;  %v7732_v0 = vld [vmem:[%s7979_s29 + $0x140] ss:$8 sps:$4 sm:$0xff]  }
 0x3b9   : > { %v3664_v38 = vpack.c.bf16 %v3658_v2, %v3655_v11  ;;  %v3663_v22 = vpack.c.bf16 %v3657_v57, %v3654_v40 }
 0x3ba   : > { %v3390_v26 = vpop.permute.xlu0 %3389 }
 0x3bb   : > { %4001 = vmatprep.mubr.bf16.mxu0 %v3664_v38  ;;  %v2806_v38 = vadd.f32 %v2788_v18, %v2695_v42 }
 0x3bc   : > { %4002 = vmatmul.mubr.bf16.vlgmr.msra.gmra.mrb[16].mxu0 %v3663_v22  ;;  %v3174_v35 = vpop.permute.xlu1 %3173  ;;  %3529 = vrot.lane.b32.xlu0 %v3482_v14, %s10293_s28  ;;  %s7934_s28 = smov 8  }
 0x3bd   : > { %4021 = vmatpush1.bf16.msra.mxu0 %v7720_v8 }
 0x3be   : > { %v3524_v12 = vpop.permute.xlu0 %3523  ;;  %4022 = vmatprep.subr.bf16.mxu0 %v7725_v17  ;;  %v2805_v17 = vadd.f32 %v2787_v3, %v2694_v50 }
 0x3c0   : > { %v9286_v6 = vpop.permute.xlu1 %3527 }
 0x3c1   : > { %4023 = vmatpush1.bf16.msra.mxu0 %v7723_v1 }
 0x3c2   : > { %v3042_v19 = vpop.permute.xlu0 %3041  ;;  %4024 = vmatprep.subr.bf16.mxu0 %v7728_v25 }
 0x3c3   : > { %v3056_v10 = vsel %vm2780_vm4, %v3040_v39, %v3042_v19  ;;  %v3057_v57 = vsel %vm2780_vm4, %v3042_v19, %v9276_v58  ;;  %v2898_v39 = vsel %vm2891_vm5, %v2884_v37, %v9221_v28  ;;  %v3297_v37 = vmul.f32 %v9023_v45, %v10378_v29 }
 0x3c4   : > { %v3080_v11 = vadd.f32 %v3056_v10, %v2946_v55  ;;  %v3081_v2 = vadd.f32 %v3057_v57, %v2947_v61  ;;  %v3176_v40 = vpop.permute.xlu1 %3175  ;;  %v2916_v18 = vadd.f32 %v2898_v39, %v2805_v17  ;;  %v7743_v39 = vld [vmem:[%s7979_s29 + $0x174] ss:$8 sps:$4 sm:$0xff]  }
 0x3c5   : > { %v3190_v22 = vsel %vm2891_vm5, %v3174_v35, %v3176_v40  ;;  %v3191_v49 = vsel %vm2891_vm5, %v3176_v40, %v9265_v32  ;;  %4025 = vmatpush1.bf16.msra.mxu0 %v7726_v23  ;;  %v2917_v23 = vadd.f32 %v2899_v16, %v2806_v38 }
 0x3c6   : > { %v3214_v8 = vadd.f32 %v3190_v22, %v3080_v11  ;;  %v3215_v14 = vadd.f32 %v3191_v49, %v3081_v2  ;;  %v3526_v56 = vpop.permute.xlu0 %3525  ;;  %4026 = vmatprep.subr.bf16.mxu0 %v7731_v53  ;;  %v7740_v2 = vld [vmem:[%s7979_s29 + $0x164] ss:$8 sps:$4 sm:$0xff]  }
 0x3c7   : > { %v3540_v53 = vsel %vm2891_vm5, %v3524_v12, %v3526_v56  ;;  %v3541_v42 = vsel %vm2891_vm5, %v3526_v56, %v9286_v6  ;;  %v10379_v56 = vld [vmem:[#allocation46_spill] sm:$0xff] }
 0x3c8   : > { %v3245_v35 = vrot.slane %v3214_v8, 1  ;;  %v3247_v1 = vrot.slane %v3215_v14, 1  ;;  %v3392_v25 = vpop.permute.xlu1 %3391 }
 0x3c9   : > { %v3406_v55 = vsel %vm2780_vm4, %v3390_v26, %v3392_v25  ;;  %v3407_v19 = vsel %vm2780_vm4, %v3392_v25, %v9272_v30  ;;  %4027 = vmatpush1.bf16.msra.mxu0 %v7729_v34  ;;  %v7737_v26 = vld [vmem:[%s7979_s29 + $0x154] ss:$8 sps:$4 sm:$0xff]   ;;  %v7738_v34 = vld [vmem:[%s7979_s29 + $0x160] ss:$8 sps:$4 sm:$0xff]  }
 0x3ca   : > { %v3246_v54 = vsel %vm3229_vm7, %v3239_v33, %v3245_v35  ;;  %v3248_v28 = vsel %vm3229_vm7, %v3241_v4, %v3247_v1  ;;  %v3430_v45 = vadd.f32 %v3406_v55, %v3296_v48  ;;  %v3431_v29 = vadd.f32 %v3407_v19, %v3297_v37  ;;  %v3022_v61 = vpop.permute.xlu0 %3021  ;;  %4028 = vmatprep.subr.bf16.mxu0 %v7734_v31  ;;  %v10380_v35 = vld [vmem:[#allocation35_spill] sm:$0xff] }
 0x3cb   : > { %v3267_v10 = vadd.f32 %v3248_v28, %v2917_v23  ;;  %v3266_v24 = vadd.f32 %v3246_v54, %v2916_v18  ;;  %v3049_v31 = vsel %vm2780_vm4, %v10379_v56, %v3022_v61  ;;  %v7933_v55 = vmov 0   ;;  %v10381_v54 = vld [vmem:[#allocation38_spill] sm:$0xff] }
 0x3cc   : > { %v3564_v57 = vadd.f32 %v3540_v53, %v3430_v45  ;;  %v3565_v33 = vadd.f32 %v3541_v42, %v3431_v29  ;;  %v3156_v3 = vpop.permute.xlu1 %3155  ;;  %v3073_v1 = vadd.f32 %v3049_v31, %v10380_v35  ;;  %v10383_v29 = vld [vmem:[#allocation37_spill] sm:$0xff] }
 0x3cd   : > { %4029 = vmatpush1.bf16.msra.mxu0 %v7732_v0  ;;  %v3183_v37 = vsel %vm2891_vm5, %v8896_v60, %v3156_v3  ;;  %v10382_v60 = vld [vmem:[#allocation47_spill] sm:$0xff]  ;;  %v10391_v35 = vld [vmem:[#allocation41_spill] sm:$0xff] }
 0x3ce   : > { %v3595_v4 = vrot.slane %v3564_v57, 2  ;;  %v3597_v11 = vrot.slane %v3565_v33, 2  ;;  %4030 = vmatprep.subr.bf16.mxu0 %v7737_v26  ;;  %v3372_v40 = vpop.permute.xlu0 %3371  ;;  %v3207_v0 = vadd.f32 %v3183_v37, %v3073_v1  ;;  %v10384_v26 = vld [vmem:[#allocation49_spill] sm:$0xff]  ;;  %v10386_v33 = vld [vmem:[#allocation27_spill] sm:$0xff] }
 0x3cf   : > { %v3399_v45 = vsel %vm2780_vm4, %v10382_v60, %v3372_v40 }
 0x3d0   : > { %v2763_v50 = vpop.permute.xlu1 %2762  ;;  %v3598_v12 = vsel %vm3579_vm6, %v3591_v44, %v3597_v11  ;;  %v3596_v38 = vsel %vm3579_vm6, %v3589_v59, %v3595_v4  ;;  %v7741_v44 = vld [vmem:[%s7979_s29 + $0x170] ss:$8 sps:$4 sm:$0xff]   ;;  %v10387_v4 = vld [vmem:[#allocation36_spill] sm:$0xff] }
 0x3d1   : > { %v3617_v22 = vadd.f32 %v3598_v12, %v3267_v10  ;;  %v3616_v49 = vadd.f32 %v3596_v38, %v3266_v24  ;;  %4031 = vmatpush1.bf16.msra.mxu0 %v7735_v13  ;;  %v10385_v24 = vld [vmem:[#allocation48_spill] sm:$0xff]  ;;  %v3236_v13 = vrot.slane %v3207_v0, 1  ;;  %v3423_v11 = vadd.f32 %v3399_v45, %v10387_v4  ;;  %v10388_v12 = vld [vmem:[#allocation39_spill] sm:$0xff] }
 0x3d2   : > { %4032 = vmatprep.subr.bf16.mxu0 %v7740_v2  ;;  %v2874_v43 = vpop.permute.xlu0 %2873  ;;  %v10393_v0 = vld [vmem:[#allocation32_spill] sm:$0xff] }
 0x3d3   : > { %v3643_v8 = vadd.f32 %v9229_v62, %v3617_v22  ;;  %v3642_v14 = vadd.f32 %v9225_v20, %v3616_v49  ;;  %v2783_v20 = vsel %vm2780_vm4, %v8915_v15, %v2763_v50  ;;  %v2894_v53 = vsel %vm2891_vm5, %v10384_v26, %v2874_v43 }
 0x3d4   : > { %v3506_v48 = vpop.permute.xlu1 %3505  ;;  %v2801_v61 = vadd.f32 %v2783_v20, %v10383_v29  ;;  %v10395_v29 = vld [vmem:[#allocation25_spill] sm:$0xff] }
 0x3d5   : > { %v3652_v27 = vmax.f32 %v3643_v8, 0.0  ;;  %v3651_v17 = vmax.f32 %v3642_v14, 0.0  ;;  %4033 = vmatpush1.bf16.msra.mxu0 %v7738_v34  ;;  %v3533_v57 = vsel %vm2891_vm5, %v10385_v24, %v3506_v48  ;;  %v10389_v34 = vld [vmem:[#allocation24_spill] sm:$0xff] }
 0x3d6   : > { %4034 = vmatprep.subr.bf16.mxu0 %v7743_v39  ;;  %v2912_v40 = vadd.f32 %v2894_v53, %v2801_v61  ;;  %v3632_v61 = vrot.slane %v9205_v9, %v10395_v29 }
 0x3d7   : > { %v3661_v59 = vmin.f32 %v3652_v27, 6.0  ;;  %v3660_v16 = vmin.f32 %v3651_v17, 6.0 }
 0x3d9   : > { %v3667_v62 = vpack.c.bf16 %v3661_v59, %v3661_v59  ;;  %v3666_v25 = vpack.c.bf16 %v3660_v16, %v3660_v16  ;;  %4035 = vmatpush1.bf16.msra.mxu0 %v7741_v44  ;;  %v10390_v59 = vld [vmem:[#allocation28_spill] sm:$0xff] }
 0x3da   : > { %v3030_v23 = vpop.permute.xlu1 %3029  ;;  %v3164_v18 = vpop.permute.xlu0 %3163  ;;  %6244 = vmatprep.subr.bf16.mxu0 %v7933_v55 }
 0x3db   : > { %v3052_v19 = vsel %vm2780_vm4, %v8990_v7, %v3030_v23  ;;  %4011 = vmatprep.mubr.bf16.mxu0 %v3667_v62  ;;  %v3186_v15 = vsel %vm2891_vm5, %v8986_v5, %v3164_v18  ;;  %v3557_v5 = vadd.f32 %v3533_v57, %v3423_v11  ;;  %v10392_v18 = vld [vmem:[#allocation40_spill] sm:$0xff] }
 0x3dc   : > { %v3076_v28 = vadd.f32 %v3052_v19, %v10381_v54  ;;  %4012 = vmatmul.mubr.bf16.gmra.mrb[20].mxu0 %v3666_v25 }
 0x3dd   : > { %4052 = vmatprep.mubr.bf16.mxu0 %v7933_v55  ;;  %v3586_v14 = vrot.slane %v3557_v5, 2  ;;  %v10396_v5 = vld [vmem:[#allocation44_spill] sm:$0xff] }
 0x3de   : > { %v3210_v42 = vadd.f32 %v3186_v15, %v3076_v28  ;;  %v3380_v7 = vpop.permute.xlu1 %3379  ;;  %v2771_v10 = vpop.permute.xlu0 %2770  ;;  %v10394_v28 = vld [vmem:[#allocation42_spill] sm:$0xff] }
 0x3df   : > { %v3402_v3 = vsel %vm2780_vm4, %v10386_v33, %v3380_v7  ;;  %v2786_v16 = vsel %vm2780_vm4, %v10390_v59, %v2771_v10 }
 0x3e0   : > { %v3237_v2 = vrot.slane %v3210_v42, 1  ;;  %v3426_v38 = vadd.f32 %v3402_v3, %v10388_v12  ;;  %v2804_v19 = vadd.f32 %v2786_v16, %v10392_v18  ;;  %v7014_v18 = vld [vmem:[%s7994_s14 + $0x7] ss:$8 sm:$0x3] }
 0x3e2   : > { %v3238_v50 = vsel %vm3229_vm7, %v3236_v13, %v3237_v2  ;;  %v3514_v22 = vpop.permute.xlu0 %3513  ;;  %v2882_v17 = vpop.permute.xlu1 %2881 }
 0x3e3   : > { %v3262_v49 = vadd.f32 %v3238_v50, %v2912_v40  ;;  %v3536_v39 = vsel %vm2891_vm5, %v10389_v34, %v3514_v22  ;;  %v2897_v62 = vsel %vm2891_vm5, %v9059_v41, %v2882_v17 }
 0x3e4   : > { %v3560_v8 = vadd.f32 %v3536_v39, %v3426_v38  ;;  %v2915_v45 = vadd.f32 %v2897_v62, %v2804_v19  ;;  %v10397_v38 = vld [vmem:[#allocation43_spill] sm:$0xff]  ;;  %v4557_v19 = vrot.slane %v7014_v18, %v10365_v21 }
 0x3e6   : > { %v3587_v56 = vrot.slane %v3560_v8, 2 }
 0x3e8   : > { %v3588_v31 = vsel %vm3579_vm6, %v3586_v14, %v3587_v56 }
 0x3e9   : > { %v3612_v27 = vadd.f32 %v3588_v31, %v3262_v49  ;;  %v10398_v31 = vld [vmem:[#allocation45_spill] sm:$0xff] }
 0x3eb   : > { %v3638_v42 = vadd.f32 %v3632_v61, %v3612_v27 }
 0x3ed   : > { %v3647_v24 = vmax.f32 %v3638_v42, 0.0 }
 0x3ef   : > { %v3656_v3 = vmin.f32 %v3647_v24, 6.0 }
 0x400   : > { %v3172_v44 = vpop.permute.xlu1 %3171  ;;  %v3038_v43 = vpop.permute.xlu0 %3037 }
 0x401   : > { %v3055_v48 = vsel %vm2780_vm4, %v9137_v47, %v3038_v43  ;;  %v3189_v37 = vsel %vm2891_vm5, %v9159_v46, %v3172_v44 }
 0x402   : > { %v3079_v1 = vadd.f32 %v3055_v48, %v10391_v35 }
 0x404   : > { %v3213_v25 = vadd.f32 %v3189_v37, %v3079_v1  ;;  %v3522_v20 = vpop.permute.xlu1 %3521  ;;  %v3388_v23 = vpop.permute.xlu0 %3387  ;;  %v7011_v37 = vld [vmem:[%s7994_s14 + $0x4] ss:$8 sm:$0x3] }
 0x405   : > { %v3405_v54 = vsel %vm2780_vm4, %v10393_v0, %v3388_v23  ;;  %v3539_v46 = vsel %vm2891_vm5, %v9172_v51, %v3522_v20  ;;  %v4362_v62 = vrot.slane %v7011_v37, %v10365_v21  ;;  %v4366_v20 = vrot.slane %v7011_v37, %v10367_v36 }
 0x406   : > { %v3243_v47 = vrot.slane %v3213_v25, 1  ;;  %v3429_v60 = vadd.f32 %v3405_v54, %v10394_v28  ;;  %v7012_v25 = vld [vmem:[%s7994_s14 + $0x5] ss:$8 sm:$0x3]  ;;  %v4561_v0 = vrot.slane %v7014_v18, %v10367_v36 }
 0x407   : > { %4367 = vrot.lane.b32.xlu1 %v4362_v62, %s7934_s28  ;;  %4369 = vrot.lane.b32.xlu0 %v4366_v20, %s7934_s28  ;;  %v4436_v23 = vrot.slane %v7012_v25, %v10367_v36  ;;  %v7008_v54 = vld [vmem:[%s7994_s14 + $0x1] ss:$8 sm:$0x3] }
 0x408   : > { %v3244_v41 = vsel %vm3229_vm7, %v3237_v2, %v3243_v47  ;;  %v3563_v15 = vadd.f32 %v3539_v46, %v3429_v60  ;;  %v2779_v9 = vpop.permute.xlu1 %2778  ;;  %v4229_v28 = vrot.slane %v7008_v54, %v10367_v36  ;;  %v7015_v60 = vld [vmem:[%s7994_s14 + $0x10] ss:$8 sm:$0x3] }
 0x409   : > { %v3265_v26 = vadd.f32 %v3244_v41, %v2915_v45  ;;  %v2789_v2 = vsel %vm2780_vm4, %v9174_v63, %v2779_v9  ;;  %v4627_v45 = vrot.slane %v7015_v60, %v10365_v21  ;;  %v4631_v29 = vrot.slane %v7015_v60, %v10367_v36 }
 0x40a   : > { %v3593_v53 = vrot.slane %v3563_v15, 2  ;;  %v2807_v22 = vadd.f32 %v2789_v2, %v10397_v38  ;;  %v3717_v15 = vld [vmem:[%s10399_s3] sm:$0x3]  ;;  %s10405_s3 = sld [smem:[#allocation12_spill]] }
 0x40b   : > { %4439 = vrot.lane.b32.xlu0 %v4436_v23, %s10299_s1 }
 0x40c   : > { %v3594_v7 = vsel %vm3579_vm6, %v3587_v56, %v3593_v53 }
 0x40d   : > { %v3615_v10 = vadd.f32 %v3594_v7, %v3265_v26  ;;  %v3722_v26 = vrot.slane %v3717_v15, %v10365_v21 }
 0x40f   : > { %v3641_v57 = vadd.f32 %v3632_v61, %v3615_v10  ;;  %4564 = vrot.lane.b32.xlu0 %v4561_v0, %s7934_s28 }
 0x411   : > { %v3650_v33 = vmax.f32 %v3641_v57, 0.0 }
 0x413   : > { %v3659_v13 = vmin.f32 %v3650_v33, 6.0  ;;  %4232 = vrot.lane.b32.xlu0 %v4229_v28, %s7934_s28 }
 0x415   : > { %v3665_v4 = vpack.c.bf16 %v3659_v13, %v3656_v3 }
 0x417   : > { %4053 = vmatmul.mubr.bf16.vlgmr.msra.gmra.mrb[16].mxu0 %v3665_v4  ;;  %4634 = vrot.lane.b32.xlu0 %v4631_v29, %s10299_s1 }
 0x418   : > { %4062 = vmatprep.mubr.bf16.mxu0 %v7933_v55 }
 0x426   : > { %v3180_v51 = vpop.permute.xlu1 %3179  ;;  %v3046_v11 = vpop.permute.xlu0 %3045 }
 0x427   : > { %v3058_v40 = vsel %vm2780_vm4, %v9276_v58, %v3046_v11  ;;  %v3192_v12 = vsel %vm2891_vm5, %v9265_v32, %v3180_v51 }
 0x428   : > { %v3082_v50 = vadd.f32 %v3058_v40, %v10396_v5 }
 0x42a   : > { %v3216_v49 = vadd.f32 %v3192_v12, %v3082_v50  ;;  %v2890_v34 = vpop.permute.xlu1 %2889  ;;  %v3396_v39 = vpop.permute.xlu0 %3395 }
 0x42b   : > { %v2900_v8 = vsel %vm2891_vm5, %v9170_v52, %v2890_v34  ;;  %v3408_v14 = vsel %vm2780_vm4, %v9272_v30, %v3396_v39 }
 0x42c   : > { %v3249_v63 = vrot.slane %v3216_v49, 1  ;;  %v2918_v56 = vadd.f32 %v2900_v8, %v2807_v22  ;;  %v3432_v27 = vadd.f32 %v3408_v14, %v10398_v31 }
 0x42e   : > { %v3250_v58 = vsel %vm3229_vm7, %v3243_v47, %v3249_v63  ;;  %v3530_v32 = vpop.permute.xlu0 %3529  ;;  %v4225_v47 = vrot.slane %v7008_v54, %v10365_v21 }
 0x42f   : > { %v3268_v17 = vadd.f32 %v3250_v58, %v2918_v56  ;;  %v3542_v44 = vsel %vm2891_vm5, %v9286_v6, %v3530_v32  ;;  %v4432_v6 = vrot.slane %v7012_v25, %v10365_v21  ;;  %v10400_v32 = vmov 0.0  }
 0x430   : > { %v3566_v43 = vadd.f32 %v3542_v44, %v3432_v27  ;;  %v4083_v27 = vld [vmem:[%s10331_s8] sm:$0xff]  ;;  %v4085_v44 = vld [vmem:[%s10331_s8 + $0x10] sm:$0xff] }
 0x431   : > { %4437 = vrot.lane.b32.xlu1 %v4432_v6, %s10299_s1 }
 0x432   : > { %v3599_v48 = vrot.slane %v3566_v43, 2  ;;  %v4086_v43 = vld [vmem:[%s10331_s8 + $0x18] sm:$0x3] }
 0x434   : > { %v3600_v52 = vsel %vm3579_vm6, %v3593_v53, %v3599_v48  ;;  %v3726_v53 = vrot.slane %v3717_v15, %v10367_v36 }
 0x435   : > { %v3618_v59 = vadd.f32 %v3600_v52, %v3268_v17  ;;  %4562 = vrot.lane.b32.xlu1 %v4557_v19, %s7934_s28  ;;  %v4084_v17 = vld [vmem:[%s10331_s8 + $0x8] sm:$0xff]  ;;  %s10409_s8 = smov 16  }
 0x437   : > { %v3644_v30 = vadd.f32 %v3632_v61, %v3618_v59  ;;  %v7009_v61 = vld [vmem:[%s7994_s14 + $0x2] ss:$8 sm:$0x3] }
 0x438   : > { %v4284_v46 = vrot.slane %v7009_v61, %v10365_v21  ;;  %v4288_v41 = vrot.slane %v7009_v61, %v10367_v36 }
 0x439   : > { %v3653_v16 = vmax.f32 %v3644_v30, 0.0  ;;  %4230 = vrot.lane.b32.xlu1 %v4225_v47, %s7934_s28  ;;  %s7935_s28 = smov 80  }
 0x43a   : > { %4291 = vrot.lane.b32.xlu0 %v4288_v41, %s10299_s1 }
 0x43b   : > { %v3662_v35 = vmin.f32 %v3653_v16, 6.0 }
 0x43d   : > { %v3668_v1 = vpack.c.bf16 %v3662_v35, %v3662_v35  ;;  %4632 = vrot.lane.b32.xlu1 %v4627_v45, %s10299_s1 }
 0x43f   : > { %4063 = vmatmul.mubr.bf16.gmra.mrb[20].mxu0 %v3668_v1 }
 0x441   : > { %4289 = vrot.lane.b32.xlu1 %v4284_v46, %s10299_s1 }
 0x479   : > { %v9452_v48 = vpop.permute.xlu1 %4367 }
 0x4a3   : > { %v9467_v1 = vpop.permute.xlu1 %4437 }
 0x4a7   : > { %v4563_v19 = vpop.permute.xlu1 %4562 }
 0x4ab   : > { %v4231_v47 = vpop.permute.xlu1 %4230 }
 0x4af   : > { %v4633_v45 = vpop.permute.xlu1 %4632 }
 0x4b3   : > { %v4290_v46 = vpop.permute.xlu1 %4289 }
 0x4ea   : > { %v4054_v42 = vpop.f32.mrb[16].mxu0 }
 0x4eb   : > { %v7256_v7 = vadd.f32 %v4054_v42, %v3722_v26  ;;  %v4056_v10 = vpop.f32.mrb[17].mxu0 }
 0x4ec   : > { %v7257_v24 = vadd.f32 %v4056_v10, %v3726_v53  ;;  %v4058_v57 = vpop.f32.mrb[18].mxu0 }
 0x4ed   : > { %v4071_v33 = vmax.f32 %v7256_v7, 0.0  ;;  %v7258_v3 = vadd.f32 %v4058_v57, %v3722_v26  ;;  %v4060_v13 = vpop.f32.mrb[19].mxu0 }
 0x4ee   : > { %v4072_v4 = vmax.f32 %v7257_v24, 0.0  ;;  %v7259_v9 = vadd.f32 %v4060_v13, %v3726_v53 }
 0x4ef   : > { %v4073_v51 = vmax.f32 %v7258_v3, 0.0  ;;  %v4077_v2 = vmin.f32 %v4071_v33, 6.0  ;;  %v4370_v33 = vpop.permute.xlu0 %4369 }
 0x4f0   : > { %v4074_v11 = vmax.f32 %v7259_v9, 0.0  ;;  %v4078_v5 = vmin.f32 %v4072_v4, 6.0 }
 0x4f1   : > { %v4079_v40 = vmin.f32 %v4073_v51, 6.0 }
 0x4f2   : > { %v4080_v50 = vmin.f32 %v4074_v11, 6.0 }
 0x4f3   : > { %v7210_v12 = vpack.c.bf16 %v4079_v40, %v4077_v2  ;;  %v4440_v13 = vpop.permute.xlu0 %4439 }
 0x4f4   : > { %v7208_v38 = vpack.c.bf16 %v4080_v50, %v4078_v5  ;;  %v9529_v50 = vsel %vm4234_vm8, %v9452_v48, %v4370_v33  ;;  %v7756_v33 = vld [vmem:[%s8004_s24 + $0x40] ss:$8 sps:$4 sm:$0xff]  }
 0x4f6   : > { %7209 = vmatprep.subr.bf16.mxu1 %v7208_v38 }
 0x4f7   : > { %7211 = vmatpush1.bf16.msra.mxu1 %v7210_v12  ;;  %v4565_v51 = vpop.permute.xlu0 %4564 }
 0x4fb   : > { %v4233_v11 = vpop.permute.xlu0 %4232 }
 0x4ff   : > { %v4635_v2 = vpop.permute.xlu0 %4634 }
 0x503   : > { %v4292_v40 = vpop.permute.xlu0 %4291 }
 0x512   : > { %v4064_v22 = vpop.f32.mrb[20].mxu0 }
 0x513   : > { %v7260_v49 = vadd.f32 %v4064_v22, %v3722_v26  ;;  %v4066_v34 = vpop.f32.mrb[21].mxu0 }
 0x514   : > { %v7261_v39 = vadd.f32 %v4066_v34, %v3726_v53  ;;  %v4068_v8 = vpop.f32.mrb[22].mxu0 }
 0x515   : > { %v4075_v14 = vmax.f32 %v7260_v49, 0.0  ;;  %v4069_v63 = vpop.f32.mrb[23].mxu0  ;;  %v9539_v49 = vsel %vm2724_vm1, %v9467_v1, %v4440_v13 }
 0x516   : > { %v4076_v56 = vmax.f32 %v7261_v39, 0.0 }
 0x517   : > { %v4081_v31 = vmin.f32 %v4075_v14, 6.0  ;;  %v9545_v14 = vsel %vm4234_vm8, %v4563_v19, %v4565_v51 }
 0x518   : > { %v4082_v58 = vmin.f32 %v4076_v56, 6.0  ;;  %v9548_v56 = vsel %vm4234_vm8, %v4231_v47, %v4233_v11  ;;  %v7762_v11 = vld [vmem:[%s8004_s24 + $0x60] ss:$8 sps:$4 sm:$0xff]  }
 0x51a   : > { %4103 = vmatprep.subr.mxu1 %v4082_v58 }
 0x51b   : > { %4104 = vmatpush1.msra.mxu1 %v4081_v31 }
 0x51c   : > { %7004 = vmatmul.mubr.msk.f32.vlgmr.msra.gmra.mrb[16].mxu1 %vm2467_vm0, %v4083_v27  ;;  %v9554_v27 = vsel %vm2724_vm1, %v4633_v45, %v4635_v2  ;;  %v7767_v2 = vld [vmem:[%s8004_s24 + $0x74] ss:$8 sps:$4 sm:$0xff]  }
 0x51d   : > { %4169 = vmatprep.mubr.f32.mxu1 %v10400_v32 }
 0x520   : > { %7005 = vmatmul.mubr.msk.f32.gmra.mrb[18].mxu1 %vm2467_vm0, %v4084_v17 }
 0x521   : > { %4175 = vmatprep.mubr.f32.mxu1 %v10400_v32 }
 0x524   : > { %7006 = vmatmul.mubr.msk.f32.gmra.mrb[20].mxu1 %vm2467_vm0, %v4085_v44 }
 0x525   : > { %4181 = vmatprep.mubr.f32.mxu1 %v10400_v32 }
 0x528   : > { %7007 = vmatmul.mubr.msk.f32.gmra.mrb[22].mxu1 %vm2467_vm0, %v4086_v43 }
 0x5ef   : > { %v9454_v52 = vpop.f32.mrb[16].mxu1 }
 0x5f0   : > { %4189 = vrot.lane.b32.xlu0 %v9454_v52, %s7935_s28  ;;  %v9457_v59 = vpop.f32.mrb[17].mxu1  ;;  %v4374_v30 = vmul.f32 %v9452_v48, %v9454_v52  ;;  %v4444_v37 = vmul.f32 %v9467_v1, %v9454_v52  ;;  %v4569_v0 = vmul.f32 %v4563_v19, %v9454_v52  ;;  %v4238_v28 = vmul.f32 %v4231_v47, %v9454_v52 }
 0x5f1   : > { %v4639_v29 = vmul.f32 %v4633_v45, %v9454_v52  ;;  %v4296_v41 = vmul.f32 %v4290_v46, %v9454_v52 }
 0x5f3   : > { %v9461_v16 = vpop.f32.mrb[18].mxu1 }
 0x5f4   : > { %4390 = vrot.lane.b32.xlu0 %v4374_v30, %s7936_s11  ;;  %4191 = vrot.lane.b32.xlu1 %v9461_v16, %s7935_s28  ;;  %v9465_v35 = vpop.f32.mrb[19].mxu1  ;;  %v4376_v20 = vmul.f32 %v9452_v48, %v9461_v16  ;;  %v4446_v18 = vmul.f32 %v9467_v1, %v9461_v16  ;;  %v4571_v54 = vmul.f32 %v4563_v19, %v9461_v16 }
 0x5f5   : > { %v4240_v60 = vmul.f32 %v4231_v47, %v9461_v16  ;;  %v4641_v61 = vmul.f32 %v4633_v45, %v9461_v16  ;;  %v4298_v15 = vmul.f32 %v4290_v46, %v9461_v16 }
 0x5f7   : > { %v9471_v62 = vpop.f32.mrb[20].mxu1 }
 0x5f8   : > { %4460 = vrot.lane.b32.xlu0 %v4444_v37, %s10297_s23  ;;  %v9474_v25 = vpop.f32.mrb[21].mxu1  ;;  %v4378_v26 = vmul.f32 %v9452_v48, %v9471_v62  ;;  %v4448_v53 = vmul.f32 %v9467_v1, %v9471_v62  ;;  %v4573_v42 = vmul.f32 %v4563_v19, %v9471_v62  ;;  %v4643_v7 = vmul.f32 %v4633_v45, %v9471_v62 }
 0x5f9   : > { %v4242_v10 = vmul.f32 %v4231_v47, %v9471_v62  ;;  %v4300_v9 = vmul.f32 %v4290_v46, %v9471_v62 }
 0x5fb   : > { %v9478_v6 = vpop.f32.mrb[22].mxu1 }
 0x5fc   : > { %4394 = vrot.lane.b32.xlu0 %v4376_v20, %s7936_s11  ;;  %4195 = vrot.lane.b32.xlu1 %v9478_v6, %s7935_s28  ;;  %v9482_v23 = vpop.f32.mrb[23].mxu1  ;;  %v4380_v24 = vmul.f32 %v9452_v48, %v9478_v6  ;;  %v4450_v57 = vmul.f32 %v9467_v1, %v9478_v6  ;;  %v4575_v3 = vmul.f32 %v4563_v19, %v9478_v6 }
 0x5fd   : > { %v4645_v4 = vmul.f32 %v4633_v45, %v9478_v6 }
 0x600   : > { %4193 = vrot.lane.b32.xlu0 %v9471_v62, %s7935_s28  ;;  %s10402_s28 = sld [smem:[#allocation9_spill]] }
 0x604   : > { %4464 = vrot.lane.b32.xlu0 %v4446_v18, %s10297_s23  ;;  %v4293_v18 = vsel %vm2724_vm1, %v4290_v46, %v4292_v40  ;;  %v7752_v46 = vld [vmem:[%s8004_s24 + $0x24] ss:$8 sps:$4 sm:$0xff]  }
 0x608   : > { %4585 = vrot.lane.b32.xlu0 %v4569_v0, %s7936_s11 }
 0x60c   : > { %4589 = vrot.lane.b32.xlu0 %v4571_v54, %s7936_s11 }
 0x610   : > { %4250 = vrot.lane.b32.xlu0 %v4238_v28, %s7936_s11  ;;  %v7744_v28 = vld [vmem:[%s8004_s24] ss:$8 sps:$4 sm:$0xff]  }
 0x614   : > { %4254 = vrot.lane.b32.xlu0 %v4240_v60, %s7936_s11  ;;  %v7746_v60 = vld [vmem:[%s8004_s24 + $0x4] ss:$8 sps:$4 sm:$0xff]  }
 0x615   : > { %4922 = vmatprep.subr.bf16.mxu1 %v7746_v60 }
 0x616   : > { %4923 = vmatpush1.bf16.msra.mxu1 %v7744_v28 }
 0x618   : > { %4655 = vrot.lane.b32.xlu0 %v4639_v29, %s10297_s23  ;;  %v7749_v29 = vld [vmem:[%s8004_s24 + $0x14] ss:$8 sps:$4 sm:$0xff]  }
 0x619   : > { %4924 = vmatprep.subr.bf16.mxu1 %v7749_v29  ;;  %v4201_v29 = vld [vmem:[%s7994_s14] ss:$8 sm:$0x3] }
 0x61c   : > { %4659 = vrot.lane.b32.xlu0 %v4641_v61, %s10297_s23  ;;  %v7747_v61 = vld [vmem:[%s8004_s24 + $0x10] ss:$8 sps:$4 sm:$0xff]  }
 0x61d   : > { %4925 = vmatpush1.bf16.msra.mxu1 %v7747_v61 }
 0x61e   : > { %4926 = vmatprep.subr.bf16.mxu1 %v7752_v46 }
 0x620   : > { %4308 = vrot.lane.b32.xlu0 %v4296_v41, %s10297_s23 }
 0x624   : > { %4312 = vrot.lane.b32.xlu0 %v4298_v15, %s10297_s23  ;;  %v7750_v15 = vld [vmem:[%s8004_s24 + $0x20] ss:$8 sps:$4 sm:$0xff]  }
 0x625   : > { %4927 = vmatpush1.bf16.msra.mxu1 %v7750_v15 }
 0x628   : > { %4398 = vrot.lane.b32.xlu0 %v4378_v26, %s7936_s11 }
 0x62c   : > { %4468 = vrot.lane.b32.xlu0 %v4448_v53, %s10297_s23 }
 0x630   : > { %4593 = vrot.lane.b32.xlu0 %v4573_v42, %s7936_s11 }
 0x634   : > { %4663 = vrot.lane.b32.xlu0 %v4643_v7, %s10297_s23  ;;  %v7753_v7 = vld [vmem:[%s8004_s24 + $0x30] ss:$8 sps:$4 sm:$0xff]  }
 0x638   : > { %4258 = vrot.lane.b32.xlu0 %v4242_v10, %s7936_s11  ;;  %v7755_v10 = vld [vmem:[%s8004_s24 + $0x34] ss:$8 sps:$4 sm:$0xff]  }
 0x639   : > { %4928 = vmatprep.subr.bf16.mxu1 %v7755_v10 }
 0x63a   : > { %4929 = vmatpush1.bf16.msra.mxu1 %v7753_v7 }
 0x63c   : > { %4402 = vrot.lane.b32.xlu0 %v4380_v24, %s7936_s11  ;;  %v7758_v24 = vld [vmem:[%s8004_s24 + $0x44] ss:$8 sps:$4 sm:$0xff]  }
 0x63d   : > { %4930 = vmatprep.subr.bf16.mxu1 %v7758_v24 }
 0x63e   : > { %4931 = vmatpush1.bf16.msra.mxu1 %v7756_v33 }
 0x640   : > { %4472 = vrot.lane.b32.xlu0 %v4450_v57, %s10297_s23 }
 0x644   : > { %4597 = vrot.lane.b32.xlu0 %v4575_v3, %s7936_s11  ;;  %v7761_v3 = vld [vmem:[%s8004_s24 + $0x54] ss:$8 sps:$4 sm:$0xff]  }
 0x645   : > { %4932 = vmatprep.subr.bf16.mxu1 %v7761_v3 }
 0x648   : > { %4667 = vrot.lane.b32.xlu0 %v4645_v4, %s10297_s23  ;;  %v7759_v4 = vld [vmem:[%s8004_s24 + $0x50] ss:$8 sps:$4 sm:$0xff]  }
 0x649   : > { %4933 = vmatpush1.bf16.msra.mxu1 %v7759_v4  ;;  %v7013_v4 = vld [vmem:[%s7994_s14 + $0x6] ss:$8 sm:$0x3] }
 0x64c   : > { %4316 = vrot.lane.b32.xlu0 %v4300_v9, %s10297_s23  ;;  %v7764_v9 = vld [vmem:[%s8004_s24 + $0x64] ss:$8 sps:$4 sm:$0xff]  }
 0x64d   : > { %4934 = vmatprep.subr.bf16.mxu1 %v7764_v9 }
 0x64e   : > { %4935 = vmatpush1.bf16.msra.mxu1 %v7762_v11 }
 0x64f   : > { %4936 = vmatprep.subr.bf16.mxu1 %v7767_v2 }
 0x662   : > { %v4190_v5 = vpop.permute.xlu0 %4189 }
 0x663   : > { %v4197_v12 = vsel %vm4188_vm9, %v4190_v5, %v9457_v59  ;;  %v7765_v5 = vld [vmem:[%s8004_s24 + $0x70] ss:$8 sps:$4 sm:$0xff]  }
 0x664   : > { %v4375_v38 = vmul.f32 %v9529_v50, %v4197_v12  ;;  %v4445_v34 = vmul.f32 %v9539_v49, %v4197_v12  ;;  %v4570_v63 = vmul.f32 %v9545_v14, %v4197_v12  ;;  %v4239_v44 = vmul.f32 %v9548_v56, %v4197_v12  ;;  %4937 = vmatpush1.bf16.msra.mxu1 %v7765_v5 }
 0x665   : > { %v4640_v19 = vmul.f32 %v9554_v27, %v4197_v12  ;;  %v4297_v54 = vmul.f32 %v4293_v18, %v4197_v12  ;;  %v7768_v12 = vld [vmem:[%s8004_s24 + $0x80] ss:$8 sps:$4 sm:$0xff]  }
 0x666   : > { %v9534_v22 = vpop.permute.xlu0 %4390  ;;  %4392 = vrot.lane.b32.xlu1 %v4375_v38, %s7936_s11  ;;  %v4192_v39 = vpop.permute.xlu1 %4191  ;;  %v7770_v38 = vld [vmem:[%s8004_s24 + $0x84] ss:$8 sps:$4 sm:$0xff]  }
 0x667   : > { %v4198_v47 = vsel %vm4188_vm9, %v4192_v39, %v9465_v35  ;;  %4938 = vmatprep.subr.bf16.mxu1 %v7770_v38  ;;  %v7771_v39 = vld [vmem:[%s8004_s24 + $0x90] ss:$8 sps:$4 sm:$0xff]  }
 0x668   : > { %v4377_v45 = vmul.f32 %v9529_v50, %v4198_v47  ;;  %v4447_v41 = vmul.f32 %v9539_v49, %v4198_v47  ;;  %v4572_v26 = vmul.f32 %v9545_v14, %v4198_v47  ;;  %v4241_v53 = vmul.f32 %v9548_v56, %v4198_v47  ;;  %4939 = vmatpush1.bf16.msra.mxu1 %v7768_v12 }
 0x669   : > { %v4642_v42 = vmul.f32 %v9554_v27, %v4198_v47  ;;  %v4299_v57 = vmul.f32 %v4293_v18, %v4198_v47  ;;  %v7010_v47 = vld [vmem:[%s7994_s14 + $0x3] ss:$8 sm:$0x3] }
 0x66a   : > { %v9542_v8 = vpop.permute.xlu0 %4460  ;;  %4462 = vrot.lane.b32.xlu1 %v4445_v34, %s10297_s23  ;;  %v9656_v60 = vrot.slane %v7010_v47, %v10365_v21 }
 0x66c   : > { %v4348_v15 = vmul.f32 %v9656_v60, %v9454_v52  ;;  %v4350_v33 = vmul.f32 %v9656_v60, %v9461_v16 }
 0x66e   : > { %v9550_v58 = vpop.permute.xlu0 %4394  ;;  %4587 = vrot.lane.b32.xlu1 %v4570_v63, %s7936_s11  ;;  %v4196_v31 = vpop.permute.xlu1 %4195  ;;  %v7774_v63 = vld [vmem:[%s8004_s24 + $0xa0] ss:$8 sps:$4 sm:$0xff]  }
 0x66f   : > { %v4200_v17 = vsel %vm4188_vm9, %v4196_v31, %v9482_v23  ;;  %v7779_v31 = vld [vmem:[%s8004_s24 + $0xb4] ss:$8 sps:$4 sm:$0xff]  }
 0x670   : > { %v9560_v43 = vmul.f32 %v9529_v50, %v4200_v17  ;;  %v9563_v48 = vmul.f32 %v9539_v49, %v4200_v17  ;;  %v9566_v30 = vmul.f32 %v9545_v14, %v4200_v17  ;;  %v9569_v1 = vmul.f32 %v9554_v27, %v4200_v17 }
 0x672   : > { %v4194_v37 = vpop.permute.xlu0 %4193  ;;  %4252 = vrot.lane.b32.xlu1 %v4239_v44, %s7936_s11 }
 0x673   : > { %v9574_v20 = vsel %vm4188_vm9, %v4194_v37, %v9474_v25 }
 0x674   : > { %v9579_v0 = vmul.f32 %v4293_v18, %v9574_v20  ;;  %v4379_v13 = vmul.f32 %v9529_v50, %v9574_v20  ;;  %v4449_v51 = vmul.f32 %v9539_v49, %v9574_v20  ;;  %v4574_v40 = vmul.f32 %v9545_v14, %v9574_v20  ;;  %v7773_v49 = vld [vmem:[%s8004_s24 + $0x94] ss:$8 sps:$4 sm:$0xff]   ;;  %v7776_v14 = vld [vmem:[%s8004_s24 + $0xa4] ss:$8 sps:$4 sm:$0xff]  }
 0x675   : > { %v4644_v50 = vmul.f32 %v9554_v27, %v9574_v20  ;;  %v4243_v34 = vmul.f32 %v9548_v56, %v9574_v20  ;;  %4940 = vmatprep.subr.bf16.mxu1 %v7773_v49  ;;  %v7777_v27 = vld [vmem:[%s8004_s24 + $0xb0] ss:$8 sps:$4 sm:$0xff]  }
 0x676   : > { %4657 = vrot.lane.b32.xlu1 %v4640_v19, %s10297_s23  ;;  %4941 = vmatpush1.bf16.msra.mxu1 %v7771_v39  ;;  %v4465_v56 = vpop.permute.xlu0 %4464 }
 0x677   : > { %4942 = vmatprep.subr.bf16.mxu1 %v7776_v14 }
 0x67a   : > { %4310 = vrot.lane.b32.xlu1 %v4297_v54, %s10297_s23  ;;  %4943 = vmatpush1.bf16.msra.mxu1 %v7774_v63  ;;  %v4586_v17 = vpop.permute.xlu0 %4585 }
 0x67b   : > { %4944 = vmatprep.subr.bf16.mxu1 %v7779_v31  ;;  %v9698_v31 = vrot.slane %v7013_v4, %v10365_v21 }
 0x67e   : > { %4396 = vrot.lane.b32.xlu1 %v4377_v45, %s7936_s11  ;;  %4945 = vmatpush1.bf16.msra.mxu1 %v7777_v27  ;;  %v9645_v44 = vpop.permute.xlu0 %4589 }
 0x682   : > { %4466 = vrot.lane.b32.xlu1 %v4447_v41, %s10297_s23 }
 0x686   : > { %4591 = vrot.lane.b32.xlu1 %v4572_v26, %s7936_s11  ;;  %v9668_v26 = vrot.slane %v4201_v29, %v10365_v21 }
 0x68a   : > { %4256 = vrot.lane.b32.xlu1 %v4241_v53, %s7936_s11  ;;  %v9671_v53 = vrot.slane %v4201_v29, %v10367_v36 }
 0x68e   : > { %4661 = vrot.lane.b32.xlu1 %v4642_v42, %s10297_s23 }
 0x692   : > { %4314 = vrot.lane.b32.xlu1 %v4299_v57, %s10297_s23 }
 0x696   : > { %4400 = vrot.lane.b32.xlu1 %v4379_v13, %s7936_s11 }
 0x69a   : > { %4470 = vrot.lane.b32.xlu1 %v4449_v51, %s10297_s23  ;;  %v4214_v51 = vmul.f32 %v9671_v53, %v9457_v59 }
 0x69e   : > { %4595 = vrot.lane.b32.xlu1 %v4574_v40, %s7936_s11  ;;  %v4213_v40 = vmul.f32 %v9668_v26, %v9454_v52 }
 0x6a2   : > { %4665 = vrot.lane.b32.xlu1 %v4644_v50, %s10297_s23 }
 0x6a6   : > { %4260 = vrot.lane.b32.xlu1 %v4243_v34, %s7936_s11  ;;  %v9694_v34 = vrot.slane %v7013_v4, %v10367_v36 }
 0x6a8   : > { %v4544_v29 = vmul.f32 %v9694_v34, %v9457_v59 }
 0x6aa   : > { %4404 = vrot.lane.b32.xlu1 %v9560_v43, %s7936_s11  ;;  %v4251_v43 = vpop.permute.xlu0 %4250 }
 0x6ae   : > { %4474 = vrot.lane.b32.xlu1 %v9563_v48, %s10297_s23  ;;  %v9647_v37 = vpop.permute.xlu0 %4254 }
 0x6b2   : > { %4599 = vrot.lane.b32.xlu1 %v9566_v30, %s7936_s11  ;;  %v4656_v18 = vpop.permute.xlu0 %4655  ;;  %s10401_s11 = smov 32  }
 0x6b6   : > { %4669 = vrot.lane.b32.xlu1 %v9569_v1, %s10297_s23  ;;  %v9649_v54 = vpop.permute.xlu0 %4659 }
 0x6ba   : > { %4318 = vrot.lane.b32.xlu1 %v9579_v0, %s10297_s23  ;;  %v4309_v28 = vpop.permute.xlu0 %4308  ;;  %v9653_v0 = vrot.slane %v7010_v47, %v10367_v36  ;;  %s10403_s23 = smov 96  }
 0x6bc   : > { %v4349_v61 = vmul.f32 %v9653_v0, %v9457_v59  ;;  %v4351_v24 = vmul.f32 %v9653_v0, %v9465_v35  ;;  %v4545_v59 = vmul.f32 %v9698_v31, %v9461_v16 }
 0x6be   : > { %v9663_v41 = vpop.permute.xlu0 %4312 }
 0x6c2   : > { %v4399_v50 = vpop.permute.xlu0 %4398 }
 0x6d8   : > { %v4393_v48 = vpop.permute.xlu1 %4392 }
 0x6d9   : > { %v4406_v46 = vsel %vm4262_vm10, %v9534_v22, %v4393_v48  ;;  %v4419_v7 = vadd.f32 %v4393_v48, %v4349_v61 }
 0x6da   : > { %v4418_v57 = vadd.f32 %v4406_v46, %v4348_v15  ;;  %v4543_v15 = vmul.f32 %v9698_v31, %v9454_v52 }
 0x6dc   : > { %v4463_v20 = vpop.permute.xlu1 %4462 }
 0x6dd   : > { %v4476_v10 = vsel %vm2780_vm4, %v9542_v8, %v4463_v20  ;;  %v4489_v3 = vadd.f32 %v4463_v20, %v4419_v7 }
 0x6de   : > { %v4488_v9 = vadd.f32 %v4476_v10, %v4418_v57 }
 0x6df   : > { %v4507_v39 = vrot.slane %v4489_v3, 1 }
 0x6e0   : > { %v4588_v19 = vpop.permute.xlu1 %4587  ;;  %v4504_v27 = vrot.slane %v4488_v9, 1 }
 0x6e1   : > { %v4601_v61 = vsel %vm4262_vm10, %v4586_v17, %v4588_v19  ;;  %v4614_v7 = vadd.f32 %v4588_v19, %v4544_v29 }
 0x6e2   : > { %v4613_v57 = vadd.f32 %v4601_v61, %v4543_v15 }
 0x6e4   : > { %v4253_v30 = vpop.permute.xlu1 %4252 }
 0x6e5   : > { %v4263_v11 = vsel %vm4262_vm10, %v4251_v43, %v4253_v30  ;;  %v4273_v12 = vadd.f32 %v4253_v30, %v4214_v51 }
 0x6e6   : > { %v4272_v14 = vadd.f32 %v4263_v11, %v4213_v40 }
 0x6e8   : > { %v4658_v1 = vpop.permute.xlu1 %4657 }
 0x6e9   : > { %v4671_v10 = vsel %vm2780_vm4, %v4656_v18, %v4658_v1  ;;  %v4684_v17 = vadd.f32 %v4658_v1, %v4614_v7 }
 0x6ea   : > { %v4683_v3 = vadd.f32 %v4671_v10, %v4613_v57 }
 0x6eb   : > { %v4702_v51 = vrot.slane %v4684_v17, 2 }
 0x6ec   : > { %v4311_v45 = vpop.permute.xlu1 %4310 }
 0x6ed   : > { %v4320_v38 = vsel %vm2780_vm4, %v4309_v28, %v4311_v45 }
 0x6ee   : > { %v4329_v20 = vadd.f32 %v4320_v38, %v4272_v14  ;;  %v4353_v14 = vmul.f32 %v9653_v0, %v9474_v25 }
 0x6f0   : > { %v4397_v42 = vpop.permute.xlu1 %4396 }
 0x6f1   : > { %v4407_v22 = vsel %vm4262_vm10, %v9550_v58, %v4397_v42  ;;  %v4421_v13 = vadd.f32 %v4397_v42, %v4351_v24  ;;  %v4546_v24 = vmul.f32 %v9694_v34, %v9465_v35 }
 0x6f2   : > { %v4420_v8 = vadd.f32 %v4407_v22, %v4350_v33 }
 0x6f4   : > { %v4467_v2 = vpop.permute.xlu1 %4466 }
 0x6f5   : > { %v4477_v58 = vsel %vm2780_vm4, %v4465_v56, %v4467_v2  ;;  %v9688_v5 = vadd.f32 %v4467_v2, %v4421_v13  ;;  %v4330_v56 = vadd.f32 %v4311_v45, %v4273_v12  ;;  %v4469_v45 = vpop.permute.xlu0 %4468 }
 0x6f6   : > { %v9691_v49 = vadd.f32 %v4477_v58, %v4420_v8  ;;  %v4699_v8 = vrot.slane %v4683_v3, 2 }
 0x6f7   : > { %v4508_v63 = vrot.slane %v9688_v5, 1 }
 0x6f8   : > { %v4505_v43 = vrot.slane %v9691_v49, 1  ;;  %v4592_v48 = vpop.permute.xlu1 %4591 }
 0x6f9   : > { %v4509_v30 = vsel %vm3229_vm7, %v4507_v39, %v4508_v63  ;;  %v4602_v22 = vsel %vm4262_vm10, %v9645_v44, %v4592_v48  ;;  %v4616_v33 = vadd.f32 %v4592_v48, %v4546_v24  ;;  %v4594_v18 = vpop.permute.xlu0 %4593  ;;  %v4216_v48 = vmul.f32 %v9671_v53, %v9465_v35 }
 0x6fa   : > { %v4506_v47 = vsel %vm3229_vm7, %v4504_v27, %v4505_v43  ;;  %v4525_v28 = vadd.f32 %v4509_v30, %v4330_v56  ;;  %v4615_v13 = vadd.f32 %v4602_v22, %v4545_v59  ;;  %v4352_v27 = vmul.f32 %v9656_v60, %v9471_v62 }
 0x6fb   : > { %v4524_v46 = vadd.f32 %v4506_v47, %v4329_v20 }
 0x6fc   : > { %v4257_v42 = vpop.permute.xlu1 %4256 }
 0x6fd   : > { %v4664_v38 = vpop.permute.xlu0 %4663  ;;  %v4264_v20 = vsel %vm4262_vm10, %v9647_v37, %v4257_v42 }
 0x700   : > { %v4662_v4 = vpop.permute.xlu1 %4661 }
 0x701   : > { %v4672_v52 = vsel %vm2780_vm4, %v9649_v54, %v4662_v4  ;;  %v4686_v19 = vadd.f32 %v4662_v4, %v4616_v33  ;;  %v4547_v33 = vmul.f32 %v9698_v31, %v9471_v62 }
 0x702   : > { %v4685_v9 = vadd.f32 %v4672_v52, %v4615_v13 }
 0x703   : > { %v4703_v11 = vrot.slane %v4686_v19, 2 }
 0x704   : > { %v4700_v2 = vrot.slane %v4685_v9, 2  ;;  %v4315_v44 = vpop.permute.xlu1 %4314 }
 0x705   : > { %v4704_v40 = vsel %vm3579_vm6, %v4702_v51, %v4703_v11  ;;  %v4321_v15 = vsel %vm2780_vm4, %v9663_v41, %v4315_v44  ;;  %v4548_v41 = vmul.f32 %v9694_v34, %v9474_v25 }
 0x706   : > { %v4701_v58 = vsel %vm3579_vm6, %v4699_v8, %v4700_v2  ;;  %v4720_v1 = vadd.f32 %v4704_v40, %v4525_v28  ;;  %v4215_v28 = vmul.f32 %v9668_v26, %v9461_v16  ;;  %v4725_v16 = vld [vmem:[%s7999_s19] sm:$0x3] }
 0x707   : > { %v4719_v12 = vadd.f32 %v4701_v58, %v4524_v46  ;;  %v4275_v46 = vadd.f32 %v4257_v42, %v4216_v48  ;;  %v9765_v19 = vrot.slane %v4725_v16, %v10365_v21 }
 0x708   : > { %v4401_v39 = vpop.permute.xlu1 %4400  ;;  %v4274_v7 = vadd.f32 %v4264_v20, %v4215_v28  ;;  %v4355_v20 = vmul.f32 %v9653_v0, %v9482_v23 }
 0x709   : > { %v4408_v54 = vsel %vm4262_vm10, %v4399_v50, %v4401_v39  ;;  %v4423_v56 = vadd.f32 %v4401_v39, %v4353_v14  ;;  %v9737_v50 = vpop.permute.xlu0 %4258  ;;  %v4332_v10 = vadd.f32 %v4315_v44, %v4275_v46  ;;  %v4737_v40 = vadd.f32 %v9765_v19, %v4719_v12 }
 0x70a   : > { %v4422_v30 = vadd.f32 %v4408_v54, %v4352_v27  ;;  %v4331_v57 = vadd.f32 %v4321_v15, %v4274_v7 }
 0x70c   : > { %v4471_v47 = vpop.permute.xlu1 %4470 }
 0x70d   : > { %v4478_v29 = vsel %vm2780_vm4, %v4469_v45, %v4471_v47  ;;  %v9735_v61 = vadd.f32 %v4471_v47, %v4423_v56  ;;  %v4403_v5 = vpop.permute.xlu0 %4402 }
 0x70e   : > { %v9741_v35 = vadd.f32 %v4478_v29, %v4422_v30  ;;  %v4743_v30 = vmax.f32 %v4737_v40, 0.0  ;;  %v4217_v40 = vmul.f32 %v9668_v26, %v9471_v62 }
 0x70f   : > { %v4512_v37 = vrot.slane %v9735_v61, 1 }
 0x710   : > { %v4510_v24 = vrot.slane %v9741_v35, 1  ;;  %v4596_v22 = vpop.permute.xlu1 %4595 }
 0x711   : > { %v4513_v45 = vsel %vm3229_vm7, %v4508_v63, %v4512_v37  ;;  %v4603_v42 = vsel %vm4262_vm10, %v4594_v18, %v4596_v22  ;;  %v4618_v13 = vadd.f32 %v4596_v22, %v4548_v41  ;;  %v9762_v63 = vrot.slane %v4725_v16, %v10367_v36  ;;  %v4473_v39 = vpop.permute.xlu0 %4472 }
 0x712   : > { %v4511_v59 = vsel %vm3229_vm7, %v4505_v43, %v4510_v24  ;;  %v4527_v17 = vadd.f32 %v4513_v45, %v4332_v10  ;;  %v4617_v4 = vadd.f32 %v4603_v42, %v4547_v33  ;;  %v4749_v22 = vmin.f32 %v4743_v30, 6.0 }
 0x713   : > { %v4526_v3 = vadd.f32 %v4511_v59, %v4331_v57  ;;  %v4738_v44 = vadd.f32 %v9762_v63, %v4720_v1  ;;  %v4550_v33 = vmul.f32 %v9694_v34, %v9482_v23  ;;  %v4218_v23 = vmul.f32 %v9671_v53, %v9474_v25 }
 0x714   : > { %v4666_v52 = vpop.permute.xlu1 %4665 }
 0x715   : > { %v4673_v18 = vsel %vm2780_vm4, %v4664_v38, %v4666_v52  ;;  %v9768_v49 = vadd.f32 %v4666_v52, %v4618_v13  ;;  %v4744_v48 = vmax.f32 %v4738_v44, 0.0  ;;  %v4598_v29 = vpop.permute.xlu0 %4597 }
 0x716   : > { %v9770_v43 = vadd.f32 %v4673_v18, %v4617_v4  ;;  %v4549_v4 = vmul.f32 %v9698_v31, %v9478_v6 }
 0x717   : > { %v4707_v9 = vrot.slane %v9768_v49, 2  ;;  %v4750_v7 = vmin.f32 %v4744_v48, 6.0 }
 0x718   : > { %v4705_v51 = vrot.slane %v9770_v43, 2  ;;  %v4261_v8 = vpop.permute.xlu1 %4260 }
 0x719   : > { %v4708_v58 = vsel %vm3579_vm6, %v4703_v11, %v4707_v9  ;;  %v4354_v11 = vmul.f32 %v9656_v60, %v9478_v6  ;;  %v4265_v34 = vsel %vm4262_vm10, %v9737_v50, %v4261_v8  ;;  %v4277_v31 = vadd.f32 %v4261_v8, %v4218_v23 }
 0x71a   : > { %v4706_v38 = vsel %vm3579_vm6, %v4700_v2, %v4705_v51  ;;  %v4722_v14 = vadd.f32 %v4708_v58, %v4527_v17 }
 0x71b   : > { %v4721_v54 = vadd.f32 %v4706_v38, %v4526_v3 }
 0x71c   : > { %v4740_v27 = vadd.f32 %v9762_v63, %v4722_v14  ;;  %v4405_v56 = vpop.permute.xlu1 %4404 }
 0x71d   : > { %v4739_v1 = vadd.f32 %v9765_v19, %v4721_v54  ;;  %v4409_v12 = vsel %vm4262_vm10, %v4403_v5, %v4405_v56  ;;  %v4425_v2 = vadd.f32 %v4405_v56, %v4355_v20  ;;  %v4668_v5 = vpop.permute.xlu0 %4667 }
 0x71e   : > { %v4746_v47 = vmax.f32 %v4740_v27, 0.0  ;;  %v4424_v46 = vadd.f32 %v4409_v12, %v4354_v11  ;;  %v7048_v11 = vld [vmem:[%s10329_s12 + $0x5] ss:$8 sm:$0x3] }
 0x71f   : > { %v4745_v28 = vmax.f32 %v4739_v1, 0.0 }
 0x720   : > { %v4475_v15 = vpop.permute.xlu1 %4474  ;;  %v4752_v10 = vmin.f32 %v4746_v47, 6.0 }
 0x721   : > { %v4751_v16 = vmin.f32 %v4745_v28, 6.0  ;;  %v4479_v0 = vsel %vm2780_vm4, %v4473_v39, %v4475_v15  ;;  %v4495_v57 = vadd.f32 %v4475_v15, %v4425_v2  ;;  %v4317_v58 = vpop.permute.xlu0 %4316  ;;  %v5252_v28 = vrot.slane %v7048_v11, %v10367_v36  ;;  %v7050_v2 = vld [vmem:[%s10329_s12 + $0x7] ss:$8 sm:$0x3] }
 0x722   : > { %v4494_v45 = vadd.f32 %v4479_v0, %v4424_v46  ;;  %v4756_v41 = vpack.c.bf16 %v4752_v10, %v4750_v7  ;;  %v5331_v46 = vrot.slane %v7050_v2, %v10367_v36  ;;  %v7044_v15 = vld [vmem:[%s10329_s12 + $0x1] ss:$8 sm:$0x3] }
 0x723   : > { %v4516_v42 = vrot.slane %v4495_v57, 1  ;;  %v4755_v59 = vpack.c.bf16 %v4751_v16, %v4749_v22  ;;  %v5099_v7 = vrot.slane %v7044_v15, %v10365_v21  ;;  %v4783_v10 = vld [vmem:[%s8009_s30] sm:$0x3] }
 0x724   : > { %v4514_v17 = vrot.slane %v4494_v45, 1  ;;  %7040 = vmatprep.mubr.msk.bf16.mxu1 %vm4915_vm11, %v4756_v41  ;;  %v4600_v60 = vpop.permute.xlu1 %4599  ;;  %v4788_v22 = vrot.slane %v4783_v10, %v10365_v21  ;;  %v4792_v16 = vrot.slane %v4783_v10, %v10367_v36  ;;  %v7782_v10 = vld [vmem:[%s10405_s3 + $0x4] ss:$8 sps:$4 sm:$0xff]  }
 0x725   : > { %v4604_v3 = vsel %vm4262_vm10, %v4598_v29, %v4600_v60  ;;  %4955 = vmatmul.mubr.bf16.vlgmr.msra.gmra.mrb[24].mxu1 %v4755_v59  ;;  %v4517_v13 = vsel %vm3229_vm7, %v4512_v37, %v4516_v42  ;;  %v4620_v18 = vadd.f32 %v4600_v60, %v4550_v33  ;;  %v5327_v29 = vrot.slane %v7050_v2, %v10365_v21 }
 0x726   : > { %v4515_v52 = vsel %vm3229_vm7, %v4510_v24, %v4514_v17  ;;  %v4619_v49 = vadd.f32 %v4604_v3, %v4549_v4  ;;  %v4276_v24 = vadd.f32 %v4265_v34, %v4217_v40 }
 0x728   : > { %v4670_v44 = vpop.permute.xlu1 %4669 }
 0x729   : > { %v4674_v61 = vsel %vm2780_vm4, %v4668_v5, %v4670_v44  ;;  %v4690_v37 = vadd.f32 %v4670_v44, %v4620_v18 }
 0x72a   : > { %v4689_v6 = vadd.f32 %v4674_v61, %v4619_v49 }
 0x72b   : > { %v4711_v35 = vrot.slane %v4690_v37, 2 }
 0x72c   : > { %v4709_v39 = vrot.slane %v4689_v6, 2  ;;  %v4319_v38 = vpop.permute.xlu1 %4318 }
 0x72d   : > { %v4712_v14 = vsel %vm3579_vm6, %v4707_v9, %v4711_v35  ;;  %v4322_v25 = vsel %vm2780_vm4, %v4317_v58, %v4319_v38  ;;  %v4334_v53 = vadd.f32 %v4319_v38, %v4277_v31  ;;  %v4985_v38 = vld [vmem:[%s10402_s28] sm:$0xff] }
 0x72e   : > { %v4710_v50 = vsel %vm3579_vm6, %v4705_v51, %v4709_v39  ;;  %v4333_v54 = vadd.f32 %v4322_v25, %v4276_v24  ;;  %v7047_v51 = vld [vmem:[%s10329_s12 + $0x4] ss:$8 sm:$0x3]  ;;  %v5103_v25 = vrot.slane %v7044_v15, %v10367_v36 }
 0x72f   : > { %v4529_v27 = vadd.f32 %v4517_v13, %v4334_v53  ;;  %v5204_v47 = vrot.slane %v7047_v51, %v10365_v21  ;;  %v7051_v53 = vld [vmem:[%s10329_s12 + $0x10] ss:$8 sm:$0x3] }
 0x730   : > { %v4528_v62 = vadd.f32 %v4515_v52, %v4333_v54 }
 0x731   : > { %v4724_v26 = vadd.f32 %v4712_v14, %v4529_v27  ;;  %5209 = vrot.lane.b32.xlu0 %v5204_v47, %s10299_s1  ;;  %v4986_v14 = vld [vmem:[%s10402_s28 + $0x8] sm:$0x3f]  ;;  %v5371_v27 = vrot.slane %v7051_v53, %v10365_v21 }
 0x732   : > { %v4723_v8 = vadd.f32 %v4710_v50, %v4528_v62 }
 0x733   : > { %v4742_v56 = vadd.f32 %v9762_v63, %v4724_v26  ;;  %v5208_v63 = vrot.slane %v7047_v51, %v10367_v36  ;;  %v7045_v26 = vld [vmem:[%s10329_s12 + $0x2] ss:$8 sm:$0x3] }
 0x734   : > { %v4741_v48 = vadd.f32 %v9765_v19, %v4723_v8  ;;  %v5248_v19 = vrot.slane %v7048_v11, %v10365_v21 }
 0x735   : > { %v4748_v20 = vmax.f32 %v4742_v56, 0.0  ;;  %5211 = vrot.lane.b32.xlu1 %v5208_v63, %s10299_s1  ;;  %v5143_v56 = vrot.slane %v7045_v26, %v10365_v21 }
 0x736   : > { %v4747_v9 = vmax.f32 %v4741_v48, 0.0  ;;  %5253 = vrot.lane.b32.xlu0 %v5248_v19, %s10401_s11  ;;  %v5375_v48 = vrot.slane %v7051_v53, %v10367_v36 }
 0x737   : > { %v4754_v30 = vmin.f32 %v4748_v20, 6.0 }
 0x738   : > { %v4753_v1 = vmin.f32 %v4747_v9, 6.0 }
 0x739   : > { %v4758_v12 = vpack.c.bf16 %v4754_v30, %v4754_v30  ;;  %5255 = vrot.lane.b32.xlu1 %v5252_v28, %s10401_s11  ;;  %v5147_v30 = vrot.slane %v7045_v26, %v10367_v36 }
 0x73a   : > { %v4757_v43 = vpack.c.bf16 %v4753_v1, %v4753_v1  ;;  %5332 = vrot.lane.b32.xlu0 %v5327_v29, %s10299_s1 }
 0x73b   : > { %7041 = vmatprep.mubr.msk.bf16.mxu1 %vm4915_vm11, %v4758_v12 }
 0x73c   : > { %4965 = vmatmul.mubr.bf16.gmra.mrb[28].mxu1 %v4757_v43 }
 0x73d   : > { %5057 = vmatprep.mubr.f32.mxu1 %v10400_v32  ;;  %5334 = vrot.lane.b32.xlu1 %v5331_v46, %s10299_s1 }
 0x73e   : > { %5104 = vrot.lane.b32.xlu0 %v5099_v7, %s10299_s1  ;;  %v7780_v7 = vld [vmem:[%s10405_s3] ss:$8 sps:$4 sm:$0xff]  }
 0x741   : > { %5106 = vrot.lane.b32.xlu1 %v5103_v25, %s10299_s1  ;;  %s10404_s1 = smov 112   ;;  %v7797_v25 = vld [vmem:[%s10405_s3 + $0x54] ss:$8 sps:$4 sm:$0xff]  }
 0x7a3   : > { %v5210_v62 = vpop.permute.xlu0 %5209 }
 0x7a7   : > { %v5212_v63 = vpop.permute.xlu1 %5211 }
 0x7a8   : > { %v5254_v9 = vpop.permute.xlu0 %5253  ;;  %v5213_v46 = vsel %vm2724_vm1, %v5210_v62, %v5212_v63  ;;  %v7807_v63 = vld [vmem:[%s10405_s3 + $0x90] ss:$8 sps:$4 sm:$0xff]  }
 0x7ab   : > { %v5256_v19 = vpop.permute.xlu1 %5255 }
 0x7ac   : > { %v9868_v12 = vpop.permute.xlu0 %5332 }
 0x7af   : > { %v5335_v28 = vpop.permute.xlu1 %5334 }
 0x7b0   : > { %v9874_v11 = vpop.permute.xlu0 %5104 }
 0x7b3   : > { %v5107_v29 = vpop.permute.xlu1 %5106 }
 0x7f8   : > { %v4956_v0 = vpop.f32.mrb[24].mxu1 }
 0x7f9   : > { %v4957_v57 = vadd.f32 %v4956_v0, %v4788_v22  ;;  %v4958_v45 = vpop.f32.mrb[25].mxu1 }
 0x7fa   : > { %v4959_v41 = vadd.f32 %v4958_v45, %v4792_v16  ;;  %v4960_v42 = vpop.f32.mrb[26].mxu1 }
 0x7fb   : > { %v4973_v59 = vmax.f32 %v4957_v57, 0.0  ;;  %v4961_v17 = vadd.f32 %v4960_v42, %v4788_v22  ;;  %v4962_v60 = vpop.f32.mrb[27].mxu1  ;;  %v5257_v57 = vsel %vm2835_vm2, %v5254_v9, %v5256_v19  ;;  %v7785_v42 = vld [vmem:[%s10405_s3 + $0x14] ss:$8 sps:$4 sm:$0xff]  }
 0x7fc   : > { %v4974_v33 = vmax.f32 %v4959_v41, 0.0  ;;  %v4963_v3 = vadd.f32 %v4962_v60, %v4792_v16  ;;  %v7783_v41 = vld [vmem:[%s10405_s3 + $0x10] ss:$8 sps:$4 sm:$0xff]   ;;  %v5336_v60 = vsel %vm2724_vm1, %v9868_v12, %v5335_v28  ;;  %v7809_v19 = vld [vmem:[%s10405_s3 + $0x94] ss:$8 sps:$4 sm:$0xff]  }
 0x7fd   : > { %v4975_v13 = vmax.f32 %v4961_v17, 0.0  ;;  %v4979_v4 = vmin.f32 %v4973_v59, 6.0  ;;  %v7812_v28 = vld [vmem:[%s10405_s3 + $0xa4] ss:$8 sps:$4 sm:$0xff]  }
 0x7fe   : > { %v4976_v5 = vmax.f32 %v4963_v3, 0.0  ;;  %v4980_v18 = vmin.f32 %v4974_v33, 6.0 }
 0x7ff   : > { %v4981_v52 = vmin.f32 %v4975_v13, 6.0 }
 0x800   : > { %v4982_v49 = vmin.f32 %v4976_v5, 6.0  ;;  %v7786_v5 = vld [vmem:[%s10405_s3 + $0x20] ss:$8 sps:$4 sm:$0xff]  }
 0x801   : > { %v7214_v44 = vpack.c.bf16 %v4981_v52, %v4979_v4  ;;  %v7788_v4 = vld [vmem:[%s10405_s3 + $0x24] ss:$8 sps:$4 sm:$0xff]   ;;  %v5108_v52 = vsel %vm2724_vm1, %v9874_v11, %v5107_v29  ;;  %v7815_v29 = vld [vmem:[%s10405_s3 + $0xb4] ss:$8 sps:$4 sm:$0xff]  }
 0x802   : > { %v7212_v23 = vpack.c.bf16 %v4982_v49, %v4980_v18  ;;  %v7789_v49 = vld [vmem:[%s10405_s3 + $0x30] ss:$8 sps:$4 sm:$0xff]  }
 0x804   : > { %7213 = vmatprep.subr.bf16.mxu1 %v7212_v23 }
 0x805   : > { %7215 = vmatpush1.bf16.msra.mxu1 %v7214_v44  ;;  %v7791_v44 = vld [vmem:[%s10405_s3 + $0x34] ss:$8 sps:$4 sm:$0xff]  }
 0x80f   : > { %v4966_v34 = vpop.f32.mrb[28].mxu1 }
 0x810   : > { %v4967_v61 = vadd.f32 %v4966_v34, %v4788_v22  ;;  %v4968_v37 = vpop.f32.mrb[29].mxu1 }
 0x811   : > { %v4969_v40 = vadd.f32 %v4968_v37, %v4792_v16  ;;  %v4970_v6 = vpop.f32.mrb[30].mxu1 }
 0x812   : > { %v4977_v31 = vmax.f32 %v4967_v61, 0.0  ;;  %v4971_v35 = vpop.f32.mrb[31].mxu1  ;;  %v7794_v6 = vld [vmem:[%s10405_s3 + $0x44] ss:$8 sps:$4 sm:$0xff]  }
 0x813   : > { %v4978_v58 = vmax.f32 %v4969_v40, 0.0  ;;  %v7792_v40 = vld [vmem:[%s10405_s3 + $0x40] ss:$8 sps:$4 sm:$0xff]  }
 0x814   : > { %v4983_v39 = vmin.f32 %v4977_v31, 6.0 }
 0x815   : > { %v4984_v24 = vmin.f32 %v4978_v58, 6.0 }
 0x817   : > { %4997 = vmatprep.subr.mxu1 %v4984_v24 }
 0x818   : > { %4998 = vmatpush1.msra.mxu1 %v4983_v39 }
 0x819   : > { %7042 = vmatmul.mubr.msk.f32.vlgmr.msra.gmra.mrb[32].mxu1 %vm2467_vm0, %v4985_v38  ;;  %5612 = vmatprep.subr.bf16.mxu1 %v7782_v10 }
 0x81a   : > { %5063 = vmatprep.mubr.f32.mxu1 %v10400_v32  ;;  %5613 = vmatpush1.bf16.msra.mxu1 %v7780_v7 }
 0x81b   : > { %5614 = vmatprep.subr.bf16.mxu1 %v7785_v42 }
 0x81d   : > { %7043 = vmatmul.mubr.msk.f32.gmra.mrb[34].mxu1 %vm2467_vm0, %v4986_v14  ;;  %v7795_v14 = vld [vmem:[%s10405_s3 + $0x50] ss:$8 sps:$4 sm:$0xff]   ;;  %vm5665_vm0 = vcmask 97280  }
 0x81e   : > { %5615 = vmatpush1.bf16.msra.mxu1 %v7783_v41 }
 0x81f   : > { %5616 = vmatprep.subr.bf16.mxu1 %v7788_v4  ;;  %v5077_v4 = vld [vmem:[%s10329_s12] ss:$8 sm:$0x3] }
 0x822   : > { %5617 = vmatpush1.bf16.msra.mxu1 %v7786_v5 }
 0x823   : > { %5618 = vmatprep.subr.bf16.mxu1 %v7791_v44  ;;  %v5082_v44 = vrot.slane %v5077_v4, %v10365_v21 }
 0x826   : > { %5619 = vmatpush1.bf16.msra.mxu1 %v7789_v49 }
 0x827   : > { %5620 = vmatprep.subr.bf16.mxu1 %v7794_v6 }
 0x82a   : > { %5621 = vmatpush1.bf16.msra.mxu1 %v7792_v40 }
 0x82b   : > { %5622 = vmatprep.subr.bf16.mxu1 %v7797_v25 }
 0x82e   : > { %5623 = vmatpush1.bf16.msra.mxu1 %v7795_v14  ;;  %v7049_v14 = vld [vmem:[%s10329_s12 + $0x6] ss:$8 sm:$0x3] }
 0x8ec   : > { %v9845_v50 = vpop.f32.mrb[32].mxu1 }
 0x8ed   : > { %5071 = vrot.lane.b32.xlu0 %v9845_v50, %s10403_s23  ;;  %v9849_v54 = vpop.f32.mrb[33].mxu1  ;;  %v5216_v1 = vmul.f32 %v5210_v62, %v9845_v50  ;;  %v5260_v43 = vmul.f32 %v5254_v9, %v9845_v50  ;;  %v5339_v51 = vmul.f32 %v9868_v12, %v9845_v50  ;;  %v5111_v47 = vmul.f32 %v9874_v11, %v9845_v50 }
 0x8f0   : > { %v9853_v8 = vpop.f32.mrb[34].mxu1 }
 0x8f1   : > { %5376 = vrot.lane.b32.xlu0 %v5371_v27, %s10401_s11  ;;  %5073 = vrot.lane.b32.xlu1 %v9853_v8, %s10403_s23  ;;  %v9860_v20 = vpop.f32.mrb[35].mxu1  ;;  %v5218_v18 = vmul.f32 %v5210_v62, %v9853_v8  ;;  %v5262_v37 = vmul.f32 %v5254_v9, %v9853_v8  ;;  %v5341_v58 = vmul.f32 %v9868_v12, %v9853_v8  ;;  %v7800_v27 = vld [vmem:[%s10405_s3 + $0x64] ss:$8 sps:$4 sm:$0xff]   ;;  %v7798_v62 = vld [vmem:[%s10405_s3 + $0x60] ss:$8 sps:$4 sm:$0xff]  }
 0x8f2   : > { %v5113_v38 = vmul.f32 %v9874_v11, %v9853_v8  ;;  %5624 = vmatprep.subr.bf16.mxu1 %v7800_v27  ;;  %v7801_v9 = vld [vmem:[%s10405_s3 + $0x70] ss:$8 sps:$4 sm:$0xff]   ;;  %v7806_v11 = vld [vmem:[%s10405_s3 + $0x84] ss:$8 sps:$4 sm:$0xff]  }
 0x8f3   : > { %5625 = vmatpush1.bf16.msra.mxu1 %v7798_v62 }
 0x8f5   : > { %5148 = vrot.lane.b32.xlu0 %v5143_v56, %s10401_s11  ;;  %5378 = vrot.lane.b32.xlu1 %v5375_v48, %s10401_s11  ;;  %v7803_v56 = vld [vmem:[%s10405_s3 + $0x74] ss:$8 sps:$4 sm:$0xff]  }
 0x8f6   : > { %5626 = vmatprep.subr.bf16.mxu1 %v7803_v56 }
 0x8f7   : > { %5627 = vmatpush1.bf16.msra.mxu1 %v7801_v9 }
 0x8f8   : > { %5628 = vmatprep.subr.bf16.mxu1 %v7806_v11 }
 0x8f9   : > { %5224 = vrot.lane.b32.xlu0 %v5216_v1, %s10404_s1  ;;  %5150 = vrot.lane.b32.xlu1 %v5147_v30, %s10401_s11 }
 0x8fd   : > { %5268 = vrot.lane.b32.xlu0 %v5260_v43, %s10403_s23 }
 0x901   : > { %5347 = vrot.lane.b32.xlu0 %v5339_v51, %s10404_s1  ;;  %v7804_v51 = vld [vmem:[%s10405_s3 + $0x80] ss:$8 sps:$4 sm:$0xff]  }
 0x902   : > { %5629 = vmatpush1.bf16.msra.mxu1 %v7804_v51 }
 0x903   : > { %5630 = vmatprep.subr.bf16.mxu1 %v7809_v19 }
 0x905   : > { %5119 = vrot.lane.b32.xlu0 %v5111_v47, %s10404_s1 }
 0x906   : > { %5631 = vmatpush1.bf16.msra.mxu1 %v7807_v63  ;;  %v5310_v63 = vrot.slane %v7049_v14, %v10365_v21 }
 0x907   : > { %5632 = vmatprep.subr.bf16.mxu1 %v7812_v28 }
 0x95f   : > { %v5072_v2 = vpop.permute.xlu0 %5071 }
 0x960   : > { %v5075_v15 = vsel %vm5070_vm12, %v5072_v2, %v9849_v54  ;;  %v7810_v2 = vld [vmem:[%s10405_s3 + $0xa0] ss:$8 sps:$4 sm:$0xff]  }
 0x961   : > { %v5217_v22 = vmul.f32 %v5213_v46, %v5075_v15  ;;  %v5261_v59 = vmul.f32 %v5257_v57, %v5075_v15  ;;  %v5340_v13 = vmul.f32 %v5336_v60, %v5075_v15  ;;  %v5112_v23 = vmul.f32 %v5108_v52, %v5075_v15  ;;  %5633 = vmatpush1.bf16.msra.mxu1 %v7810_v2 }
 0x962   : > { %5634 = vmatprep.subr.bf16.mxu1 %v7815_v29 }
 0x963   : > { %v5377_v16 = vpop.permute.xlu0 %5376  ;;  %5226 = vrot.lane.b32.xlu1 %v5217_v22, %s10404_s1  ;;  %v5074_v0 = vpop.permute.xlu1 %5073 }
 0x964   : > { %v5383_v45 = vmul.f32 %v5377_v16, %v9845_v50  ;;  %v5076_v39 = vsel %vm5070_vm12, %v5074_v0, %v9860_v20  ;;  %v5385_v26 = vmul.f32 %v5377_v16, %v9853_v8 }
 0x965   : > { %v5219_v53 = vmul.f32 %v5213_v46, %v5076_v39  ;;  %v5263_v48 = vmul.f32 %v5257_v57, %v5076_v39  ;;  %v5342_v1 = vmul.f32 %v5336_v60, %v5076_v39  ;;  %v5114_v12 = vmul.f32 %v5108_v52, %v5076_v39  ;;  %v7813_v46 = vld [vmem:[%s10405_s3 + $0xb0] ss:$8 sps:$4 sm:$0xff]   ;;  %s10406_s3 = sld [smem:[#allocation11_spill]] }
 0x966   : > { %5391 = vrot.lane.b32.xlu0 %v5383_v45, %s10403_s23  ;;  %5635 = vmatpush1.bf16.msra.mxu1 %v7813_v46 }
 0x967   : > { %v5149_v17 = vpop.permute.xlu0 %5148  ;;  %5270 = vrot.lane.b32.xlu1 %v5261_v59, %s10403_s23  ;;  %v5379_v3 = vpop.permute.xlu1 %5378 }
 0x968   : > { %v5155_v33 = vmul.f32 %v5149_v17, %v9845_v50  ;;  %v5380_v34 = vsel %vm2835_vm2, %v5377_v16, %v5379_v3  ;;  %v5157_v30 = vmul.f32 %v5149_v17, %v9853_v8 }
 0x969   : > { %v5384_v31 = vmul.f32 %v5380_v34, %v5075_v15  ;;  %v5386_v43 = vmul.f32 %v5380_v34, %v5076_v39 }
 0x96a   : > { %5163 = vrot.lane.b32.xlu0 %v5155_v33, %s10403_s23 }
 0x96b   : > { %5349 = vrot.lane.b32.xlu1 %v5340_v13, %s10404_s1  ;;  %v5151_v61 = vpop.permute.xlu1 %5150 }
 0x96c   : > { %v5152_v35 = vsel %vm2835_vm2, %v5149_v17, %v5151_v61  ;;  %v7046_v17 = vld [vmem:[%s10329_s12 + $0x3] ss:$8 sm:$0x3] }
 0x96d   : > { %v5156_v24 = vmul.f32 %v5152_v35, %v5075_v15  ;;  %v5158_v47 = vmul.f32 %v5152_v35, %v5076_v39  ;;  %v5225_v15 = vpop.permute.xlu0 %5224  ;;  %v5191_v33 = vrot.slane %v7046_v17, %v10367_v36  ;;  %v5187_v3 = vrot.slane %v7046_v17, %v10365_v21 }
 0x96e   : > { %5228 = vrot.lane.b32.xlu0 %v5218_v18, %s10404_s1 }
 0x96f   : > { %5121 = vrot.lane.b32.xlu1 %v5112_v23, %s10404_s1  ;;  %v5195_v52 = vmul.f32 %v5191_v33, %v9849_v54  ;;  %v5194_v49 = vmul.f32 %v5187_v3, %v9845_v50  ;;  %v5086_v23 = vrot.slane %v5077_v4, %v10367_v36  ;;  %v5197_v40 = vmul.f32 %v5191_v33, %v9860_v20 }
 0x971   : > { %v5269_v7 = vpop.permute.xlu0 %5268  ;;  %v5090_v25 = vmul.f32 %v5086_v23, %v9849_v54 }
 0x972   : > { %5272 = vrot.lane.b32.xlu0 %v5262_v37, %s10403_s23 }
 0x973   : > { %5393 = vrot.lane.b32.xlu1 %v5384_v31, %s10403_s23 }
 0x975   : > { %v5348_v10 = vpop.permute.xlu0 %5347 }
 0x976   : > { %5351 = vrot.lane.b32.xlu0 %v5341_v58, %s10404_s1  ;;  %v5196_v58 = vmul.f32 %v5187_v3, %v9853_v8 }
 0x977   : > { %5165 = vrot.lane.b32.xlu1 %v5156_v24, %s10403_s23 }
 0x979   : > { %v5120_v22 = vpop.permute.xlu0 %5119 }
 0x97a   : > { %5123 = vrot.lane.b32.xlu0 %v5113_v38, %s10404_s1 }
 0x97b   : > { %5230 = vrot.lane.b32.xlu1 %v5219_v53, %s10404_s1 }
 0x97e   : > { %5395 = vrot.lane.b32.xlu0 %v5385_v26, %s10403_s23  ;;  %v5089_v26 = vmul.f32 %v5082_v44, %v9845_v50 }
 0x97f   : > { %5274 = vrot.lane.b32.xlu1 %v5263_v48, %s10403_s23 }
 0x982   : > { %5167 = vrot.lane.b32.xlu0 %v5157_v30, %s10403_s23 }
 0x983   : > { %5353 = vrot.lane.b32.xlu1 %v5342_v1, %s10404_s1 }
 0x987   : > { %5125 = vrot.lane.b32.xlu1 %v5114_v12, %s10404_s1 }
 0x98b   : > { %5397 = vrot.lane.b32.xlu1 %v5386_v43, %s10403_s23  ;;  %v5314_v43 = vrot.slane %v7049_v14, %v10367_v36 }
 0x98d   : > { %v5320_v3 = vmul.f32 %v5314_v43, %v9860_v20 }
 0x98f   : > { %5169 = vrot.lane.b32.xlu1 %v5158_v47, %s10403_s23 }
 0x9d5   : > { %v5227_v16 = vpop.permute.xlu1 %5226 }
 0x9d6   : > { %v5232_v18 = vsel %vm2780_vm4, %v5225_v15, %v5227_v16  ;;  %v5239_v61 = vadd.f32 %v5227_v16, %v5195_v52  ;;  %v5318_v16 = vmul.f32 %v5314_v43, %v9849_v54  ;;  %v5319_v52 = vmul.f32 %v5310_v63, %v9853_v8 }
 0x9d7   : > { %v5238_v31 = vadd.f32 %v5232_v18, %v5194_v49 }
 0x9d8   : > { %v5392_v0 = vpop.permute.xlu0 %5391 }
 0x9d9   : > { %v5271_v57 = vpop.permute.xlu1 %5270 }
 0x9da   : > { %v5276_v37 = vsel %vm2891_vm5, %v5269_v7, %v5271_v57  ;;  %v5283_v24 = vadd.f32 %v5271_v57, %v5239_v61 }
 0x9db   : > { %v5282_v38 = vadd.f32 %v5276_v37, %v5238_v31 }
 0x9dc   : > { %v5164_v45 = vpop.permute.xlu0 %5163  ;;  %v5293_v12 = vrot.slane %v5283_v24, 1 }
 0x9dd   : > { %v5350_v41 = vpop.permute.xlu1 %5349  ;;  %v5290_v47 = vrot.slane %v5282_v38, 1 }
 0x9de   : > { %v5355_v57 = vsel %vm2780_vm4, %v5348_v10, %v5350_v41  ;;  %v5362_v17 = vadd.f32 %v5350_v41, %v5318_v16  ;;  %v5427_v41 = vld [vmem:[%s10406_s3] sm:$0x3]  ;;  %s10407_s3 = sld [smem:[#allocation15_spill]] }
 0x9df   : > { %v5436_v38 = vrot.slane %v5427_v41, %v10367_v36 }
 0x9e0   : > { %v5229_v59 = vpop.permute.xlu0 %5228 }
 0x9e1   : > { %v5122_v42 = vpop.permute.xlu1 %5121 }
 0x9e2   : > { %v5127_v53 = vsel %vm2780_vm4, %v5120_v22, %v5122_v42  ;;  %v5134_v9 = vadd.f32 %v5122_v42, %v5090_v25  ;;  %v5317_v42 = vmul.f32 %v5310_v63, %v9845_v50  ;;  %v5092_v50 = vmul.f32 %v5086_v23, %v9860_v20 }
 0x9e3   : > { %v5133_v51 = vadd.f32 %v5127_v53, %v5089_v26  ;;  %v5432_v20 = vrot.slane %v5427_v41, %v10365_v21 }
 0x9e4   : > { %v5273_v13 = vpop.permute.xlu0 %5272  ;;  %v7085_v16 = vld [vmem:[%s10407_s3 + $0x5] ss:$8 sm:$0x3] }
 0x9e5   : > { %v5394_v60 = vpop.permute.xlu1 %5393 }
 0x9e6   : > { %v5399_v33 = vsel %vm2891_vm5, %v5392_v0, %v5394_v60  ;;  %v5406_v18 = vadd.f32 %v5394_v60, %v5362_v17  ;;  %v7087_v17 = vld [vmem:[%s10407_s3 + $0x7] ss:$8 sm:$0x3] }
 0x9e8   : > { %v5352_v35 = vpop.permute.xlu0 %5351  ;;  %v5416_v31 = vrot.slane %v5406_v18, 2 }
 0x9e9   : > { %v5166_v5 = vpop.permute.xlu1 %5165 }
 0x9ea   : > { %v5171_v30 = vsel %vm2891_vm5, %v5164_v45, %v5166_v5  ;;  %v5178_v19 = vadd.f32 %v5166_v5, %v5134_v9  ;;  %v5361_v5 = vadd.f32 %v5355_v57, %v5317_v42  ;;  %v5933_v42 = vrot.slane %v7085_v16, %v10365_v21 }
 0x9eb   : > { %v5177_v46 = vadd.f32 %v5171_v30, %v5133_v51 }
 0x9ec   : > { %v5124_v28 = vpop.permute.xlu0 %5123  ;;  %v5405_v49 = vadd.f32 %v5399_v33, %v5361_v5  ;;  %v6012_v33 = vrot.slane %v7087_v17, %v10365_v21 }
 0x9ed   : > { %v5231_v34 = vpop.permute.xlu1 %5230 }
 0x9ee   : > { %v5233_v6 = vsel %vm2780_vm4, %v5229_v59, %v5231_v34  ;;  %v5241_v39 = vadd.f32 %v5231_v34, %v5197_v40  ;;  %v5091_v40 = vmul.f32 %v5082_v44, %v9853_v8  ;;  %v5413_v24 = vrot.slane %v5405_v49, 2 }
 0x9ef   : > { %v5240_v27 = vadd.f32 %v5233_v6, %v5196_v58 }
 0x9f0   : > { %v5396_v4 = vpop.permute.xlu0 %5395 }
 0x9f1   : > { %v5275_v62 = vpop.permute.xlu1 %5274 }
 0x9f2   : > { %v5277_v56 = vsel %vm2891_vm5, %v5273_v13, %v5275_v62  ;;  %v5285_v48 = vadd.f32 %v5275_v62, %v5241_v39 }
 0x9f3   : > { %v5284_v1 = vadd.f32 %v5277_v56, %v5240_v27 }
 0x9f4   : > { %v5294_v11 = vrot.slane %v5285_v48, 1  ;;  %v5168_v60 = vpop.permute.xlu0 %5167 }
 0x9f5   : > { %v5291_v2 = vrot.slane %v5284_v1, 1  ;;  %v5354_v29 = vpop.permute.xlu1 %5353 }
 0x9f6   : > { %v5295_v15 = vsel %vm3229_vm7, %v5293_v12, %v5294_v11  ;;  %v5356_v13 = vsel %vm2780_vm4, %v5352_v35, %v5354_v29  ;;  %v5364_v54 = vadd.f32 %v5354_v29, %v5320_v3  ;;  %v6016_v3 = vrot.slane %v7087_v17, %v10367_v36 }
 0x9f7   : > { %v5292_v7 = vsel %vm3229_vm7, %v5290_v47, %v5291_v2  ;;  %v5301_v22 = vadd.f32 %v5295_v15, %v5178_v19  ;;  %v5363_v10 = vadd.f32 %v5356_v13, %v5319_v52  ;;  %v7081_v13 = vld [vmem:[%s10407_s3 + $0x1] ss:$8 sm:$0x3] }
 0x9f8   : > { %v5300_v45 = vadd.f32 %v5292_v7, %v5177_v46  ;;  %v5784_v5 = vrot.slane %v7081_v13, %v10365_v21 }
 0x9f9   : > { %v5126_v59 = vpop.permute.xlu1 %5125 }
 0x9fa   : > { %v5128_v61 = vsel %vm2780_vm4, %v5124_v28, %v5126_v59  ;;  %v5136_v35 = vadd.f32 %v5126_v59, %v5092_v50  ;;  %v5937_v59 = vrot.slane %v7085_v16, %v10367_v36 }
 0x9fb   : > { %v5135_v39 = vadd.f32 %v5128_v61, %v5091_v40 }
 0x9fd   : > { %v5398_v34 = vpop.permute.xlu1 %5397 }
 0x9fe   : > { %v5400_v0 = vsel %vm2891_vm5, %v5396_v4, %v5398_v34  ;;  %v5408_v37 = vadd.f32 %v5398_v34, %v5364_v54  ;;  %v5477_v4 = vld [vmem:[%s10408_s5] sm:$0x3]  ;;  %s10413_s5 = sld [smem:[#allocation17_spill]] }
 0x9ff   : > { %v5407_v6 = vadd.f32 %v5400_v0, %v5363_v10  ;;  %v5482_v52 = vrot.slane %v5477_v4, %v10365_v21  ;;  %v5486_v18 = vrot.slane %v5477_v4, %v10367_v36 }
 0xa00   : > { %v5417_v58 = vrot.slane %v5408_v37, 2 }
 0xa01   : > { %v5414_v14 = vrot.slane %v5407_v6, 2  ;;  %v5170_v25 = vpop.permute.xlu1 %5169 }
 0xa02   : > { %v5418_v23 = vsel %vm3579_vm6, %v5416_v31, %v5417_v58  ;;  %v5172_v53 = vsel %vm2891_vm5, %v5168_v60, %v5170_v25  ;;  %v5180_v27 = vadd.f32 %v5170_v25, %v5136_v35  ;;  %v5663_v25 = vld [vmem:[%s10410_s9] sm:$0xff] }
 0xa03   : > { %v5415_v8 = vsel %vm3579_vm6, %v5413_v24, %v5414_v14  ;;  %v5424_v44 = vadd.f32 %v5418_v23, %v5301_v22  ;;  %v5179_v62 = vadd.f32 %v5172_v53, %v5135_v39  ;;  %v5788_v23 = vrot.slane %v7081_v13, %v10367_v36  ;;  %v7088_v53 = vld [vmem:[%s10407_s3 + $0x10] ss:$8 sm:$0x3] }
 0xa04   : > { %v5423_v26 = vadd.f32 %v5415_v8, %v5300_v45  ;;  %v5303_v56 = vadd.f32 %v5294_v11, %v5180_v27 }
 0xa05   : > { %v5440_v48 = vadd.f32 %v5436_v38, %v5424_v44  ;;  %v5302_v9 = vadd.f32 %v5291_v2, %v5179_v62  ;;  %v7084_v2 = vld [vmem:[%s10407_s3 + $0x4] ss:$8 sm:$0x3]  ;;  %v6056_v44 = vrot.slane %v7088_v53, %v10365_v21 }
 0xa06   : > { %v5439_v30 = vadd.f32 %v5432_v20, %v5423_v26  ;;  %v5426_v1 = vadd.f32 %v5417_v58, %v5303_v56  ;;  %v5889_v57 = vrot.slane %v7084_v2, %v10365_v21  ;;  %v5893_v45 = vrot.slane %v7084_v2, %v10367_v36  ;;  %v7082_v26 = vld [vmem:[%s10407_s3 + $0x2] ss:$8 sm:$0x3] }
 0xa07   : > { %v5425_v12 = vadd.f32 %v5414_v14, %v5302_v9  ;;  %v5444_v51 = vmax.f32 %v5440_v48, 0.0  ;;  %v5828_v48 = vrot.slane %v7082_v26, %v10365_v21  ;;  %v6060_v9 = vrot.slane %v7088_v53, %v10367_v36 }
 0xa08   : > { %v5442_v43 = vadd.f32 %v5436_v38, %v5426_v1  ;;  %v5443_v47 = vmax.f32 %v5439_v30, 0.0  ;;  %5894 = vrot.lane.b32.xlu0 %v5889_v57, %s10409_s8  ;;  %5896 = vrot.lane.b32.xlu1 %v5893_v45, %s10409_s8 }
 0xa09   : > { %v5441_v63 = vadd.f32 %v5432_v20, %v5425_v12  ;;  %v5448_v46 = vmin.f32 %v5444_v51, 6.0  ;;  %v5664_v20 = vld [vmem:[%s10410_s9 + $0x8] sm:$0x3f]  ;;  %v5832_v12 = vrot.slane %v7082_v26, %v10367_v36  ;;  %v7823_v26 = vld [vmem:[%s10413_s5 + $0x38] sm:$0xff]  }
 0xa0a   : > { %v5446_v19 = vmax.f32 %v5442_v43, 0.0  ;;  %v5447_v15 = vmin.f32 %v5443_v47, 6.0 }
 0xa0b   : > { %v5445_v28 = vmax.f32 %v5441_v63, 0.0 }
 0xa0c   : > { %v5450_v29 = vmin.f32 %v5446_v19, 6.0  ;;  %5938 = vrot.lane.b32.xlu0 %v5933_v42, %s10401_s11  ;;  %5940 = vrot.lane.b32.xlu1 %v5937_v59, %s10401_s11  ;;  %v7816_v42 = vld [vmem:[%s10413_s5] sm:$0xff]  }
 0xa0d   : > { %v5449_v7 = vmin.f32 %v5445_v28, 6.0  ;;  %6245 = vmatpush1.bf16.msra.mxu0 %v7816_v42 }
 0xa0e   : > { %v5452_v22 = vpack.c.bf16 %v5450_v29, %v5448_v46  ;;  %6246 = vmatprep.subr.bf16.mxu0 %v7933_v55 }
 0xa0f   : > { %v5451_v11 = vpack.c.bf16 %v5449_v7, %v5447_v15 }
 0xa10   : > { %7076 = vmatprep.mubr.msk.bf16.mxu1 %vm4915_vm11, %v5452_v22  ;;  %6017 = vrot.lane.b32.xlu0 %v6012_v33, %s10409_s8 }
 0xa11   : > { %5645 = vmatmul.mubr.bf16.vlgmr.msra.gmra.mrb[36].mxu1 %v5451_v11  ;;  %6019 = vrot.lane.b32.xlu1 %v6016_v3, %s10409_s8 }
 0xa12   : > { %5743 = vmatprep.mubr.f32.mxu1 %v10400_v32 }
 0xa14   : > { %5789 = vrot.lane.b32.xlu0 %v5784_v5, %s10409_s8 }
 0xa15   : > { %5791 = vrot.lane.b32.xlu1 %v5788_v23, %s10409_s8  ;;  %s10414_s8 = sld [smem:[#allocation16_spill]] }
 0xa7a   : > { %v5895_v62 = vpop.permute.xlu0 %5894  ;;  %v5897_v29 = vpop.permute.xlu1 %5896 }
 0xa7b   : > { %v5898_v11 = vsel %vm2724_vm1, %v5895_v62, %v5897_v29 }
 0xa7e   : > { %v5939_v1 = vpop.permute.xlu0 %5938  ;;  %v5941_v46 = vpop.permute.xlu1 %5940 }
 0xa7f   : > { %v5942_v59 = vsel %vm2835_vm2, %v5939_v1, %v5941_v46 }
 0xa82   : > { %v6018_v51 = vpop.permute.xlu0 %6017 }
 0xa83   : > { %v6020_v15 = vpop.permute.xlu1 %6019 }
 0xa84   : > { %v6021_v13 = vsel %vm2724_vm1, %v6018_v51, %v6020_v15 }
 0xa86   : > { %v5790_v19 = vpop.permute.xlu0 %5789 }
 0xa87   : > { %v5792_v22 = vpop.permute.xlu1 %5791 }
 0xae4   : > { %v5646_v54 = vpop.f32.mrb[36].mxu1 }
 0xae5   : > { %v5647_v49 = vadd.f32 %v5646_v54, %v5482_v52  ;;  %v5648_v10 = vpop.f32.mrb[37].mxu1  ;;  %v7818_v54 = vld [vmem:[%s10413_s5 + $0x10] sm:$0xff]  }
 0xae6   : > { %v5649_v34 = vadd.f32 %v5648_v10, %v5486_v18  ;;  %v5650_v50 = vpop.f32.mrb[38].mxu1 }
 0xae7   : > { %v5655_v61 = vmax.f32 %v5647_v49, 0.0  ;;  %v5651_v41 = vadd.f32 %v5650_v50, %v5482_v52  ;;  %v5652_v0 = vpop.f32.mrb[39].mxu1  ;;  %v5793_v49 = vsel %vm2724_vm1, %v5790_v19, %v5792_v22  ;;  %vm7939_vm1 = vmmov 0  }
 0xae8   : > { %v5656_v37 = vmax.f32 %v5649_v34, 0.0  ;;  %v5653_v40 = vadd.f32 %v5652_v0, %v5486_v18  ;;  %v7817_v18 = vld [vmem:[%s10413_s5 + $0x8] sm:$0xff]  }
 0xae9   : > { %v5657_v6 = vmax.f32 %v5651_v41, 0.0  ;;  %v5659_v35 = vmin.f32 %v5655_v61, 6.0  ;;  %6247 = vmatpush1.bf16.msra.mxu0 %v7817_v18  ;;  %v7819_v41 = vld [vmem:[%s10413_s5 + $0x18] sm:$0xff]  }
 0xaea   : > { %v5658_v31 = vmax.f32 %v5653_v40, 0.0  ;;  %v5660_v24 = vmin.f32 %v5656_v37, 6.0  ;;  %6248 = vmatprep.subr.bf16.mxu0 %v7933_v55 }
 0xaeb   : > { %v5661_v58 = vmin.f32 %v5657_v6, 6.0 }
 0xaec   : > { %v5662_v60 = vmin.f32 %v5658_v31, 6.0 }
 0xaed   : > { %v7219_v39 = vpack.c.bf16 %v5661_v58, %v5659_v35  ;;  %6249 = vmatpush1.bf16.msra.mxu0 %v7818_v54 }
 0xaee   : > { %v7216_v14 = vpack.c.bf16 %v5662_v60, %v5660_v24  ;;  %6250 = vmatprep.subr.bf16.mxu0 %v7933_v55  ;;  %v7820_v24 = vld [vmem:[%s10413_s5 + $0x20] sm:$0xff]  }
 0xaf0   : > { %7218 = vmatprep.subr.msk.bf16.mxu1 %vm10009_vm15, %v7216_v14 }
 0xaf1   : > { %7221 = vmatpush1.bf16.msk.msra.mxu1 %vm10009_vm15, %v7219_v39  ;;  %6251 = vmatpush1.bf16.msra.mxu0 %v7819_v41  ;;  %v7821_v39 = vld [vmem:[%s10413_s5 + $0x28] sm:$0xff]  }
 0xaf2   : > { %6252 = vmatprep.subr.bf16.mxu0 %v7933_v55 }
 0xaf4   : > { %7079 = vmatmul.mubr.msk.f32.vlgmr.msra.gmra.mrb[40].mxu1 %vm5665_vm0, %v5663_v25 }
 0xaf5   : > { %5749 = vmatprep.mubr.f32.mxu1 %v10400_v32  ;;  %6253 = vmatpush1.bf16.msra.mxu0 %v7820_v24 }
 0xaf6   : > { %6254 = vmatprep.subr.bf16.mxu0 %v7933_v55 }
 0xaf8   : > { %7080 = vmatmul.mubr.msk.f32.gmra.mrb[42].mxu1 %vm5665_vm0, %v5664_v20  ;;  %v7822_v20 = vld [vmem:[%s10413_s5 + $0x30] sm:$0xff]  }
 0xaf9   : > { %6255 = vmatpush1.bf16.msra.mxu0 %v7821_v39  ;;  %7154 = vmatprep.mubr.msk.f32.mxu1 %vm7939_vm1, %v10400_v32 }
 0xafa   : > { %6256 = vmatprep.subr.bf16.mxu0 %v7933_v55 }
 0xafd   : > { %6257 = vmatpush1.bf16.msra.mxu0 %v7822_v20 }
 0xafe   : > { %6258 = vmatprep.subr.bf16.mxu0 %v7933_v55 }
 0xb01   : > { %6259 = vmatpush1.bf16.msra.mxu0 %v7823_v26 }
 0xb02   : > { %6260 = vmatprep.subr.bf16.mxu0 %v7933_v55 }
 0xbc7   : > { %v10025_v27 = vpop.f32.mrb[40].mxu1 }
 0xbc8   : > { %5756 = vrot.lane.b32.xlu0 %v10025_v27, %s10403_s23  ;;  %v10029_v8 = vpop.f32.mrb[41].mxu1  ;;  %v5901_v43 = vmul.f32 %v5895_v62, %v10025_v27  ;;  %v5945_v47 = vmul.f32 %v5939_v1, %v10025_v27  ;;  %v6024_v63 = vmul.f32 %v6018_v51, %v10025_v27  ;;  %v5796_v28 = vmul.f32 %v5790_v19, %v10025_v27 }
 0xbcb   : > { %v10033_v56 = vpop.f32.mrb[42].mxu1 }
 0xbcc   : > { %6061 = vrot.lane.b32.xlu0 %v6056_v44, %s10401_s11  ;;  %5758 = vrot.lane.b32.xlu1 %v10033_v56, %s10403_s23  ;;  %v10040_v30 = vpop.f32.mrb[43].mxu1  ;;  %v5903_v10 = vmul.f32 %v5895_v62, %v10033_v56  ;;  %v5947_v0 = vmul.f32 %v5939_v1, %v10033_v56  ;;  %v6026_v6 = vmul.f32 %v6018_v51, %v10033_v56  ;;  %v7825_v1 = vld [vmem:[%s10413_s5 + $0x48] sm:$0xff]  }
 0xbcd   : > { %v5798_v58 = vmul.f32 %v5790_v19, %v10033_v56 }
 0xbd0   : > { %5833 = vrot.lane.b32.xlu0 %v5828_v48, %s10401_s11  ;;  %6063 = vrot.lane.b32.xlu1 %v6060_v9, %s10401_s11  ;;  %v7824_v9 = vld [vmem:[%s10413_s5 + $0x40] sm:$0xff]  }
 0xbd1   : > { %6261 = vmatpush1.bf16.msra.mxu0 %v7824_v9 }
 0xbd2   : > { %6262 = vmatprep.subr.bf16.mxu0 %v7933_v55 }
 0xbd4   : > { %5909 = vrot.lane.b32.xlu0 %v5901_v43, %s10404_s1  ;;  %5835 = vrot.lane.b32.xlu1 %v5832_v12, %s10401_s11  ;;  %v7826_v12 = vld [vmem:[%s10413_s5 + $0x50] sm:$0xff]   ;;  %v7827_v43 = vld [vmem:[%s10413_s5 + $0x58] sm:$0xff]   ;;  %s10415_s11 = sld [smem:[#allocation18_spill]] }
 0xbd5   : > { %6263 = vmatpush1.bf16.msra.mxu0 %v7825_v1 }
 0xbd6   : > { %6264 = vmatprep.subr.bf16.mxu0 %v7933_v55 }
 0xbd8   : > { %5953 = vrot.lane.b32.xlu0 %v5945_v47, %s10403_s23 }
 0xbd9   : > { %6265 = vmatpush1.bf16.msra.mxu0 %v7826_v12 }
 0xbda   : > { %6266 = vmatprep.subr.bf16.mxu0 %v7933_v55 }
 0xbdc   : > { %6032 = vrot.lane.b32.xlu0 %v6024_v63, %s10404_s1 }
 0xbdd   : > { %6267 = vmatpush1.bf16.msra.mxu0 %v7827_v43 }
 0xbe0   : > { %5804 = vrot.lane.b32.xlu0 %v5796_v28, %s10404_s1 }
 0xc3a   : > { %v5757_v7 = vpop.permute.xlu0 %5756 }
 0xc3b   : > { %v5760_v2 = vsel %vm5070_vm12, %v5757_v7, %v10029_v8 }
 0xc3c   : > { %v5902_v16 = vmul.f32 %v5898_v11, %v5760_v2  ;;  %v5946_v33 = vmul.f32 %v5942_v59, %v5760_v2  ;;  %v6025_v52 = vmul.f32 %v6021_v13, %v5760_v2  ;;  %v5797_v34 = vmul.f32 %v5793_v49, %v5760_v2 }
 0xc3e   : > { %v6062_v57 = vpop.permute.xlu0 %6061  ;;  %5911 = vrot.lane.b32.xlu1 %v5902_v16, %s10404_s1  ;;  %v5759_v45 = vpop.permute.xlu1 %5758 }
 0xc3f   : > { %v6068_v17 = vmul.f32 %v6062_v57, %v10025_v27  ;;  %v5761_v35 = vsel %vm5070_vm12, %v5759_v45, %v10040_v30  ;;  %v6070_v14 = vmul.f32 %v6062_v57, %v10033_v56 }
 0xc40   : > { %v5904_v60 = vmul.f32 %v5898_v11, %v5761_v35  ;;  %v5948_v25 = vmul.f32 %v5942_v59, %v5761_v35  ;;  %v6027_v53 = vmul.f32 %v6021_v13, %v5761_v35  ;;  %v5799_v44 = vmul.f32 %v5793_v49, %v5761_v35  ;;  %v5762_v59 = vld [vmem:[%s10407_s3] ss:$8 sm:$0x3] }
 0xc41   : > { %6076 = vrot.lane.b32.xlu0 %v6068_v17, %s10403_s23  ;;  %v5767_v13 = vrot.slane %v5762_v59, %v10365_v21 }
 0xc42   : > { %v5834_v3 = vpop.permute.xlu0 %5833  ;;  %5955 = vrot.lane.b32.xlu1 %v5946_v33, %s10403_s23  ;;  %v6064_v4 = vpop.permute.xlu1 %6063 }
 0xc43   : > { %v5840_v5 = vmul.f32 %v5834_v3, %v10025_v27  ;;  %v6065_v50 = vsel %vm2835_vm2, %v6062_v57, %v6064_v4  ;;  %v5842_v23 = vmul.f32 %v5834_v3, %v10033_v56 }
 0xc44   : > { %v6069_v37 = vmul.f32 %v6065_v50, %v5760_v2  ;;  %v6071_v62 = vmul.f32 %v6065_v50, %v5761_v35 }
 0xc45   : > { %5848 = vrot.lane.b32.xlu0 %v5840_v5, %s10403_s23  ;;  %v5771_v5 = vrot.slane %v5762_v59, %v10367_v36 }
 0xc46   : > { %6034 = vrot.lane.b32.xlu1 %v6025_v52, %s10404_s1  ;;  %v5836_v61 = vpop.permute.xlu1 %5835  ;;  %v5910_v51 = vpop.permute.xlu0 %5909 }
 0xc47   : > { %v5837_v40 = vsel %vm2835_vm2, %v5834_v3, %v5836_v61  ;;  %vm6549_vm2 = vcmask 783360  }
 0xc48   : > { %v5841_v31 = vmul.f32 %v5837_v40, %v5760_v2  ;;  %v5843_v48 = vmul.f32 %v5837_v40, %v5761_v35  ;;  %v7083_v2 = vld [vmem:[%s10407_s3 + $0x3] ss:$8 sm:$0x3]  ;;  %v5775_v40 = vmul.f32 %v5771_v5, %v10029_v8 }
 0xc49   : > { %5913 = vrot.lane.b32.xlu0 %v5903_v10, %s10404_s1  ;;  %v5876_v57 = vrot.slane %v7083_v2, %v10367_v36  ;;  %v5872_v45 = vrot.slane %v7083_v2, %v10365_v21 }
 0xc4a   : > { %5806 = vrot.lane.b32.xlu1 %v5797_v34, %s10404_s1  ;;  %v5954_v47 = vpop.permute.xlu0 %5953 }
 0xc4b   : > { %v5880_v17 = vmul.f32 %v5876_v57, %v10029_v8  ;;  %v5879_v3 = vmul.f32 %v5872_v45, %v10025_v27  ;;  %v5882_v54 = vmul.f32 %v5876_v57, %v10040_v30  ;;  %v5881_v50 = vmul.f32 %v5872_v45, %v10033_v56 }
 0xc4d   : > { %5957 = vrot.lane.b32.xlu0 %v5947_v0, %s10403_s23 }
 0xc4e   : > { %6078 = vrot.lane.b32.xlu1 %v6069_v37, %s10403_s23  ;;  %v6033_v63 = vpop.permute.xlu0 %6032  ;;  %v7086_v37 = vld [vmem:[%s10407_s3 + $0x6] ss:$8 sm:$0x3]  ;;  %s10417_s3 = sld [smem:[#allocation22_spill]] }
 0xc4f   : > { %v5995_v26 = vrot.slane %v7086_v37, %v10365_v21 }
 0xc51   : > { %6036 = vrot.lane.b32.xlu0 %v6026_v6, %s10404_s1 }
 0xc52   : > { %5850 = vrot.lane.b32.xlu1 %v5841_v31, %s10403_s23  ;;  %v5805_v19 = vpop.permute.xlu0 %5804 }
 0xc55   : > { %5808 = vrot.lane.b32.xlu0 %v5798_v58, %s10404_s1  ;;  %v5774_v58 = vmul.f32 %v5767_v13, %v10025_v27 }
 0xc56   : > { %5915 = vrot.lane.b32.xlu1 %v5904_v60, %s10404_s1 }
 0xc59   : > { %6080 = vrot.lane.b32.xlu0 %v6070_v14, %s10403_s23 }
 0xc5a   : > { %5959 = vrot.lane.b32.xlu1 %v5948_v25, %s10403_s23 }
 0xc5d   : > { %5852 = vrot.lane.b32.xlu0 %v5842_v23, %s10403_s23  ;;  %v5999_v23 = vrot.slane %v7086_v37, %v10367_v36 }
 0xc5e   : > { %6038 = vrot.lane.b32.xlu1 %v6027_v53, %s10404_s1 }
 0xc5f   : > { %v6005_v45 = vmul.f32 %v5999_v23, %v10040_v30 }
 0xc62   : > { %5810 = vrot.lane.b32.xlu1 %v5799_v44, %s10404_s1 }
 0xc66   : > { %6082 = vrot.lane.b32.xlu1 %v6071_v62, %s10403_s23 }
 0xc6a   : > { %5854 = vrot.lane.b32.xlu1 %v5843_v48, %s10403_s23 }
 0xcb0   : > { %v5912_v28 = vpop.permute.xlu1 %5911 }
 0xcb1   : > { %v5917_v33 = vsel %vm2780_vm4, %v5910_v51, %v5912_v28  ;;  %v5924_v52 = vadd.f32 %v5912_v28, %v5880_v17  ;;  %v6003_v28 = vmul.f32 %v5999_v23, %v10029_v8  ;;  %v6004_v17 = vmul.f32 %v5995_v26, %v10033_v56 }
 0xcb2   : > { %v5923_v10 = vadd.f32 %v5917_v33, %v5879_v3 }
 0xcb3   : > { %v6077_v29 = vpop.permute.xlu0 %6076 }
 0xcb4   : > { %v5956_v46 = vpop.permute.xlu1 %5955 }
 0xcb5   : > { %v5961_v18 = vsel %vm2891_vm5, %v5954_v47, %v5956_v46  ;;  %v5968_v61 = vadd.f32 %v5956_v46, %v5924_v52 }
 0xcb6   : > { %v5967_v0 = vadd.f32 %v5961_v18, %v5923_v10 }
 0xcb7   : > { %v5849_v15 = vpop.permute.xlu0 %5848  ;;  %v5978_v20 = vrot.slane %v5968_v61, 1 }
 0xcb8   : > { %v6035_v7 = vpop.permute.xlu1 %6034  ;;  %v5975_v62 = vrot.slane %v5967_v0, 1 }
 0xcb9   : > { %v6040_v46 = vsel %vm2780_vm4, %v6033_v63, %v6035_v7  ;;  %v6047_v2 = vadd.f32 %v6035_v7, %v6003_v28  ;;  %v6112_v7 = vld [vmem:[%s10414_s8] sm:$0x3]  ;;  %s10416_s8 = sld [smem:[#allocation19_spill]] }
 0xcba   : > { %v6121_v0 = vrot.slane %v6112_v7, %v10367_v36 }
 0xcbb   : > { %v5914_v11 = vpop.permute.xlu0 %5913 }
 0xcbc   : > { %v5807_v22 = vpop.permute.xlu1 %5806 }
 0xcbd   : > { %v5812_v6 = vsel %vm2780_vm4, %v5805_v19, %v5807_v22  ;;  %v5819_v39 = vadd.f32 %v5807_v22, %v5775_v40  ;;  %v6002_v22 = vmul.f32 %v5995_v26, %v10025_v27  ;;  %v5777_v27 = vmul.f32 %v5771_v5, %v10040_v30 }
 0xcbe   : > { %v5818_v53 = vadd.f32 %v5812_v6, %v5774_v58  ;;  %v6117_v30 = vrot.slane %v6112_v7, %v10365_v21  ;;  %v7832_v7 = vld [vmem:[%s10417_s3 + $0x20] sm:$0xff]  }
 0xcbf   : > { %v5958_v55 = vpop.permute.xlu0 %5957 }
 0xcc0   : > { %v6079_v16 = vpop.permute.xlu1 %6078 }
 0xcc1   : > { %v6084_v57 = vsel %vm2891_vm5, %v6077_v29, %v6079_v16  ;;  %v6091_v33 = vadd.f32 %v6079_v16, %v6047_v2 }
 0xcc3   : > { %v6037_v34 = vpop.permute.xlu0 %6036  ;;  %v6101_v10 = vrot.slane %v6091_v33, 2  ;;  %v7829_v33 = vld [vmem:[%s10417_s3 + $0x8] sm:$0xff]  }
 0xcc4   : > { %v5851_v42 = vpop.permute.xlu1 %5850 }
 0xcc5   : > { %v5856_v14 = vsel %vm2891_vm5, %v5849_v15, %v5851_v42  ;;  %v5863_v48 = vadd.f32 %v5851_v42, %v5819_v39  ;;  %v6046_v42 = vadd.f32 %v6040_v46, %v6002_v22 }
 0xcc6   : > { %v5862_v43 = vadd.f32 %v5856_v14, %v5818_v53 }
 0xcc7   : > { %v5809_v9 = vpop.permute.xlu0 %5808  ;;  %v6090_v3 = vadd.f32 %v6084_v57, %v6046_v42 }
 0xcc8   : > { %v5916_v4 = vpop.permute.xlu1 %5915 }
 0xcc9   : > { %v5918_v49 = vsel %vm2780_vm4, %v5914_v11, %v5916_v4  ;;  %v5926_v41 = vadd.f32 %v5916_v4, %v5882_v54  ;;  %v5776_v54 = vmul.f32 %v5767_v13, %v10033_v56  ;;  %v6098_v61 = vrot.slane %v6090_v3, 2  ;;  %v7830_v3 = vld [vmem:[%s10417_s3 + $0x10] sm:$0xff]  }
 0xcca   : > { %v5925_v31 = vadd.f32 %v5918_v49, %v5881_v50 }
 0xccb   : > { %v6081_v59 = vpop.permute.xlu0 %6080 }
 0xccc   : > { %v5960_v35 = vpop.permute.xlu1 %5959 }
 0xccd   : > { %v5962_v24 = vsel %vm2891_vm5, %v5958_v55, %v5960_v35  ;;  %v5970_v60 = vadd.f32 %v5960_v35, %v5926_v41 }
 0xcce   : > { %v5969_v25 = vadd.f32 %v5962_v24, %v5925_v31 }
 0xccf   : > { %v5979_v44 = vrot.slane %v5970_v60, 1  ;;  %v5853_v16 = vpop.permute.xlu0 %5852 }
 0xcd0   : > { %v5976_v1 = vrot.slane %v5969_v25, 1  ;;  %v6039_v12 = vpop.permute.xlu1 %6038 }
 0xcd1   : > { %v5980_v51 = vsel %vm3229_vm7, %v5978_v20, %v5979_v44  ;;  %v6041_v55 = vsel %vm2780_vm4, %v6037_v34, %v6039_v12  ;;  %v6049_v8 = vadd.f32 %v6039_v12, %v6005_v45 }
 0xcd2   : > { %v5977_v47 = vsel %vm3229_vm7, %v5975_v62, %v5976_v1  ;;  %v5986_v19 = vadd.f32 %v5980_v51, %v5863_v48  ;;  %v6048_v63 = vadd.f32 %v6041_v55, %v6004_v17  ;;  %v7828_v17 = vld [vmem:[%s10417_s3] sm:$0xff]  }
 0xcd3   : > { %v5985_v15 = vadd.f32 %v5977_v47, %v5862_v43 }
 0xcd4   : > { %v5811_v11 = vpop.permute.xlu1 %5810 }
 0xcd5   : > { %v5813_v52 = vsel %vm2780_vm4, %v5809_v9, %v5811_v11  ;;  %v5821_v34 = vadd.f32 %v5811_v11, %v5777_v27  ;;  %v6558_v27 = vld [vmem:[%s8089_s27 + $0x8] sm:$0xff] }
 0xcd6   : > { %v5820_v41 = vadd.f32 %v5813_v52, %v5776_v54 }
 0xcd8   : > { %v6083_v4 = vpop.permute.xlu1 %6082 }
 0xcd9   : > { %v6085_v29 = vsel %vm2891_vm5, %v6081_v59, %v6083_v4  ;;  %v6093_v18 = vadd.f32 %v6083_v4, %v6049_v8  ;;  %v6289_v59 = vld [vmem:[%s10416_s8] sm:$0xff]  ;;  %s7124_s8 = sshll.u32 %s8122_s0, 4  ;;  %s7940_s0 = smov [#allocation2]  }
 0xcda   : > { %v6092_v49 = vadd.f32 %v6085_v29, %v6048_v63  ;;  %v7831_v63 = vld [vmem:[%s10417_s3 + $0x18] sm:$0xff]   ;;  %v6557_v4 = vld [vmem:[%s8089_s27] sm:$0xff]  ;;  %v7833_v29 = vld [vmem:[%s10417_s3 + $0x28] sm:$0xff]   ;;  %s10217_s5 = scalar_lea.hbm %s8099_s6, %s7124_s8 }
 0xcdb   : > { %v6102_v50 = vrot.slane %v6093_v18, 2  ;;  %v7227_v52 = vpack.c.bf16 %v6558_v27, %v6557_v4 }
 0xcdc   : > { %v6099_v37 = vrot.slane %v6092_v49, 2  ;;  %v5855_v40 = vpop.permute.xlu1 %5854 }
 0xcdd   : > { %v6103_v5 = vsel %vm3579_vm6, %v6101_v10, %v6102_v50  ;;  %v5857_v6 = vsel %vm2891_vm5, %v5853_v16, %v5855_v40  ;;  %v5865_v31 = vadd.f32 %v5855_v40, %v5821_v34 }
 0xcde   : > { %v6100_v56 = vsel %vm3579_vm6, %v6098_v61, %v6099_v37  ;;  %v6109_v13 = vadd.f32 %v6103_v5, %v5986_v19  ;;  %v5864_v35 = vadd.f32 %v5857_v6, %v5820_v41 }
 0xcdf   : > { %v6108_v58 = vadd.f32 %v6100_v56, %v5985_v15  ;;  %v5988_v24 = vadd.f32 %v5979_v44, %v5865_v31  ;;  %v7938_v44 = vmov 0.0|0.0  }
 0xce0   : > { %v6125_v60 = vadd.f32 %v6121_v0, %v6109_v13  ;;  %v5987_v39 = vadd.f32 %v5976_v1, %v5864_v35  ;;  %7222 = vmatprep.subr.bf16.mxu1 %v7938_v44  ;;  %7226 = vmatprep.subr.bf16.mxu0 %v7938_v44  ;;  %v7089_v1 = vld [vmem:[%s10415_s11] ss:$0 sm:$0xff]  ;;  %s10418_s11 = sld [smem:[#allocation20_spill]] }
 0xce1   : > { %v6124_v14 = vadd.f32 %v6117_v30, %v6108_v58  ;;  %v6111_v25 = vadd.f32 %v6102_v50, %v5988_v24 }
 0xce2   : > { %v6110_v36 = vadd.f32 %v6099_v37, %v5987_v39  ;;  %v6129_v23 = vmax.f32 %v6125_v60, 0.0 }
 0xce3   : > { %v6127_v20 = vadd.f32 %v6121_v0, %v6111_v25  ;;  %v6128_v53 = vmax.f32 %v6124_v14, 0.0 }
 0xce4   : > { %v6126_v21 = vadd.f32 %v6117_v30, %v6110_v36  ;;  %v6133_v9 = vmin.f32 %v6129_v23, 6.0 }
 0xce5   : > { %v6131_v62 = vmax.f32 %v6127_v20, 0.0  ;;  %v6132_v12 = vmin.f32 %v6128_v53, 6.0 }
 0xce6   : > { %v6130_v26 = vmax.f32 %v6126_v21, 0.0  ;;  %v7105_v18 = vld [vmem:[%s10418_s11] ss:$0 sm:$0xff]  ;;  %v7106_v54 = vld [vmem:[%s10418_s11 + $0x1] ss:$0 sm:$0xff] }
 0xce7   : > { %v6135_v48 = vmin.f32 %v6131_v62, 6.0  ;;  %v7108_v49 = vld [vmem:[%s10418_s11 + $0x3] ss:$0 sm:$0xff]  ;;  %v7109_v10 = vld [vmem:[%s10418_s11 + $0x4] ss:$0 sm:$0xff] }
 0xce8   : > { %v6134_v43 = vmin.f32 %v6130_v26, 6.0  ;;  %v7111_v34 = vld [vmem:[%s10418_s11 + $0x6] ss:$0 sm:$0xff]  ;;  %v7112_v50 = vld [vmem:[%s10418_s11 + $0x7] ss:$0 sm:$0xff] }
 0xce9   : > { %v6137_v51 = vpack.c.bf16 %v6135_v48, %v6133_v9  ;;  %v7110_v61 = vld [vmem:[%s10418_s11 + $0x5] ss:$0 sm:$0xff]  ;;  %v7113_v37 = vld [vmem:[%s10418_s11 + $0x8] ss:$0 sm:$0xff] }
 0xcea   : > { %v6136_v47 = vpack.c.bf16 %v6134_v43, %v6132_v12  ;;  %v6559_v12 = vld [vmem:[%s8089_s27 + $0x10] sm:$0xff]  ;;  %v6560_v43 = vld [vmem:[%s8089_s27 + $0x18] sm:$0xff] }
 0xceb   : > { %7102 = vmatprep.mubr.msk.bf16.mxu0 %vm4915_vm11, %v6137_v51  ;;  %v6561_v51 = vld [vmem:[%s8089_s27 + $0x20] sm:$0xff] }
 0xcec   : > { %6277 = vmatmul.mubr.bf16.vlgmr.msra.gmra.mrb[24].mxu0 %v6136_v47  ;;  %v7230_v47 = vpack.c.bf16 %v6560_v43, %v6559_v12 }
 0xced   : > { %7197 = vmatprep.mubr.msk.f32.mxu0 %vm7939_vm1, %v10400_v32  ;;  %7228 = vmatpush3.bf16.msra.mxu0 %v7227_v52 }
 0xcee   : > { %7229 = vmatprep.subr.bf16.mxu0 %v7938_v44 }
 0xcf1   : > { %7231 = vmatpush3.bf16.msra.mxu0 %v7230_v47 }
 0xcf2   : > { %7232 = vmatprep.subr.bf16.mxu0 %v7938_v44 }
 0xdbf   : > { %v6278_v19 = vpop.f32.mrb[24].mxu0 }
 0xdc0   : > { %v6279_v28 = vadd.f32 %v7089_v1, %v6278_v19  ;;  %v6280_v46 = vpop.f32.mrb[25].mxu0 }
 0xdc1   : > { %v6281_v15 = vpop.f32.mrb[26].mxu0  ;;  %v6564_v46 = vld [vmem:[%s8089_s27 + $0x38] sm:$0xff] }
 0xdc2   : > { %v6285_v22 = vmax.f32 %v6279_v28, 0.0  ;;  %v6282_v11 = vadd.f32 %v7089_v1, %v6281_v15  ;;  %v6283_v2 = vpop.f32.mrb[27].mxu0  ;;  %v6562_v1 = vld [vmem:[%s8089_s27 + $0x28] sm:$0xff]  ;;  %v6563_v28 = vld [vmem:[%s8089_s27 + $0x30] sm:$0xff] }
 0xdc3   : > { %v7233_v19 = vpack.c.bf16 %v6562_v1, %v6561_v51  ;;  %v7236_v15 = vpack.c.bf16 %v6564_v46, %v6563_v28 }
 0xdc4   : > { %v6286_v57 = vmax.f32 %v6282_v11, 0.0  ;;  %v6287_v45 = vmin.f32 %v6285_v22, 6.0  ;;  %v6565_v22 = vld [vmem:[%s8089_s27 + $0x40] sm:$0xff]  ;;  %v6566_v11 = vld [vmem:[%s8089_s27 + $0x48] sm:$0xff] }
 0xdc5   : > { %7234 = vmatpush3.bf16.msra.mxu0 %v7233_v19  ;;  %v7239_v2 = vpack.c.bf16 %v6566_v11, %v6565_v22 }
 0xdc6   : > { %v6288_v55 = vmin.f32 %v6286_v57, 6.0  ;;  %7235 = vmatprep.subr.bf16.mxu0 %v7938_v44  ;;  %v6567_v57 = vld [vmem:[%s8089_s27 + $0x50] sm:$0xff] }
 0xdc8   : > { %v7223_v42 = vpack.c.bf16 %v6288_v55, %v6287_v45  ;;  %v6568_v45 = vld [vmem:[%s8089_s27 + $0x58] sm:$0xff] }
 0xdc9   : > { %7237 = vmatpush3.bf16.msra.mxu0 %v7236_v15  ;;  %v7242_v55 = vpack.c.bf16 %v6568_v45, %v6567_v57 }
 0xdca   : > { %7225 = vmatpush3.bf16.msk.msra.mxu1 %vm10009_vm15, %v7223_v42  ;;  %7238 = vmatprep.subr.bf16.mxu0 %v7938_v44  ;;  %v7115_v42 = vld [vmem:[%s8084_s20] ss:$0 sm:$0xff] }
 0xdcb   : > { %7157 = vmatprep.subr.bf16.mxu1 %v10400_v32 }
 0xdcd   : > { %7155 = vmatmul.mubr.msk.f32.vlgmr.msra.gmra.mrb[44].mxu1 %vm5665_vm0, %v6289_v59  ;;  %7240 = vmatpush3.bf16.msra.mxu0 %v7239_v2 }
 0xdce   : > { %7169 = vmatprep.mubr.msk.bf16.mxu1 %vm7939_vm1, %v10400_v32  ;;  %7158 = vmatpush3.bf16.msra.mxu1 %v7828_v17 }
 0xdcf   : > { %7159 = vmatprep.subr.bf16.mxu1 %v10400_v32  ;;  %7241 = vmatprep.subr.bf16.mxu0 %v7938_v44 }
 0xdd1   : > { %7243 = vmatpush3.bf16.msra.mxu0 %v7242_v55 }
 0xdd2   : > { %7160 = vmatpush3.bf16.msra.mxu1 %v7829_v33 }
 0xdd3   : > { %7161 = vmatprep.subr.bf16.mxu1 %v10400_v32 }
 0xdd6   : > { %7162 = vmatpush3.bf16.msra.mxu1 %v7830_v3 }
 0xdd7   : > { %7163 = vmatprep.subr.bf16.mxu1 %v10400_v32 }
 0xdda   : > { %7164 = vmatpush3.bf16.msra.mxu1 %v7831_v63 }
 0xddb   : > { %7165 = vmatprep.subr.bf16.mxu1 %v10400_v32 }
 0xdde   : > { %7166 = vmatpush3.bf16.msra.mxu1 %v7832_v7 }
 0xddf   : > { %7167 = vmatprep.subr.bf16.mxu1 %v10400_v32  ;;  %v7107_v32 = vld [vmem:[%s10418_s11 + $0x2] ss:$0 sm:$0xff] }
 0xde2   : > { %7168 = vmatpush3.bf16.msra.mxu1 %v7833_v29 }
 0xea0   : > { %v6362_v38 = vpop.f32.mrb[44].mxu1 }
 0xea1   : > { %6366 = vrot.lane.b32.xlu0 %v6362_v38, %s10404_s1  ;;  %6368 = vrot.lane.b32.xlu1 %v6362_v38, %s10403_s23  ;;  %v7156_v8 = vpop.f32.mrb[45].mxu1  ;;  %v6375_v41 = vmul.f32 %v7105_v18, %v6362_v38  ;;  %v6395_v0 = vmul.f32 %v7108_v49, %v6362_v38  ;;  %s10419_s1 = sld [smem:[#allocation21_spill]]  ;;  %v6419_v6 = vmul.f32 %v7111_v34, %v6362_v38  ;;  %s921_s23 = sand.u32 1, %s7888_s16  }
 0xea2   : > { %s6646_s9 = scalar_lea.sflag [#allocation3], %s921_s23 }
 0xea7   : > { %v7114_v53 = vld [vmem:[%s10419_s1] ss:$0 sm:$0xff]  ;;  %s922_s1 = scalar_lea.vmem [#allocation2], %s921_s23 }
 0xea8   : > { %s6658_s3 = sshll.u32 %s922_s1, 4  ;;  %s10219_s3 = int_to_ptr.vmem [resolvable:$true] %s6658_s3 }
 0xea9   : > { %s7834_s11 = scalar_lea.vmem %s10219_s3, 16 }
 0xeaa   : > { %p7835_p11 = scmp.ne.s32.totalorder %s10219_s3, %s7834_s11 }
 0xeac   : > { %p7836_p12 = pnand %p7835_p11, %p8139_p5 }
 0xeae   : > { %p7837_p13 = pneg %p7836_p12 }
 0xf13   : > { %v6367_v16 = vpop.permute.xlu0 %6366  ;;  %v6369_v40 = vpop.permute.xlu1 %6368 }
 0xf14   : > { %v6381_v30 = vmul.f32 %v7106_v54, %v6367_v16  ;;  %v6401_v5 = vmul.f32 %v7109_v10, %v6367_v16  ;;  %v6425_v31 = vmul.f32 %v7112_v50, %v6367_v16  ;;  %v6408_v56 = vmul.f32 %v7110_v61, %v6369_v40  ;;  %v6569_v54 = vld [vmem:[%s10420_s4] sm:$0x1]  ;;  %s7838_s4 = sshll.u32 %s7940_s0, 4  ;;  %s7839_s4 = int_to_ptr.vmem [resolvable:$false] %s7838_s4 }
 0xf15   : > { %v6432_v24 = vmul.f32 %v7113_v37, %v6369_v40  ;;  %v6388_v60 = vmul.f32 %v7107_v32, %v6369_v40  ;;  %s7840_s12 = scalar_lea.vmem %s7839_s4, 32  ;;  %p7841_p0 = scmp.lt.s32.totalorder %s10219_s3, %s7839_s4 }
 0xf16   : > { %v6382_v13 = vadd.f32 %v6381_v30, %v6375_v41  ;;  %v6402_v35 = vadd.f32 %v6401_v5, %v6395_v0  ;;  %v6426_v58 = vadd.f32 %v6425_v31, %v6419_v6  ;;  %p7842_p1 = scmp.lt.s32.totalorder %s7840_s12, %s7834_s11 }
 0xf18   : > { %v6409_v39 = vadd.f32 %v6408_v56, %v6402_v35  ;;  %v6433_v14 = vadd.f32 %v6432_v24, %v6426_v58  ;;  %v6389_v25 = vadd.f32 %v6388_v60, %v6382_v13  ;;  %p7843_p2 = por %p7842_p1, %p7841_p0 }
 0xf1a   : > { %v6411_v36 = vrot.slane %v6409_v39, 1  ;;  %v6435_v23 = vrot.slane %v6433_v14, 2  ;;  %p7844_p3 = pnand %p7843_p2, %p7837_p13 }
 0xf1c   : > { %v6413_v20 = vadd.f32 %v6411_v36, %v6389_v25 }
 0xf1e   : > { %v6437_v21 = vadd.f32 %v6435_v23, %v6413_v20 }
 0xf20   : > { %v6445_v62 = vadd.f32 %v7114_v53, %v6437_v21 }
 0xf22   : > { %v6446_v26 = vmax.f32 %v6445_v62, 0.0 }
 0xf24   : > { %v6447_v48 = vmin.f32 %v6446_v26, 6.0 }
 0xf26   : > { %v6448_v9 = vpack.c.bf16 %v6447_v48, %v6447_v48 }
 0xf28   : > { %7170 = vmatmul.mubr.msk.bf16.vlgmr.msra.gmra.mrb[48].mxu1 %vm2891_vm5, %v6448_v9 }
 0xffb   : > { %v6541_v59 = vpop.f32.mrb[48].mxu1 }
 0xffc   : > { %v6542_v17 = vadd.f32 %v7115_v42, %v6541_v59  ;;  %v7171_v33 = vpop.f32.mrb[49].mxu1 }
 0xffd   : > { %v6544_v38 = vpop.f32.mrb[50].mxu1 }
 0xffe   : > { %v6547_v8 = vmax.f32 %v6542_v17, 0.0  ;;  %v7172_v3 = vpop.f32.mrb[51].mxu1 }
0x1000   : > { %v6548_v63 = vmin.f32 %v6547_v8, 6.0 }
0x1002   : > { %v6550_v4 = vsel %vm6549_vm2, %v6548_v63, 0.0 }
0x1003   : > { %v6551_v27 = vrot.slane %v6550_v4, 4 }
0x1005   : > { %v6552_v52 = vadd.f32 %v6551_v27, %v6550_v4 }
0x1007   : > { %v6553_v7 = vrot.slane %v6552_v52, 2 }
0x1009   : > { %v6554_v29 = vadd.f32 %v6553_v7, %v6552_v52 }
0x100b   : > { %v6555_v44 = vrot.slane %v6554_v29, 1 }
0x100d   : > { %v6556_v18 = vadd.f32 %v6555_v44, %v6554_v29 }
0x100f   : > { %7198 = vmatmul.mubr.msk.f32.vlgmr.msra.gmra.mrb[28].mxu0 %vm2891_vm5, %v6556_v18 }
0x10e2   : > { %v6639_v49 = vpop.f32.mrb[28].mxu0 }
0x10e3   : > { %v6640_v10 = vadd.f32 %v6639_v49, %v6569_v54  ;;  %v7199_v34 = vpop.f32.mrb[29].mxu0 }
0x10e5   : > { %6644 = vst.msk [vmem:[%s922_s1] sm:$0x1] %vm6643_vm3, %v6640_v10 }
0x10e6   : > { %7847 = shalt.err (!%p7844_p3)
}
0x10e7   : > { %s7848_s23 = scalar_lea.hbm %s10217_s5, 16  ;;  %s7852_s8 = scalar_lea.hbm %s8099_s6, 32 }
0x10e8   : > { %p7849_p4 = scmp.ne.s32.totalorder %s10217_s5, %s7848_s23  ;;  %p7853_p9 = scmp.lt.u32.totalorder %s10217_s5, %s8099_s6 }
0x10e9   : > { %p7854_p10 = scmp.lt.u32.totalorder %s7852_s8, %s7848_s23  ;;  %p7856_p12 = scmp.lt.u32.totalorder %s7848_s23, %s10217_s5 }
0x10ea   : > { %p7850_p7 = pnand %p7849_p4, %p8139_p5 }
0x10eb   : > { %p7855_p11 = por %p7854_p10, %p7853_p9 }
0x10ec   : > { %p7851_p8 = pneg %p7850_p7 }
0x10ed   : > { %p7857_p0 = por %p7856_p12, %p7855_p11 }
0x10ef   : > { %p7858_p13 = pnand %p7857_p0, %p7851_p8 }
0x10f1   : > { %7861 = shalt.err (!%p7858_p13)
}
0x10f2   : > { %7303 = dma.vmem_to_hbm [thread:$0]  (%p8139_p5), %s10219_s3, 16, %s10217_s5, %s6646_s9  }
0x10f3 PF: > { %p7309_p1 = scmp.ge.s32.totalorder %s7896_s22, 2  ;;  %s6670_s12 = sand.u32 1, %s7884_s15  }
0x10f4   : > { %s6671_s4 = scalar_lea.sflag [#allocation3], %s6670_s12 }
0x10f5   : > { %p7306_p2 = pnand %p7309_p1, %p8143_p6 }
0x10f7   : > { %7879 = dma.done.wait (!%p7306_p2), %s6671_s4, 16  }
0x10f8   : > { %7881 = vsyncadd (!%p7306_p2), %s6671_s4, 4294967280  ;;  %p71_p3 = scmp.ge.s32.totalorder %s8126_s26, 4   ;;  %s10421_s15 = smov %s7888_s16 }
0x10f9   : > { %s10422_s16 = smov %s7892_s18  ;;  %s10423_s18 = smov %s8137_s2 }
0x10fa   : > { %s10424_s22 = smov %s8126_s26  ;;  %73 = sbr.rel (!%p71_p3) target bundleno = 62 (0x3e), region = 237 }
0x1101   :  { %6675 = vsyncpa [#allocation3], 1 }
0x1102   :  { %6677 = vsyncpa [#allocation3 + $0x1], 1 }

</bundles_post_ra>
